<compile_context>
chip_gen: v6e
topology: v6e:2x2x1
jax: 0.10.0
libtpu: 0.0.40
codegen_flags: <defaults>
</compile_context>

<pallas_src>
import jax
import jax.numpy as jnp
from jax import lax
from jax.experimental import pallas as pl
from jax.experimental.pallas import tpu as pltpu


def _round_up(n, m):
    return ((n + m - 1) // m) * m


def _lstm_fc_kernel(x_ref, wih_ref, whh_ref, b_ref, wfc_ref, bfc_ref, out_ref):
    """Whole-sequence LSTM + Linear(H,1) for one batch tile.

    x_ref   : (BT*T, I_pad)    bf16, rows ordered b*T + t (batch-major)
    wih_ref : (I_pad, 4*H_pad) bf16, W_ih^T  (per-gate zero padded)
    whh_ref : (H_pad, 4*H_pad) bf16, W_hh^T  (per-gate zero padded)
    b_ref   : (1, 4*H_pad)     f32,  b_ih + b_hh
    wfc_ref : (1, H_pad)       f32,  fc weight row
    bfc_ref : (1, 1)           f32,  fc bias (SMEM scalar)
    out_ref : (BT, 1)          f32
    """
    BT = out_ref.shape[0]
    T = x_ref.shape[0] // BT
    H_pad = wfc_ref.shape[1]

    # (1) One wide MXU pass: input->gate pre-activations for every (b, t), plus bias.
    gx = jnp.dot(x_ref[...], wih_ref[...], preferred_element_type=jnp.float32)
    gx = (gx + b_ref[...]).reshape(BT, T, 4 * H_pad)          # f32, [b, t, gates]

    h = jnp.zeros((BT, H_pad), jnp.float32)
    c = jnp.zeros((BT, H_pad), jnp.float32)

    # (2) Sequential recurrence, fully unrolled (T is small & static): one small
    #     bf16 matmul per step; gate order follows PyTorch: [i | f | g | o].
    for t in range(T):
        gates = gx[:, t, :] + jnp.dot(h.astype(jnp.bfloat16), whh_ref[...],
                                      preferred_element_type=jnp.float32)
        i_g = jax.nn.sigmoid(gates[:, 0 * H_pad:1 * H_pad])
        f_g = jax.nn.sigmoid(gates[:, 1 * H_pad:2 * H_pad])
        g_g = jnp.tanh(gates[:, 2 * H_pad:3 * H_pad])
        o_g = jax.nn.sigmoid(gates[:, 3 * H_pad:4 * H_pad])
        c = f_g * c + i_g * g_g
        h = o_g * jnp.tanh(c)

    # (3) Linear(H, 1): VPU multiply + lane reduction instead of a 1-column MXU pass;
    #     scalar bias comes from SMEM.
    out_ref[...] = jnp.sum(h * wfc_ref[...], axis=-1, keepdims=True) + bfc_ref[0, 0]


def simple_rnn_forward(x, params, *, batch_tile=8):
    """x: (B, T, I) float32 -> (B,) float32 (matches SimpleRNN.forward + squeeze)."""
    B, T, I = x.shape
    w_ih, w_hh = params["w_ih"], params["w_hh"]
    b_ih, b_hh = params["b_ih"], params["b_hh"]
    w_fc, b_fc = params["w_fc"], params["b_fc"]
    H = w_hh.shape[1]

    BT = batch_tile
    B_pad = _round_up(B, BT)
    I_pad = _round_up(I, 128)
    H_pad = _round_up(H, 128)

    # ---- glue: pad to (8,128)-friendly tiles, cast matmul operands to bf16 ----------
    x_p = jnp.pad(x, ((0, B_pad - B), (0, 0), (0, I_pad - I)))
    x_p = x_p.reshape(B_pad * T, I_pad).astype(jnp.bfloat16)       # rows: b*T + t

    def pad_gate_w(w, in_dim, in_pad):          # (4H, in) -> (in_pad, 4*H_pad) == W^T
        w4 = w.reshape(4, H, in_dim)
        w4 = jnp.pad(w4, ((0, 0), (0, H_pad - H), (0, in_pad - in_dim)))
        return w4.reshape(4 * H_pad, in_pad).T

    wih_t = pad_gate_w(w_ih, I, I_pad).astype(jnp.bfloat16)        # (I_pad, 4H_pad)
    whh_t = pad_gate_w(w_hh, H, H_pad).astype(jnp.bfloat16)        # (H_pad, 4H_pad)

    b4 = (b_ih + b_hh).reshape(4, H)
    b_p = jnp.pad(b4, ((0, 0), (0, H_pad - H))).reshape(1, 4 * H_pad).astype(jnp.float32)

    wfc_p = jnp.pad(w_fc, ((0, 0), (0, H_pad - H))).astype(jnp.float32)   # (1, H_pad)
    bfc = b_fc.reshape(1, 1).astype(jnp.float32)

    out = pl.pallas_call(
        _lstm_fc_kernel,
        out_shape=jax.ShapeDtypeStruct((B_pad, 1), jnp.float32),
        grid=(B_pad // BT,),
        in_specs=[
            pl.BlockSpec((BT * T, I_pad), lambda b: (b, 0)),       # x (batch-major rows)
            pl.BlockSpec((I_pad, 4 * H_pad), lambda b: (0, 0)),    # W_ih^T
            pl.BlockSpec((H_pad, 4 * H_pad), lambda b: (0, 0)),    # W_hh^T
            pl.BlockSpec((1, 4 * H_pad), lambda b: (0, 0)),        # b_ih + b_hh
            pl.BlockSpec((1, H_pad), lambda b: (0, 0)),            # fc weight row
            pl.BlockSpec(memory_space=pltpu.MemorySpace.SMEM),     # fc bias scalar
        ],
        out_specs=pl.BlockSpec((BT, 1), lambda b: (b, 0)),
        compiler_params=pltpu.CompilerParams(
            # Batch tiles are independent (time loop lives entirely inside the kernel),
            # so this axis is safe to shard across v7x's two TensorCores.
            dimension_semantics=("parallel",),
            vmem_limit_bytes=32 * 1024 * 1024,
        ),
        # NOTE (v7x, production-size H): the weight specs are grid-invariant; with large
        # H, single-buffer them (pipeline_mode=pl.Buffered(1)) to halve weight residency
        # under the 64 MiB VMEM ceiling. Irrelevant at these test shapes.
    )(x_p, wih_t, whh_t, b_p, wfc_p, bfc)

    return out[:B, 0]   # squeeze -> (B,)


def simple_rnn_reference(x, params):
    """Pure-JAX f32 reference (PyTorch LSTM semantics) for correctness check."""
    w_ih, w_hh, b_ih, b_hh, w_fc, b_fc = (
        params["w_ih"], params["w_hh"], params["b_ih"],
        params["b_hh"], params["w_fc"], params["b_fc"])
    B, T, I = x.shape
    H = w_hh.shape[1]
    h = jnp.zeros((B, H), jnp.float32)
    c = jnp.zeros((B, H), jnp.float32)

    def step(carry, x_t):
        h, c = carry
        gates = x_t @ w_ih.T + b_ih + h @ w_hh.T + b_hh
        i = jax.nn.sigmoid(gates[:, 0 * H:1 * H])
        f = jax.nn.sigmoid(gates[:, 1 * H:2 * H])
        g = jnp.tanh(gates[:, 2 * H:3 * H])
        o = jax.nn.sigmoid(gates[:, 3 * H:4 * H])
        c = f * c + i * g
        h = o * jnp.tanh(c)
        return (h, c), None

    (h, c), _ = lax.scan(step, (h, c), jnp.transpose(x, (1, 0, 2)))
    return (h @ w_fc.T + b_fc)[:, 0]


def init_params(key, input_size, hidden_size):
    """Deterministic init mimicking PyTorch's uniform(-1/sqrt(H), 1/sqrt(H))."""
    ks = jax.random.split(key, 6)
    bound = 1.0 / jnp.sqrt(hidden_size)
    u = lambda k, shape: jax.random.uniform(
        k, shape, jnp.float32, minval=-bound, maxval=bound)
    return {
        "w_ih": u(ks[0], (4 * hidden_size, input_size)),
        "w_hh": u(ks[1], (4 * hidden_size, hidden_size)),
        "b_ih": u(ks[2], (4 * hidden_size,)),
        "b_hh": u(ks[3], (4 * hidden_size,)),
        "w_fc": u(ks[4], (1, hidden_size)),
        "b_fc": u(ks[5], (1,)),
    }


if __name__ == "__main__":
    B, T, I, H = 4, 8, 16, 32
    key = jax.random.PRNGKey(0)
    kx, kp = jax.random.split(key)
    x = jax.random.normal(kx, (B, T, I), dtype=jnp.float32)
    params = init_params(kp, I, H)

    out = simple_rnn_forward(x, params)
    out = jax.block_until_ready(out)

    ref = simple_rnn_reference(x, params)
    assert out.shape == (B,)
    # bf16 matmul operands -> slightly looser tolerance than pure f32.
    assert jnp.allclose(out, ref, atol=2e-2, rtol=2e-2), (out, ref)

    print("KERNEL_OK")
</pallas_src>

<mosaic_0001>
module attributes {stable_mosaic.version = 11 : i64} {
  func.func @_lstm_fc_kernel(%arg0: i32, %arg1: memref<64x128xbf16, #tpu.memory_space<vmem>>, %arg2: memref<128x512xbf16, #tpu.memory_space<vmem>>, %arg3: memref<128x512xbf16, #tpu.memory_space<vmem>>, %arg4: memref<1x512xf32, #tpu.memory_space<vmem>>, %arg5: memref<1x128xf32, #tpu.memory_space<vmem>>, %arg6: memref<1x1xf32, #tpu.memory_space<smem>>, %arg7: memref<8x1xf32, #tpu.memory_space<vmem>>) attributes {dimension_semantics = [#tpu.dimension_semantics<parallel>], iteration_bounds = array<i64: 1>, scalar_prefetch = 0 : i64, scratch_operands = 0 : i64, tpu.core_type = #tpu.core_type<tc>, window_params = [{transform_indices = @transform_0, window_bounds = array<i64: 64, 128>}, {pipeline_mode = #tpu.pipeline_mode<synchronous>, transform_indices = @transform_1, window_bounds = array<i64: 128, 512>}, {pipeline_mode = #tpu.pipeline_mode<synchronous>, transform_indices = @transform_2, window_bounds = array<i64: 128, 512>}, {pipeline_mode = #tpu.pipeline_mode<synchronous>, transform_indices = @transform_3, window_bounds = array<i64: 1, 512>}, {pipeline_mode = #tpu.pipeline_mode<synchronous>, transform_indices = @transform_4, window_bounds = array<i64: 1, 128>}, {transform_indices = @transform_5, window_bounds = array<i64: 1, 1>}, {transform_indices = @transform_6, window_bounds = array<i64: 8, 1>}]} {
    %c0 = arith.constant 0 : index
    %c0_0 = arith.constant 0 : index
    %0 = vector.load %arg1[%c0, %c0_0] : memref<64x128xbf16, #tpu.memory_space<vmem>>, vector<64x128xbf16>
    %c0_1 = arith.constant 0 : index
    %c0_2 = arith.constant 0 : index
    %1 = vector.load %arg2[%c0_1, %c0_2] : memref<128x512xbf16, #tpu.memory_space<vmem>>, vector<128x512xbf16>
    %cst = arith.constant dense<0.000000e+00> : vector<64x512xf32>
    %2 = tpu.matmul %0, %1, %cst {dimension_numbers = #tpu.dot_dimension_numbers<[1], [0], [0], [1], [0, 0, 1, 1], [], []>} : vector<64x128xbf16>, vector<128x512xbf16>, vector<64x512xf32> -> vector<64x512xf32>
    %c0_3 = arith.constant 0 : index
    %c0_4 = arith.constant 0 : index
    %3 = vector.load %arg4[%c0_3, %c0_4] : memref<1x512xf32, #tpu.memory_space<vmem>>, vector<1x512xf32>
    %4 = vector.broadcast %3 : vector<1x512xf32> to vector<64x512xf32>
    %5 = arith.addf %2, %4 : vector<64x512xf32>
    %6 = vector.shape_cast %5 : vector<64x512xf32> to vector<8x8x512xf32>
    %cst_5 = arith.constant 0.000000e+00 : f32
    %7 = vector.broadcast %cst_5 : f32 to vector<8x128xf32>
    %cst_6 = arith.constant 0.000000e+00 : f32
    %8 = vector.broadcast %cst_6 : f32 to vector<8x128xf32>
    %9 = vector.extract_strided_slice %6 {offsets = [0, 0, 0], sizes = [8, 1, 512], strides = [1, 1, 1]} : vector<8x8x512xf32> to vector<8x1x512xf32>
    %10 = vector.shape_cast %9 : vector<8x1x512xf32> to vector<8x512xf32>
    %11 = arith.truncf %7 : vector<8x128xf32> to vector<8x128xbf16>
    %c0_7 = arith.constant 0 : index
    %c0_8 = arith.constant 0 : index
    %12 = vector.load %arg3[%c0_7, %c0_8] : memref<128x512xbf16, #tpu.memory_space<vmem>>, vector<128x512xbf16>
    %cst_9 = arith.constant dense<0.000000e+00> : vector<8x512xf32>
    %13 = tpu.matmul %11, %12, %cst_9 {dimension_numbers = #tpu.dot_dimension_numbers<[1], [0], [0], [1], [0, 0, 1, 1], [], []>} : vector<8x128xbf16>, vector<128x512xbf16>, vector<8x512xf32> -> vector<8x512xf32>
    %14 = arith.addf %10, %13 : vector<8x512xf32>
    %15 = vector.extract_strided_slice %14 {offsets = [0, 0], sizes = [8, 128], strides = [1, 1]} : vector<8x512xf32> to vector<8x128xf32>
    %16 = arith.negf %15 : vector<8x128xf32>
    %17 = math.exp %16 : vector<8x128xf32>
    %cst_10 = arith.constant 1.000000e+00 : f32
    %18 = vector.broadcast %cst_10 : f32 to vector<8x128xf32>
    %19 = arith.addf %18, %17 : vector<8x128xf32>
    %20 = arith.divf %18, %19 : vector<8x128xf32>
    %21 = vector.extract_strided_slice %14 {offsets = [0, 128], sizes = [8, 128], strides = [1, 1]} : vector<8x512xf32> to vector<8x128xf32>
    %22 = arith.negf %21 : vector<8x128xf32>
    %23 = math.exp %22 : vector<8x128xf32>
    %cst_11 = arith.constant 1.000000e+00 : f32
    %24 = vector.broadcast %cst_11 : f32 to vector<8x128xf32>
    %25 = arith.addf %24, %23 : vector<8x128xf32>
    %26 = arith.divf %24, %25 : vector<8x128xf32>
    %27 = vector.extract_strided_slice %14 {offsets = [0, 256], sizes = [8, 128], strides = [1, 1]} : vector<8x512xf32> to vector<8x128xf32>
    %28 = math.tanh %27 : vector<8x128xf32>
    %29 = vector.extract_strided_slice %14 {offsets = [0, 384], sizes = [8, 128], strides = [1, 1]} : vector<8x512xf32> to vector<8x128xf32>
    %30 = arith.negf %29 : vector<8x128xf32>
    %31 = math.exp %30 : vector<8x128xf32>
    %cst_12 = arith.constant 1.000000e+00 : f32
    %32 = vector.broadcast %cst_12 : f32 to vector<8x128xf32>
    %33 = arith.addf %32, %31 : vector<8x128xf32>
    %34 = arith.divf %32, %33 : vector<8x128xf32>
    %35 = arith.mulf %26, %8 : vector<8x128xf32>
    %36 = arith.mulf %20, %28 : vector<8x128xf32>
    %37 = arith.addf %35, %36 : vector<8x128xf32>
    %38 = math.tanh %37 : vector<8x128xf32>
    %39 = arith.mulf %34, %38 : vector<8x128xf32>
    %40 = vector.extract_strided_slice %6 {offsets = [0, 1, 0], sizes = [8, 1, 512], strides = [1, 1, 1]} : vector<8x8x512xf32> to vector<8x1x512xf32>
    %41 = vector.shape_cast %40 : vector<8x1x512xf32> to vector<8x512xf32>
    %42 = arith.truncf %39 : vector<8x128xf32> to vector<8x128xbf16>
    %c0_13 = arith.constant 0 : index
    %c0_14 = arith.constant 0 : index
    %43 = vector.load %arg3[%c0_13, %c0_14] : memref<128x512xbf16, #tpu.memory_space<vmem>>, vector<128x512xbf16>
    %cst_15 = arith.constant dense<0.000000e+00> : vector<8x512xf32>
    %44 = tpu.matmul %42, %43, %cst_15 {dimension_numbers = #tpu.dot_dimension_numbers<[1], [0], [0], [1], [0, 0, 1, 1], [], []>} : vector<8x128xbf16>, vector<128x512xbf16>, vector<8x512xf32> -> vector<8x512xf32>
    %45 = arith.addf %41, %44 : vector<8x512xf32>
    %46 = vector.extract_strided_slice %45 {offsets = [0, 0], sizes = [8, 128], strides = [1, 1]} : vector<8x512xf32> to vector<8x128xf32>
    %47 = arith.negf %46 : vector<8x128xf32>
    %48 = math.exp %47 : vector<8x128xf32>
    %cst_16 = arith.constant 1.000000e+00 : f32
    %49 = vector.broadcast %cst_16 : f32 to vector<8x128xf32>
    %50 = arith.addf %49, %48 : vector<8x128xf32>
    %51 = arith.divf %49, %50 : vector<8x128xf32>
    %52 = vector.extract_strided_slice %45 {offsets = [0, 128], sizes = [8, 128], strides = [1, 1]} : vector<8x512xf32> to vector<8x128xf32>
    %53 = arith.negf %52 : vector<8x128xf32>
    %54 = math.exp %53 : vector<8x128xf32>
    %cst_17 = arith.constant 1.000000e+00 : f32
    %55 = vector.broadcast %cst_17 : f32 to vector<8x128xf32>
    %56 = arith.addf %55, %54 : vector<8x128xf32>
    %57 = arith.divf %55, %56 : vector<8x128xf32>
    %58 = vector.extract_strided_slice %45 {offsets = [0, 256], sizes = [8, 128], strides = [1, 1]} : vector<8x512xf32> to vector<8x128xf32>
    %59 = math.tanh %58 : vector<8x128xf32>
    %60 = vector.extract_strided_slice %45 {offsets = [0, 384], sizes = [8, 128], strides = [1, 1]} : vector<8x512xf32> to vector<8x128xf32>
    %61 = arith.negf %60 : vector<8x128xf32>
    %62 = math.exp %61 : vector<8x128xf32>
    %cst_18 = arith.constant 1.000000e+00 : f32
    %63 = vector.broadcast %cst_18 : f32 to vector<8x128xf32>
    %64 = arith.addf %63, %62 : vector<8x128xf32>
    %65 = arith.divf %63, %64 : vector<8x128xf32>
    %66 = arith.mulf %57, %37 : vector<8x128xf32>
    %67 = arith.mulf %51, %59 : vector<8x128xf32>
    %68 = arith.addf %66, %67 : vector<8x128xf32>
    %69 = math.tanh %68 : vector<8x128xf32>
    %70 = arith.mulf %65, %69 : vector<8x128xf32>
    %71 = vector.extract_strided_slice %6 {offsets = [0, 2, 0], sizes = [8, 1, 512], strides = [1, 1, 1]} : vector<8x8x512xf32> to vector<8x1x512xf32>
    %72 = vector.shape_cast %71 : vector<8x1x512xf32> to vector<8x512xf32>
    %73 = arith.truncf %70 : vector<8x128xf32> to vector<8x128xbf16>
    %c0_19 = arith.constant 0 : index
    %c0_20 = arith.constant 0 : index
    %74 = vector.load %arg3[%c0_19, %c0_20] : memref<128x512xbf16, #tpu.memory_space<vmem>>, vector<128x512xbf16>
    %cst_21 = arith.constant dense<0.000000e+00> : vector<8x512xf32>
    %75 = tpu.matmul %73, %74, %cst_21 {dimension_numbers = #tpu.dot_dimension_numbers<[1], [0], [0], [1], [0, 0, 1, 1], [], []>} : vector<8x128xbf16>, vector<128x512xbf16>, vector<8x512xf32> -> vector<8x512xf32>
    %76 = arith.addf %72, %75 : vector<8x512xf32>
    %77 = vector.extract_strided_slice %76 {offsets = [0, 0], sizes = [8, 128], strides = [1, 1]} : vector<8x512xf32> to vector<8x128xf32>
    %78 = arith.negf %77 : vector<8x128xf32>
    %79 = math.exp %78 : vector<8x128xf32>
    %cst_22 = arith.constant 1.000000e+00 : f32
    %80 = vector.broadcast %cst_22 : f32 to vector<8x128xf32>
    %81 = arith.addf %80, %79 : vector<8x128xf32>
    %82 = arith.divf %80, %81 : vector<8x128xf32>
    %83 = vector.extract_strided_slice %76 {offsets = [0, 128], sizes = [8, 128], strides = [1, 1]} : vector<8x512xf32> to vector<8x128xf32>
    %84 = arith.negf %83 : vector<8x128xf32>
    %85 = math.exp %84 : vector<8x128xf32>
    %cst_23 = arith.constant 1.000000e+00 : f32
    %86 = vector.broadcast %cst_23 : f32 to vector<8x128xf32>
    %87 = arith.addf %86, %85 : vector<8x128xf32>
    %88 = arith.divf %86, %87 : vector<8x128xf32>
    %89 = vector.extract_strided_slice %76 {offsets = [0, 256], sizes = [8, 128], strides = [1, 1]} : vector<8x512xf32> to vector<8x128xf32>
    %90 = math.tanh %89 : vector<8x128xf32>
    %91 = vector.extract_strided_slice %76 {offsets = [0, 384], sizes = [8, 128], strides = [1, 1]} : vector<8x512xf32> to vector<8x128xf32>
    %92 = arith.negf %91 : vector<8x128xf32>
    %93 = math.exp %92 : vector<8x128xf32>
    %cst_24 = arith.constant 1.000000e+00 : f32
    %94 = vector.broadcast %cst_24 : f32 to vector<8x128xf32>
    %95 = arith.addf %94, %93 : vector<8x128xf32>
    %96 = arith.divf %94, %95 : vector<8x128xf32>
    %97 = arith.mulf %88, %68 : vector<8x128xf32>
    %98 = arith.mulf %82, %90 : vector<8x128xf32>
    %99 = arith.addf %97, %98 : vector<8x128xf32>
    %100 = math.tanh %99 : vector<8x128xf32>
    %101 = arith.mulf %96, %100 : vector<8x128xf32>
    %102 = vector.extract_strided_slice %6 {offsets = [0, 3, 0], sizes = [8, 1, 512], strides = [1, 1, 1]} : vector<8x8x512xf32> to vector<8x1x512xf32>
    %103 = vector.shape_cast %102 : vector<8x1x512xf32> to vector<8x512xf32>
    %104 = arith.truncf %101 : vector<8x128xf32> to vector<8x128xbf16>
    %c0_25 = arith.constant 0 : index
    %c0_26 = arith.constant 0 : index
    %105 = vector.load %arg3[%c0_25, %c0_26] : memref<128x512xbf16, #tpu.memory_space<vmem>>, vector<128x512xbf16>
    %cst_27 = arith.constant dense<0.000000e+00> : vector<8x512xf32>
    %106 = tpu.matmul %104, %105, %cst_27 {dimension_numbers = #tpu.dot_dimension_numbers<[1], [0], [0], [1], [0, 0, 1, 1], [], []>} : vector<8x128xbf16>, vector<128x512xbf16>, vector<8x512xf32> -> vector<8x512xf32>
    %107 = arith.addf %103, %106 : vector<8x512xf32>
    %108 = vector.extract_strided_slice %107 {offsets = [0, 0], sizes = [8, 128], strides = [1, 1]} : vector<8x512xf32> to vector<8x128xf32>
    %109 = arith.negf %108 : vector<8x128xf32>
    %110 = math.exp %109 : vector<8x128xf32>
    %cst_28 = arith.constant 1.000000e+00 : f32
    %111 = vector.broadcast %cst_28 : f32 to vector<8x128xf32>
    %112 = arith.addf %111, %110 : vector<8x128xf32>
    %113 = arith.divf %111, %112 : vector<8x128xf32>
    %114 = vector.extract_strided_slice %107 {offsets = [0, 128], sizes = [8, 128], strides = [1, 1]} : vector<8x512xf32> to vector<8x128xf32>
    %115 = arith.negf %114 : vector<8x128xf32>
    %116 = math.exp %115 : vector<8x128xf32>
    %cst_29 = arith.constant 1.000000e+00 : f32
    %117 = vector.broadcast %cst_29 : f32 to vector<8x128xf32>
    %118 = arith.addf %117, %116 : vector<8x128xf32>
    %119 = arith.divf %117, %118 : vector<8x128xf32>
    %120 = vector.extract_strided_slice %107 {offsets = [0, 256], sizes = [8, 128], strides = [1, 1]} : vector<8x512xf32> to vector<8x128xf32>
    %121 = math.tanh %120 : vector<8x128xf32>
    %122 = vector.extract_strided_slice %107 {offsets = [0, 384], sizes = [8, 128], strides = [1, 1]} : vector<8x512xf32> to vector<8x128xf32>
    %123 = arith.negf %122 : vector<8x128xf32>
    %124 = math.exp %123 : vector<8x128xf32>
    %cst_30 = arith.constant 1.000000e+00 : f32
    %125 = vector.broadcast %cst_30 : f32 to vector<8x128xf32>
    %126 = arith.addf %125, %124 : vector<8x128xf32>
    %127 = arith.divf %125, %126 : vector<8x128xf32>
    %128 = arith.mulf %119, %99 : vector<8x128xf32>
    %129 = arith.mulf %113, %121 : vector<8x128xf32>
    %130 = arith.addf %128, %129 : vector<8x128xf32>
    %131 = math.tanh %130 : vector<8x128xf32>
    %132 = arith.mulf %127, %131 : vector<8x128xf32>
    %133 = vector.extract_strided_slice %6 {offsets = [0, 4, 0], sizes = [8, 1, 512], strides = [1, 1, 1]} : vector<8x8x512xf32> to vector<8x1x512xf32>
    %134 = vector.shape_cast %133 : vector<8x1x512xf32> to vector<8x512xf32>
    %135 = arith.truncf %132 : vector<8x128xf32> to vector<8x128xbf16>
    %c0_31 = arith.constant 0 : index
    %c0_32 = arith.constant 0 : index
    %136 = vector.load %arg3[%c0_31, %c0_32] : memref<128x512xbf16, #tpu.memory_space<vmem>>, vector<128x512xbf16>
    %cst_33 = arith.constant dense<0.000000e+00> : vector<8x512xf32>
    %137 = tpu.matmul %135, %136, %cst_33 {dimension_numbers = #tpu.dot_dimension_numbers<[1], [0], [0], [1], [0, 0, 1, 1], [], []>} : vector<8x128xbf16>, vector<128x512xbf16>, vector<8x512xf32> -> vector<8x512xf32>
    %138 = arith.addf %134, %137 : vector<8x512xf32>
    %139 = vector.extract_strided_slice %138 {offsets = [0, 0], sizes = [8, 128], strides = [1, 1]} : vector<8x512xf32> to vector<8x128xf32>
    %140 = arith.negf %139 : vector<8x128xf32>
    %141 = math.exp %140 : vector<8x128xf32>
    %cst_34 = arith.constant 1.000000e+00 : f32
    %142 = vector.broadcast %cst_34 : f32 to vector<8x128xf32>
    %143 = arith.addf %142, %141 : vector<8x128xf32>
    %144 = arith.divf %142, %143 : vector<8x128xf32>
    %145 = vector.extract_strided_slice %138 {offsets = [0, 128], sizes = [8, 128], strides = [1, 1]} : vector<8x512xf32> to vector<8x128xf32>
    %146 = arith.negf %145 : vector<8x128xf32>
    %147 = math.exp %146 : vector<8x128xf32>
    %cst_35 = arith.constant 1.000000e+00 : f32
    %148 = vector.broadcast %cst_35 : f32 to vector<8x128xf32>
    %149 = arith.addf %148, %147 : vector<8x128xf32>
    %150 = arith.divf %148, %149 : vector<8x128xf32>
    %151 = vector.extract_strided_slice %138 {offsets = [0, 256], sizes = [8, 128], strides = [1, 1]} : vector<8x512xf32> to vector<8x128xf32>
    %152 = math.tanh %151 : vector<8x128xf32>
    %153 = vector.extract_strided_slice %138 {offsets = [0, 384], sizes = [8, 128], strides = [1, 1]} : vector<8x512xf32> to vector<8x128xf32>
    %154 = arith.negf %153 : vector<8x128xf32>
    %155 = math.exp %154 : vector<8x128xf32>
    %cst_36 = arith.constant 1.000000e+00 : f32
    %156 = vector.broadcast %cst_36 : f32 to vector<8x128xf32>
    %157 = arith.addf %156, %155 : vector<8x128xf32>
    %158 = arith.divf %156, %157 : vector<8x128xf32>
    %159 = arith.mulf %150, %130 : vector<8x128xf32>
    %160 = arith.mulf %144, %152 : vector<8x128xf32>
    %161 = arith.addf %159, %160 : vector<8x128xf32>
    %162 = math.tanh %161 : vector<8x128xf32>
    %163 = arith.mulf %158, %162 : vector<8x128xf32>
    %164 = vector.extract_strided_slice %6 {offsets = [0, 5, 0], sizes = [8, 1, 512], strides = [1, 1, 1]} : vector<8x8x512xf32> to vector<8x1x512xf32>
    %165 = vector.shape_cast %164 : vector<8x1x512xf32> to vector<8x512xf32>
    %166 = arith.truncf %163 : vector<8x128xf32> to vector<8x128xbf16>
    %c0_37 = arith.constant 0 : index
    %c0_38 = arith.constant 0 : index
    %167 = vector.load %arg3[%c0_37, %c0_38] : memref<128x512xbf16, #tpu.memory_space<vmem>>, vector<128x512xbf16>
    %cst_39 = arith.constant dense<0.000000e+00> : vector<8x512xf32>
    %168 = tpu.matmul %166, %167, %cst_39 {dimension_numbers = #tpu.dot_dimension_numbers<[1], [0], [0], [1], [0, 0, 1, 1], [], []>} : vector<8x128xbf16>, vector<128x512xbf16>, vector<8x512xf32> -> vector<8x512xf32>
    %169 = arith.addf %165, %168 : vector<8x512xf32>
    %170 = vector.extract_strided_slice %169 {offsets = [0, 0], sizes = [8, 128], strides = [1, 1]} : vector<8x512xf32> to vector<8x128xf32>
    %171 = arith.negf %170 : vector<8x128xf32>
    %172 = math.exp %171 : vector<8x128xf32>
    %cst_40 = arith.constant 1.000000e+00 : f32
    %173 = vector.broadcast %cst_40 : f32 to vector<8x128xf32>
    %174 = arith.addf %173, %172 : vector<8x128xf32>
    %175 = arith.divf %173, %174 : vector<8x128xf32>
    %176 = vector.extract_strided_slice %169 {offsets = [0, 128], sizes = [8, 128], strides = [1, 1]} : vector<8x512xf32> to vector<8x128xf32>
    %177 = arith.negf %176 : vector<8x128xf32>
    %178 = math.exp %177 : vector<8x128xf32>
    %cst_41 = arith.constant 1.000000e+00 : f32
    %179 = vector.broadcast %cst_41 : f32 to vector<8x128xf32>
    %180 = arith.addf %179, %178 : vector<8x128xf32>
    %181 = arith.divf %179, %180 : vector<8x128xf32>
    %182 = vector.extract_strided_slice %169 {offsets = [0, 256], sizes = [8, 128], strides = [1, 1]} : vector<8x512xf32> to vector<8x128xf32>
    %183 = math.tanh %182 : vector<8x128xf32>
    %184 = vector.extract_strided_slice %169 {offsets = [0, 384], sizes = [8, 128], strides = [1, 1]} : vector<8x512xf32> to vector<8x128xf32>
    %185 = arith.negf %184 : vector<8x128xf32>
    %186 = math.exp %185 : vector<8x128xf32>
    %cst_42 = arith.constant 1.000000e+00 : f32
    %187 = vector.broadcast %cst_42 : f32 to vector<8x128xf32>
    %188 = arith.addf %187, %186 : vector<8x128xf32>
    %189 = arith.divf %187, %188 : vector<8x128xf32>
    %190 = arith.mulf %181, %161 : vector<8x128xf32>
    %191 = arith.mulf %175, %183 : vector<8x128xf32>
    %192 = arith.addf %190, %191 : vector<8x128xf32>
    %193 = math.tanh %192 : vector<8x128xf32>
    %194 = arith.mulf %189, %193 : vector<8x128xf32>
    %195 = vector.extract_strided_slice %6 {offsets = [0, 6, 0], sizes = [8, 1, 512], strides = [1, 1, 1]} : vector<8x8x512xf32> to vector<8x1x512xf32>
    %196 = vector.shape_cast %195 : vector<8x1x512xf32> to vector<8x512xf32>
    %197 = arith.truncf %194 : vector<8x128xf32> to vector<8x128xbf16>
    %c0_43 = arith.constant 0 : index
    %c0_44 = arith.constant 0 : index
    %198 = vector.load %arg3[%c0_43, %c0_44] : memref<128x512xbf16, #tpu.memory_space<vmem>>, vector<128x512xbf16>
    %cst_45 = arith.constant dense<0.000000e+00> : vector<8x512xf32>
    %199 = tpu.matmul %197, %198, %cst_45 {dimension_numbers = #tpu.dot_dimension_numbers<[1], [0], [0], [1], [0, 0, 1, 1], [], []>} : vector<8x128xbf16>, vector<128x512xbf16>, vector<8x512xf32> -> vector<8x512xf32>
    %200 = arith.addf %196, %199 : vector<8x512xf32>
    %201 = vector.extract_strided_slice %200 {offsets = [0, 0], sizes = [8, 128], strides = [1, 1]} : vector<8x512xf32> to vector<8x128xf32>
    %202 = arith.negf %201 : vector<8x128xf32>
    %203 = math.exp %202 : vector<8x128xf32>
    %cst_46 = arith.constant 1.000000e+00 : f32
    %204 = vector.broadcast %cst_46 : f32 to vector<8x128xf32>
    %205 = arith.addf %204, %203 : vector<8x128xf32>
    %206 = arith.divf %204, %205 : vector<8x128xf32>
    %207 = vector.extract_strided_slice %200 {offsets = [0, 128], sizes = [8, 128], strides = [1, 1]} : vector<8x512xf32> to vector<8x128xf32>
    %208 = arith.negf %207 : vector<8x128xf32>
    %209 = math.exp %208 : vector<8x128xf32>
    %cst_47 = arith.constant 1.000000e+00 : f32
    %210 = vector.broadcast %cst_47 : f32 to vector<8x128xf32>
    %211 = arith.addf %210, %209 : vector<8x128xf32>
    %212 = arith.divf %210, %211 : vector<8x128xf32>
    %213 = vector.extract_strided_slice %200 {offsets = [0, 256], sizes = [8, 128], strides = [1, 1]} : vector<8x512xf32> to vector<8x128xf32>
    %214 = math.tanh %213 : vector<8x128xf32>
    %215 = vector.extract_strided_slice %200 {offsets = [0, 384], sizes = [8, 128], strides = [1, 1]} : vector<8x512xf32> to vector<8x128xf32>
    %216 = arith.negf %215 : vector<8x128xf32>
    %217 = math.exp %216 : vector<8x128xf32>
    %cst_48 = arith.constant 1.000000e+00 : f32
    %218 = vector.broadcast %cst_48 : f32 to vector<8x128xf32>
    %219 = arith.addf %218, %217 : vector<8x128xf32>
    %220 = arith.divf %218, %219 : vector<8x128xf32>
    %221 = arith.mulf %212, %192 : vector<8x128xf32>
    %222 = arith.mulf %206, %214 : vector<8x128xf32>
    %223 = arith.addf %221, %222 : vector<8x128xf32>
    %224 = math.tanh %223 : vector<8x128xf32>
    %225 = arith.mulf %220, %224 : vector<8x128xf32>
    %226 = vector.extract_strided_slice %6 {offsets = [0, 7, 0], sizes = [8, 1, 512], strides = [1, 1, 1]} : vector<8x8x512xf32> to vector<8x1x512xf32>
    %227 = vector.shape_cast %226 : vector<8x1x512xf32> to vector<8x512xf32>
    %228 = arith.truncf %225 : vector<8x128xf32> to vector<8x128xbf16>
    %c0_49 = arith.constant 0 : index
    %c0_50 = arith.constant 0 : index
    %229 = vector.load %arg3[%c0_49, %c0_50] : memref<128x512xbf16, #tpu.memory_space<vmem>>, vector<128x512xbf16>
    %cst_51 = arith.constant dense<0.000000e+00> : vector<8x512xf32>
    %230 = tpu.matmul %228, %229, %cst_51 {dimension_numbers = #tpu.dot_dimension_numbers<[1], [0], [0], [1], [0, 0, 1, 1], [], []>} : vector<8x128xbf16>, vector<128x512xbf16>, vector<8x512xf32> -> vector<8x512xf32>
    %231 = arith.addf %227, %230 : vector<8x512xf32>
    %232 = vector.extract_strided_slice %231 {offsets = [0, 0], sizes = [8, 128], strides = [1, 1]} : vector<8x512xf32> to vector<8x128xf32>
    %233 = arith.negf %232 : vector<8x128xf32>
    %234 = math.exp %233 : vector<8x128xf32>
    %cst_52 = arith.constant 1.000000e+00 : f32
    %235 = vector.broadcast %cst_52 : f32 to vector<8x128xf32>
    %236 = arith.addf %235, %234 : vector<8x128xf32>
    %237 = arith.divf %235, %236 : vector<8x128xf32>
    %238 = vector.extract_strided_slice %231 {offsets = [0, 128], sizes = [8, 128], strides = [1, 1]} : vector<8x512xf32> to vector<8x128xf32>
    %239 = arith.negf %238 : vector<8x128xf32>
    %240 = math.exp %239 : vector<8x128xf32>
    %cst_53 = arith.constant 1.000000e+00 : f32
    %241 = vector.broadcast %cst_53 : f32 to vector<8x128xf32>
    %242 = arith.addf %241, %240 : vector<8x128xf32>
    %243 = arith.divf %241, %242 : vector<8x128xf32>
    %244 = vector.extract_strided_slice %231 {offsets = [0, 256], sizes = [8, 128], strides = [1, 1]} : vector<8x512xf32> to vector<8x128xf32>
    %245 = math.tanh %244 : vector<8x128xf32>
    %246 = vector.extract_strided_slice %231 {offsets = [0, 384], sizes = [8, 128], strides = [1, 1]} : vector<8x512xf32> to vector<8x128xf32>
    %247 = arith.negf %246 : vector<8x128xf32>
    %248 = math.exp %247 : vector<8x128xf32>
    %cst_54 = arith.constant 1.000000e+00 : f32
    %249 = vector.broadcast %cst_54 : f32 to vector<8x128xf32>
    %250 = arith.addf %249, %248 : vector<8x128xf32>
    %251 = arith.divf %249, %250 : vector<8x128xf32>
    %252 = arith.mulf %243, %223 : vector<8x128xf32>
    %253 = arith.mulf %237, %245 : vector<8x128xf32>
    %254 = arith.addf %252, %253 : vector<8x128xf32>
    %255 = math.tanh %254 : vector<8x128xf32>
    %256 = arith.mulf %251, %255 : vector<8x128xf32>
    %c0_55 = arith.constant 0 : index
    %c0_56 = arith.constant 0 : index
    %257 = vector.load %arg5[%c0_55, %c0_56] : memref<1x128xf32, #tpu.memory_space<vmem>>, vector<1x128xf32>
    %258 = vector.broadcast %257 : vector<1x128xf32> to vector<8x128xf32>
    %259 = arith.mulf %256, %258 : vector<8x128xf32>
    %cst_57 = arith.constant dense<0.000000e+00> : vector<8xf32>
    %260 = vector.multi_reduction <add>, %259, %cst_57 [1] : vector<8x128xf32> to vector<8xf32>
    %261 = vector.shape_cast %260 : vector<8xf32> to vector<8x1xf32>
    %c0_58 = arith.constant 0 : index
    %c0_59 = arith.constant 0 : index
    %262 = memref.load %arg6[%c0_58, %c0_59] : memref<1x1xf32, #tpu.memory_space<smem>>
    %263 = vector.broadcast %262 : f32 to vector<8x1xf32>
    %264 = arith.addf %261, %263 : vector<8x1xf32>
    %c0_60 = arith.constant 0 : index
    %c0_61 = arith.constant 0 : index
    %265 = vector.load %arg7[%c0_60, %c0_61] : memref<8x1xf32, #tpu.memory_space<vmem>>, vector<8x1xf32>
    tpu.vector_store %arg7[%c0_60, %c0_61], %264 {strides = array<i32>} : memref<8x1xf32, #tpu.memory_space<vmem>>, vector<8x1xf32>,
    return
  }
  func.func @transform_0(%arg0: i32) -> (i32, i32) {
    %c0_i32 = arith.constant 0 : i32
    %c0_i32_0 = arith.constant 0 : i32
    return %arg0, %c0_i32 : i32, i32
  }
  func.func @transform_1(%arg0: i32) -> (i32, i32) {
    %c0_i32 = arith.constant 0 : i32
    %c0_i32_0 = arith.constant 0 : i32
    %c0_i32_1 = arith.constant 0 : i32
    return %c0_i32, %c0_i32_0 : i32, i32
  }
  func.func @transform_2(%arg0: i32) -> (i32, i32) {
    %c0_i32 = arith.constant 0 : i32
    %c0_i32_0 = arith.constant 0 : i32
    %c0_i32_1 = arith.constant 0 : i32
    return %c0_i32, %c0_i32_0 : i32, i32
  }
  func.func @transform_3(%arg0: i32) -> (i32, i32) {
    %c0_i32 = arith.constant 0 : i32
    %c0_i32_0 = arith.constant 0 : i32
    %c0_i32_1 = arith.constant 0 : i32
    return %c0_i32, %c0_i32_0 : i32, i32
  }
  func.func @transform_4(%arg0: i32) -> (i32, i32) {
    %c0_i32 = arith.constant 0 : i32
    %c0_i32_0 = arith.constant 0 : i32
    %c0_i32_1 = arith.constant 0 : i32
    return %c0_i32, %c0_i32_0 : i32, i32
  }
  func.func @transform_5(%arg0: i32) -> (i32, i32) {
    %c0_i32 = arith.constant 0 : i32
    %c0_i32_0 = arith.constant 0 : i32
    %c0_i32_1 = arith.constant 0 : i32
    return %c0_i32, %c0_i32_0 : i32, i32
  }
  func.func @transform_6(%arg0: i32) -> (i32, i32) {
    %c0_i32 = arith.constant 0 : i32
    %c0_i32_0 = arith.constant 0 : i32
    return %arg0, %c0_i32 : i32, i32
  }
}

</mosaic_0001>

<bundles_post_ra>
// kernel: tpu_custom_call.1
= control target key start
LH: loop header
LB: loop body
LE: loop exit
PB: predicated region body
PF: predicated region fallthrough
CT: control target
= control target key end

     0   :  { %12 = vsyncpa [#allocation4], 0  ;;  %s7472_s0 = inlined_call_operand.hbm [shape: bf16[64,128], index: 0, kind: input, shape index: {}]   ;;  %s7473_s1 = inlined_call_operand.hbm [shape: bf16[128,512], index: 1, kind: input, shape index: {}]   ;;  %s7474_s2 = inlined_call_operand.hbm [shape: bf16[128,512], index: 2, kind: input, shape index: {}]   ;;  %s7475_s3 = inlined_call_operand.vmem [shape: f32[1,512], index: 3, kind: input, shape index: {}]   ;;  %s7476_s4 = inlined_call_operand.vmem [shape: f32[1,128], index: 4, kind: input, shape index: {}]   ;;  %s7477_s5 = inlined_call_operand.<no memory space> [shape: f32[1,1], index: 5, kind: input, shape index: {}]   ;;  %s7478_s6 = inlined_call_operand.vmem [shape: f32[8,1], index: 6, kind: output, shape index: {}]  }
   0x1   :  { %13 = vsyncpa [#allocation6], 0  ;;  %s5677_s21 = smov [#allocation5]  }
   0x2   :  { %s31_s22 = sshll.u32 %s5677_s21, 4  ;;  %s32_s22 = int_to_ptr.vmem [resolvable:$true] %s31_s22 }
   0x3   :  { %s5621_s23 = scalar_lea.vmem %s32_s22, 4096  ;;  %p5626_p1 = scmp.lt.s32.totalorder %s32_s22, %s32_s22 }
   0x4   :  { %p5622_p0 = scmp.ne.s32.totalorder %s32_s22, %s5621_s23  ;;  %p5627_p2 = scmp.lt.s32.totalorder %s5621_s23, %s5621_s23 }
   0x6   :  { %p5628_p3 = por %p5627_p2, %p5626_p1 }
   0x8   :  { %p5629_p4 = pnand %p5628_p3, %p5622_p0 }
   0xa   :  { %5632 = shalt.err (!%p5629_p4)
}
   0xb   :  { %s5678_s24 = smov 256   ;;  %s5679_s25 = smov 16  }
   0xc   :  { %37 = dma.hbm_to_vmem [thread:$0]  %s7473_s1, 4096, %s32_s22, [#allocation6], %s5678_s24, %s5678_s24, %s5679_s25  }
   0xd   :  { %s5680_s28 = smov [#allocation3]  }
   0xe   :  { %s19_s29 = sshll.u32 %s5680_s28, 4  ;;  %s20_s29 = int_to_ptr.vmem [resolvable:$true] %s19_s29 }
   0xf   :  { %s5641_s30 = scalar_lea.vmem %s20_s29, 512  ;;  %p5646_p6 = scmp.lt.s32.totalorder %s20_s29, %s20_s29 }
  0x10   :  { %p5642_p5 = scmp.ne.s32.totalorder %s20_s29, %s5641_s30  ;;  %p5647_p7 = scmp.lt.s32.totalorder %s5641_s30, %s5641_s30 }
  0x12   :  { %p5648_p8 = por %p5647_p7, %p5646_p6 }
  0x14   :  { %p5649_p9 = pnand %p5648_p8, %p5642_p5 }
  0x16   :  { %5652 = shalt.err (!%p5649_p9)
}
  0x17   :  { %s5681_s7 = smov 64   ;;  %s5682_s8 = smov 4  }
  0x18   :  { %25 = dma.hbm_to_vmem [thread:$0]  %s7472_s0, 512, %s20_s29, [#allocation4], %s5681_s7, %s5681_s7, %s5682_s8  }
  0x19   :  { %s5683_s11 = smov [#allocation7]  }
  0x1a   :  { %s43_s12 = sshll.u32 %s5683_s11, 4  ;;  %s44_s12 = int_to_ptr.vmem [resolvable:$true] %s43_s12 }
  0x1b   :  { %s5661_s1 = scalar_lea.vmem %s44_s12, 4096  ;;  %p5666_p11 = scmp.lt.s32.totalorder %s44_s12, %s44_s12 }
  0x1c   :  { %p5662_p10 = scmp.ne.s32.totalorder %s44_s12, %s5661_s1  ;;  %p5667_p12 = scmp.lt.s32.totalorder %s5661_s1, %s5661_s1 }
  0x1e   :  { %p5668_p13 = por %p5667_p12, %p5666_p11 }
  0x20   :  { %p5669_p0 = pnand %p5668_p13, %p5662_p10 }
  0x22   :  { %5672 = shalt.err (!%p5669_p0)
}
  0x23   :  { %49 = dma.hbm_to_vmem [thread:$0]  %s7474_s2, 4096, %s44_s12, [#allocation6], %s5678_s24, %s5678_s24, %s5679_s25  }
  0x24   :  { %5673 = dma.done.wait [#allocation4], 512  }
  0x25   :  { %5674 = vsyncadd [#allocation4], 4294966784 }
  0x26   :  { %5675 = dma.done.wait [#allocation6], 8192  }
  0x27   :  { %5676 = vsyncadd [#allocation6], 4294959104  ;;  %v7479_v0 = vmov 0   ;;  %v4393_v1 = vld [vmem:[#allocation5 + $0xe4] ss:$16 sps:$4 sm:$0xff]   ;;  %v4454_v44 = vld [vmem:[#allocation3 + $0x8] sm:$0xff]  }
  0x28   :  { %344 = vmatprep.mubr.bf16.mxu0 %v7479_v0  ;;  %417 = vmatprep.mubr.bf16.mxu1 %v7479_v0  ;;  %v4395_v2 = vld [vmem:[#allocation5 + $0xec] ss:$16 sps:$4 sm:$0xff]   ;;  %v4397_v3 = vld [vmem:[#allocation5 + $0xe0] ss:$16 sps:$4 sm:$0xff]   ;;  %v4398_v4 = vld [vmem:[#allocation5 + $0xe8] ss:$16 sps:$4 sm:$0xff]  }
  0x29   :  { %312 = vmatprep.subr.bf16.mxu0 %v4393_v1  ;;  %385 = vmatprep.subr.bf16.mxu1 %v4395_v2  ;;  %v4399_v5 = vld [vmem:[#allocation5 + $0xc4] ss:$16 sps:$4 sm:$0xff]   ;;  %v4401_v6 = vld [vmem:[#allocation5 + $0xcc] ss:$16 sps:$4 sm:$0xff]   ;;  %v4403_v7 = vld [vmem:[#allocation5 + $0xc0] ss:$16 sps:$4 sm:$0xff]  }
  0x2a   :  { %313 = vmatpush1.bf16.msra.mxu0 %v4397_v3  ;;  %386 = vmatpush1.bf16.msra.mxu1 %v4398_v4  ;;  %v4404_v8 = vld [vmem:[#allocation5 + $0xc8] ss:$16 sps:$4 sm:$0xff]   ;;  %v4405_v9 = vld [vmem:[#allocation5 + $0xa4] ss:$16 sps:$4 sm:$0xff]   ;;  %v4407_v10 = vld [vmem:[#allocation5 + $0xac] ss:$16 sps:$4 sm:$0xff]  }
  0x2b   :  { %314 = vmatprep.subr.bf16.mxu0 %v4399_v5  ;;  %387 = vmatprep.subr.bf16.mxu1 %v4401_v6  ;;  %v4409_v11 = vld [vmem:[#allocation5 + $0xa0] ss:$16 sps:$4 sm:$0xff]   ;;  %v4410_v12 = vld [vmem:[#allocation5 + $0xa8] ss:$16 sps:$4 sm:$0xff]   ;;  %v4411_v13 = vld [vmem:[#allocation5 + $0x84] ss:$16 sps:$4 sm:$0xff]  }
  0x2c   :  { %v4413_v14 = vld [vmem:[#allocation5 + $0x8c] ss:$16 sps:$4 sm:$0xff]   ;;  %v4415_v15 = vld [vmem:[#allocation5 + $0x80] ss:$16 sps:$4 sm:$0xff]   ;;  %v4416_v16 = vld [vmem:[#allocation5 + $0x88] ss:$16 sps:$4 sm:$0xff]  }
  0x2d   :  { %v4417_v17 = vld [vmem:[#allocation5 + $0x64] ss:$16 sps:$4 sm:$0xff]   ;;  %v4419_v18 = vld [vmem:[#allocation5 + $0x6c] ss:$16 sps:$4 sm:$0xff]   ;;  %v4421_v19 = vld [vmem:[#allocation5 + $0x60] ss:$16 sps:$4 sm:$0xff]  }
  0x2e   :  { %315 = vmatpush1.bf16.msra.mxu0 %v4403_v7  ;;  %388 = vmatpush1.bf16.msra.mxu1 %v4404_v8  ;;  %v4422_v20 = vld [vmem:[#allocation5 + $0x68] ss:$16 sps:$4 sm:$0xff]   ;;  %v4423_v21 = vld [vmem:[#allocation5 + $0x44] ss:$16 sps:$4 sm:$0xff]   ;;  %v4425_v22 = vld [vmem:[#allocation5 + $0x4c] ss:$16 sps:$4 sm:$0xff]  }
  0x2f   :  { %316 = vmatprep.subr.bf16.mxu0 %v4405_v9  ;;  %389 = vmatprep.subr.bf16.mxu1 %v4407_v10  ;;  %v4427_v23 = vld [vmem:[#allocation5 + $0x40] ss:$16 sps:$4 sm:$0xff]   ;;  %v4428_v24 = vld [vmem:[#allocation5 + $0x48] ss:$16 sps:$4 sm:$0xff]   ;;  %v4429_v25 = vld [vmem:[#allocation5 + $0x24] ss:$16 sps:$4 sm:$0xff]  }
  0x30   :  { %v4431_v26 = vld [vmem:[#allocation5 + $0x2c] ss:$16 sps:$4 sm:$0xff]   ;;  %v4433_v27 = vld [vmem:[#allocation5 + $0x20] ss:$16 sps:$4 sm:$0xff]   ;;  %v4434_v28 = vld [vmem:[#allocation5 + $0x28] ss:$16 sps:$4 sm:$0xff]  }
  0x31   :  { %v4435_v29 = vld [vmem:[#allocation5 + $0x4] ss:$16 sps:$4 sm:$0xff]   ;;  %v4437_v30 = vld [vmem:[#allocation5 + $0xc] ss:$16 sps:$4 sm:$0xff]   ;;  %v4439_v31 = vld [vmem:[#allocation5] ss:$16 sps:$4 sm:$0xff]  }
  0x32   :  { %317 = vmatpush1.bf16.msra.mxu0 %v4409_v11  ;;  %390 = vmatpush1.bf16.msra.mxu1 %v4410_v12  ;;  %v4440_v32 = vld [vmem:[#allocation5 + $0x8] ss:$16 sps:$4 sm:$0xff]   ;;  %v5731_v33 = vld [vmem:[#allocation7 + $0xe4] ss:$16 sps:$4 sm:$0xff]   ;;  %v5733_v34 = vld [vmem:[#allocation7 + $0xec] ss:$16 sps:$4 sm:$0xff]  }
  0x33   :  { %318 = vmatprep.subr.bf16.mxu0 %v4411_v13  ;;  %391 = vmatprep.subr.bf16.mxu1 %v4413_v14  ;;  %v4441_v35 = vld [vmem:[#allocation3] sm:$0xff]   ;;  %v5737_v37 = vld [vmem:[#allocation7 + $0xe8] ss:$16 sps:$4 sm:$0xff]   ;;  %v5743_v39 = vld [vmem:[#allocation7 + $0xcc] ss:$16 sps:$4 sm:$0xff]   ;;  %vm1045_vm0 = vcmask 1041409  }
  0x34   :  { %v5735_v36 = vld [vmem:[#allocation7 + $0xe0] ss:$16 sps:$4 sm:$0xff]   ;;  %v5741_v38 = vld [vmem:[#allocation7 + $0xc4] ss:$16 sps:$4 sm:$0xff]   ;;  %v5749_v41 = vld [vmem:[#allocation7 + $0xc8] ss:$16 sps:$4 sm:$0xff]  }
  0x35   :  { %v5745_v40 = vld [vmem:[#allocation7 + $0xc0] ss:$16 sps:$4 sm:$0xff]   ;;  %v5753_v42 = vld [vmem:[#allocation7 + $0xa4] ss:$16 sps:$4 sm:$0xff]   ;;  %v5755_v43 = vld [vmem:[#allocation7 + $0xac] ss:$16 sps:$4 sm:$0xff]  }
  0x36   :  { %319 = vmatpush1.bf16.msra.mxu0 %v4415_v15  ;;  %392 = vmatpush1.bf16.msra.mxu1 %v4416_v16  ;;  %v5759_v45 = vld [vmem:[#allocation7 + $0xa0] ss:$16 sps:$4 sm:$0xff]   ;;  %v5761_v46 = vld [vmem:[#allocation7 + $0xa8] ss:$16 sps:$4 sm:$0xff]   ;;  %v5765_v47 = vld [vmem:[#allocation7 + $0x84] ss:$16 sps:$4 sm:$0xff]  }
  0x37   :  { %320 = vmatprep.subr.bf16.mxu0 %v4417_v17  ;;  %393 = vmatprep.subr.bf16.mxu1 %v4419_v18  ;;  %v5769_v48 = vld [vmem:[#allocation7 + $0x8c] ss:$16 sps:$4 sm:$0xff]   ;;  %v5771_v49 = vld [vmem:[#allocation7 + $0x80] ss:$16 sps:$4 sm:$0xff]   ;;  %v5773_v50 = vld [vmem:[#allocation7 + $0x88] ss:$16 sps:$4 sm:$0xff]  }
  0x38   :  { %v5777_v51 = vld [vmem:[#allocation7 + $0x64] ss:$16 sps:$4 sm:$0xff]   ;;  %v5781_v52 = vld [vmem:[#allocation7 + $0x6c] ss:$16 sps:$4 sm:$0xff]   ;;  %v5787_v54 = vld [vmem:[#allocation7 + $0x60] ss:$16 sps:$4 sm:$0xff]  }
  0x39   :  { %v4467_v53 = vld [vmem:[#allocation3 + $0x10] sm:$0xff]   ;;  %v5789_v55 = vld [vmem:[#allocation7 + $0x68] ss:$16 sps:$4 sm:$0xff]   ;;  %v5795_v57 = vld [vmem:[#allocation7 + $0x4c] ss:$16 sps:$4 sm:$0xff]   ;;  %vm1048_vm1 = vcmask 1042434  }
  0x3a   :  { %321 = vmatpush1.bf16.msra.mxu0 %v4421_v19  ;;  %394 = vmatpush1.bf16.msra.mxu1 %v4422_v20  ;;  %v5793_v56 = vld [vmem:[#allocation7 + $0x44] ss:$16 sps:$4 sm:$0xff]   ;;  %7570 = vst [vmem:[#allocation11_spill] sm:$0xff] %v5795_v57  ;;  %v5799_v58 = vld [vmem:[#allocation7 + $0x40] ss:$16 sps:$4 sm:$0xff]   ;;  %v4480_v62 = vld [vmem:[#allocation3 + $0x18] sm:$0xff]  }
  0x3b   :  { %322 = vmatprep.subr.bf16.mxu0 %v4423_v21  ;;  %395 = vmatprep.subr.bf16.mxu1 %v4425_v22  ;;  %7569 = vst [vmem:[#allocation10_spill] sm:$0xff] %v5793_v56  ;;  %7571 = vst [vmem:[#allocation12_spill] sm:$0xff] %v5799_v58  ;;  %v5801_v59 = vld [vmem:[#allocation7 + $0x48] ss:$16 sps:$4 sm:$0xff]   ;;  %v5805_v60 = vld [vmem:[#allocation7 + $0x24] ss:$16 sps:$4 sm:$0xff]   ;;  %v108_v22 = vlaneseq }
  0x3c   :  { %7572 = vst [vmem:[#allocation13_spill] sm:$0xff] %v5801_v59  ;;  %7573 = vst [vmem:[#allocation14_spill] sm:$0xff] %v5805_v60  ;;  %v5807_v61 = vld [vmem:[#allocation7 + $0x2c] ss:$16 sps:$4 sm:$0xff]   ;;  %v5813_v63 = vld [vmem:[#allocation7 + $0x20] ss:$16 sps:$4 sm:$0xff]  }
  0x3d   :  { %7574 = vst [vmem:[#allocation15_spill] sm:$0xff] %v5807_v61  ;;  %7575 = vst [vmem:[#allocation16_spill] sm:$0xff] %v5813_v63  ;;  %v5815_v1 = vld [vmem:[#allocation7 + $0x28] ss:$16 sps:$4 sm:$0xff]   ;;  %v5819_v2 = vld [vmem:[#allocation7 + $0x4] ss:$16 sps:$4 sm:$0xff]  }
  0x3e   :  { %323 = vmatpush1.bf16.msra.mxu0 %v4427_v23  ;;  %396 = vmatpush1.bf16.msra.mxu1 %v4428_v24  ;;  %7576 = vst [vmem:[#allocation17_spill] sm:$0xff] %v5815_v1  ;;  %7577 = vst [vmem:[#allocation18_spill] sm:$0xff] %v5819_v2  ;;  %v5821_v3 = vld [vmem:[#allocation7 + $0xc] ss:$16 sps:$4 sm:$0xff]   ;;  %v5825_v4 = vld [vmem:[#allocation7] ss:$16 sps:$4 sm:$0xff]  }
  0x3f   :  { %324 = vmatprep.subr.bf16.mxu0 %v4429_v25  ;;  %397 = vmatprep.subr.bf16.mxu1 %v4431_v26  ;;  %7578 = vst [vmem:[#allocation19_spill] sm:$0xff] %v5821_v3  ;;  %7579 = vst [vmem:[#allocation20_spill] sm:$0xff] %v5825_v4  ;;  %v5827_v5 = vld [vmem:[#allocation7 + $0x8] ss:$16 sps:$4 sm:$0xff]   ;;  %vm1051_vm2 = vcmask 1043459   ;;  %vm1054_vm3 = vcmask 1044484  }
  0x40   :  { %7580 = vst [vmem:[#allocation21_spill] sm:$0xff] %v5827_v5  ;;  %vm1057_vm4 = vcmask 1045509   ;;  %vm1060_vm5 = vcmask 1046534   ;;  %vm1063_vm6 = vcmask 1047559   ;;  %vm4106_vm7 = vcmask 1046528  }
  0x41   :  { %vm4114_vm8 = vcmask 7175   ;;  %vm4116_vm9 = vcmask 6144  }
  0x42   :  { %325 = vmatpush1.bf16.msra.mxu0 %v4433_v27  ;;  %398 = vmatpush1.bf16.msra.mxu1 %v4434_v28  ;;  %v109_v27 = vshrl.u32 %v108_v22, 7 }
  0x43   :  { %326 = vmatprep.subr.bf16.mxu0 %v4435_v29  ;;  %399 = vmatprep.subr.bf16.mxu1 %v4437_v30 }
  0x46   :  { %327 = vmatpush1.bf16.msra.mxu0 %v4439_v31  ;;  %400 = vmatpush1.bf16.msra.mxu1 %v4440_v32  ;;  %v110_v32 = vsub.s32 0, %v109_v27 }
  0x47   :  { %650 = vmatprep.subr.bf16.mxu0 %v5731_v33  ;;  %691 = vmatprep.subr.bf16.mxu1 %v5733_v34 }
  0x49   :  { %345 = vmatmul.mubr.bf16.vlgmr.msra.gmra.mxu0 %v4441_v35  ;;  %418 = vmatmul.mubr.bf16.vlgmr.msra.gmra.mxu1 %v4441_v35 }
  0x4a   :  { %651 = vmatpush1.bf16.msra.mxu0 %v5735_v36  ;;  %692 = vmatpush1.bf16.msra.mxu1 %v5737_v37 }
  0x4b   :  { %652 = vmatprep.subr.bf16.mxu0 %v5741_v38  ;;  %693 = vmatprep.subr.bf16.mxu1 %v5743_v39 }
  0x4c   :  { %354 = vmatprep.mubr.bf16.mxu0 %v7479_v0  ;;  %427 = vmatprep.mubr.bf16.mxu1 %v7479_v0 }
  0x4e   :  { %653 = vmatpush1.bf16.msra.mxu0 %v5745_v40  ;;  %694 = vmatpush1.bf16.msra.mxu1 %v5749_v41 }
  0x4f   :  { %654 = vmatprep.subr.bf16.mxu0 %v5753_v42  ;;  %695 = vmatprep.subr.bf16.mxu1 %v5755_v43 }
  0x51   :  { %355 = vmatmul.mubr.bf16.gmra.mxu0 %v4454_v44  ;;  %428 = vmatmul.mubr.bf16.gmra.mxu1 %v4454_v44 }
  0x52   :  { %655 = vmatpush1.bf16.msra.mxu0 %v5759_v45  ;;  %696 = vmatpush1.bf16.msra.mxu1 %v5761_v46 }
  0x53   :  { %656 = vmatprep.subr.bf16.mxu0 %v5765_v47  ;;  %697 = vmatprep.subr.bf16.mxu1 %v5769_v48 }
  0x54   :  { %364 = vmatprep.mubr.bf16.mxu0 %v7479_v0  ;;  %437 = vmatprep.mubr.bf16.mxu1 %v7479_v0 }
  0x56   :  { %657 = vmatpush1.bf16.msra.mxu0 %v5771_v49  ;;  %698 = vmatpush1.bf16.msra.mxu1 %v5773_v50 }
  0x57   :  { %658 = vmatprep.subr.bf16.mxu0 %v5777_v51  ;;  %699 = vmatprep.subr.bf16.mxu1 %v5781_v52 }
  0x59   :  { %365 = vmatmul.mubr.bf16.gmra.mxu0 %v4467_v53  ;;  %438 = vmatmul.mubr.bf16.gmra.mxu1 %v4467_v53 }
  0x5a   :  { %659 = vmatpush1.bf16.msra.mxu0 %v5787_v54  ;;  %700 = vmatpush1.bf16.msra.mxu1 %v5789_v55 }
  0x5b   :  { %660 = vmatprep.subr.bf16.mxu0 %v5793_v56  ;;  %701 = vmatprep.subr.bf16.mxu1 %v5795_v57 }
  0x5c   :  { %374 = vmatprep.mubr.bf16.mxu0 %v7479_v0  ;;  %447 = vmatprep.mubr.bf16.mxu1 %v7479_v0 }
  0x5e   :  { %661 = vmatpush1.bf16.msra.mxu0 %v5799_v58  ;;  %702 = vmatpush1.bf16.msra.mxu1 %v5801_v59 }
  0x5f   :  { %662 = vmatprep.subr.bf16.mxu0 %v5805_v60  ;;  %703 = vmatprep.subr.bf16.mxu1 %v5807_v61 }
  0x61   :  { %375 = vmatmul.mubr.bf16.gmra.mxu0 %v4480_v62  ;;  %448 = vmatmul.mubr.bf16.gmra.mxu1 %v4480_v62 }
  0x62   :  { %663 = vmatpush1.bf16.msra.mxu0 %v5813_v63  ;;  %704 = vmatpush1.bf16.msra.mxu1 %v5815_v1 }
  0x63   :  { %664 = vmatprep.subr.bf16.mxu0 %v5819_v2  ;;  %705 = vmatprep.subr.bf16.mxu1 %v5821_v3 }
  0x64   :  { %682 = vmatprep.mubr.bf16.mxu0 %v7479_v0  ;;  %723 = vmatprep.mubr.bf16.mxu1 %v7479_v0 }
  0x66   :  { %665 = vmatpush1.bf16.msra.mxu0 %v5825_v4  ;;  %706 = vmatpush1.bf16.msra.mxu1 %v5827_v5 }
  0x67   :  { %1067 = vmatprep.subr.bf16.mxu0 %v5731_v33  ;;  %1108 = vmatprep.subr.bf16.mxu1 %v5733_v34 }
  0x69   :  { %683 = vmatmul.mubr.bf16.vlgmr.msra.gmra.mxu0 %v7479_v0  ;;  %724 = vmatmul.mubr.bf16.vlgmr.msra.gmra.mxu1 %v7479_v0 }
  0x6a   :  { %1068 = vmatpush1.bf16.msra.mxu0 %v5735_v36  ;;  %1109 = vmatpush1.bf16.msra.mxu1 %v5737_v37  ;;  %v118_v36 = vsub.s32 2, %v109_v27  ;;  %v114_v37 = vsub.s32 1, %v109_v27 }
  0x6b   :  { %1069 = vmatprep.subr.bf16.mxu0 %v5741_v38  ;;  %1110 = vmatprep.subr.bf16.mxu1 %v5743_v39  ;;  %v122_v38 = vsub.s32 3, %v109_v27 }
  0x6c   :  { %1099 = vmatprep.mubr.bf16.mxu0 %v7479_v0  ;;  %1140 = vmatprep.mubr.bf16.mxu1 %v7479_v0 }
  0x6e   :  { %1070 = vmatpush1.bf16.msra.mxu0 %v5745_v40  ;;  %1111 = vmatpush1.bf16.msra.mxu1 %v5749_v41 }
  0x6f   :  { %1071 = vmatprep.subr.bf16.mxu0 %v5753_v42  ;;  %1112 = vmatprep.subr.bf16.mxu1 %v5755_v43 }
  0x72   :  { %1072 = vmatpush1.bf16.msra.mxu0 %v5759_v45  ;;  %1113 = vmatpush1.bf16.msra.mxu1 %v5761_v46 }
  0x73   :  { %1073 = vmatprep.subr.bf16.mxu0 %v5765_v47  ;;  %1114 = vmatprep.subr.bf16.mxu1 %v5769_v48 }
  0x76   :  { %1074 = vmatpush1.bf16.msra.mxu0 %v5771_v49  ;;  %1115 = vmatpush1.bf16.msra.mxu1 %v5773_v50 }
  0x77   :  { %1075 = vmatprep.subr.bf16.mxu0 %v5777_v51  ;;  %1116 = vmatprep.subr.bf16.mxu1 %v5781_v52 }
  0x7a   :  { %1076 = vmatpush1.bf16.msra.mxu0 %v5787_v54  ;;  %1117 = vmatpush1.bf16.msra.mxu1 %v5789_v55 }
  0x7b   :  { %1077 = vmatprep.subr.bf16.mxu0 %v5793_v56  ;;  %1118 = vmatprep.subr.bf16.mxu1 %v5795_v57 }
  0x7e   :  { %1078 = vmatpush1.bf16.msra.mxu0 %v5799_v58  ;;  %1119 = vmatpush1.bf16.msra.mxu1 %v5801_v59 }
  0x7f   :  { %1079 = vmatprep.subr.bf16.mxu0 %v5805_v60  ;;  %1120 = vmatprep.subr.bf16.mxu1 %v5807_v61 }
  0x82   :  { %1080 = vmatpush1.bf16.msra.mxu0 %v5813_v63  ;;  %1121 = vmatpush1.bf16.msra.mxu1 %v5815_v1 }
  0x83   :  { %1081 = vmatprep.subr.bf16.mxu0 %v5819_v2  ;;  %1122 = vmatprep.subr.bf16.mxu1 %v5821_v3 }
  0x86   :  { %1082 = vmatpush1.bf16.msra.mxu0 %v5825_v4  ;;  %1123 = vmatpush1.bf16.msra.mxu1 %v5827_v5 }
  0x87   :  { %1501 = vmatprep.subr.bf16.mxu0 %v5731_v33  ;;  %1542 = vmatprep.subr.bf16.mxu1 %v5733_v34  ;;  %v106_v33 = vld [vmem:[%s7475_s3] sm:$0xf] }
  0x88   :  { %v111_v41 = vrot.slane %v106_v33, %v110_v32  ;;  %v5920_v44 = vrot.slane %v106_v33, %v118_v36  ;;  %v5922_v45 = vrot.slane %v106_v33, %v114_v37  ;;  %v5924_v46 = vrot.slane %v106_v33, %v122_v38 }
 0x109   :  { %v346_v6 = vpop.f32.mrf.mxu0  ;;  %v5873_v7 = vpop.f32.mrf.mxu1 }
 0x10a   :  { %v5930_v22 = vadd.f32 %v346_v6, %v111_v41  ;;  %v5959_v60 = vadd.f32 %v5873_v7, %v5920_v44 }
 0x10b   :  { %v5875_v8 = vpop.f32.mrf.mxu0  ;;  %v5877_v9 = vpop.f32.mrf.mxu1 }
 0x10c   :  { %7581 = vst [vmem:[#allocation22_spill] sm:$0xff] %v5930_v22  ;;  %7589 = vst [vmem:[#allocation30_spill] sm:$0xff] %v5959_v60  ;;  %v5970_v7 = vadd.f32 %v5877_v9, %v5924_v46 }
 0x10d   :  { %v350_v10 = vpop.f32.mrf.mxu0  ;;  %v5879_v11 = vpop.f32.mrf.mxu1 }
 0x10e   :  { %v5932_v27 = vadd.f32 %v350_v10, %v111_v41  ;;  %7591 = vst [vmem:[#allocation32_spill] sm:$0xff] %v5970_v7 }
 0x10f   :  { %v5881_v12 = vpop.f32.mrf.mxu0  ;;  %v5883_v13 = vpop.f32.mrf.mxu1 }
 0x110   :  { %7582 = vst [vmem:[#allocation23_spill] sm:$0xff] %v5932_v27 }
 0x111   :  { %v356_v14 = vpop.f32.mrf.mxu0  ;;  %v5885_v15 = vpop.f32.mrf.mxu1 }
 0x112   :  { %v5934_v0 = vadd.f32 %v356_v14, %v111_v41 }
 0x113   :  { %v5887_v16 = vpop.f32.mrf.mxu0  ;;  %v5889_v17 = vpop.f32.mrf.mxu1 }
 0x114   :  { %7583 = vst [vmem:[#allocation24_spill] sm:$0xff] %v5934_v0 }
 0x115   :  { %v360_v18 = vpop.f32.mrf.mxu0  ;;  %v5891_v19 = vpop.f32.mrf.mxu1 }
 0x116   :  { %v5936_v32 = vadd.f32 %v360_v18, %v111_v41 }
 0x117   :  { %v5893_v20 = vpop.f32.mrf.mxu0  ;;  %v5895_v21 = vpop.f32.mrf.mxu1 }
 0x118   :  { %7584 = vst [vmem:[#allocation25_spill] sm:$0xff] %v5936_v32 }
 0x119   :  { %v366_v23 = vpop.f32.mrf.mxu0  ;;  %v5897_v24 = vpop.f32.mrf.mxu1 }
 0x11a   :  { %v5938_v5 = vadd.f32 %v366_v23, %v111_v41 }
 0x11b   :  { %v5899_v25 = vpop.f32.mrf.mxu0  ;;  %v5901_v26 = vpop.f32.mrf.mxu1 }
 0x11c   :  { %7585 = vst [vmem:[#allocation26_spill] sm:$0xff] %v5938_v5 }
 0x11d   :  { %v370_v28 = vpop.f32.mrf.mxu0  ;;  %v5903_v29 = vpop.f32.mrf.mxu1 }
 0x11e   :  { %v5940_v36 = vadd.f32 %v370_v28, %v111_v41 }
 0x11f   :  { %v5905_v30 = vpop.f32.mrf.mxu0  ;;  %v5907_v31 = vpop.f32.mrf.mxu1 }
 0x120   :  { %7586 = vst [vmem:[#allocation27_spill] sm:$0xff] %v5940_v36 }
 0x121   :  { %v376_v34 = vpop.f32.mrf.mxu0  ;;  %v5912_v35 = vpop.f32.mrf.mxu1 }
 0x122   :  { %v5942_v37 = vadd.f32 %v376_v34, %v111_v41 }
 0x123   :  { %v5914_v39 = vpop.f32.mrf.mxu0  ;;  %v5916_v40 = vpop.f32.mrf.mxu1 }
 0x124   :  { %7587 = vst [vmem:[#allocation28_spill] sm:$0xff] %v5942_v37 }
 0x125   :  { %v380_v42 = vpop.f32.mrf.mxu0  ;;  %v5918_v43 = vpop.f32.mrf.mxu1 }
 0x126   :  { %v5944_v33 = vadd.f32 %v380_v42, %v111_v41 }
 0x127   :  { %v5926_v53 = vpop.f32.mrf.mxu0  ;;  %v5928_v62 = vpop.f32.mrf.mxu1 }
 0x128   :  { %7588 = vst [vmem:[#allocation29_spill] sm:$0xff] %v5944_v33 }
 0x129   :  { %v684_v38 = vpop.f32.mrf.mxu0  ;;  %v5946_v4 = vpop.f32.mrf.mxu1 }
 0x12a   :  { %v736_v3 = vrot.slane %v684_v38, 1  ;;  %v740_v6 = vrot.slane %v684_v38, 2  ;;  %v744_v2 = vrot.slane %v684_v38, 3  ;;  %v748_v10 = vrot.slane %v684_v38, 4 }
 0x12b   :  { %v752_v1 = vrot.slane %v684_v38, 5  ;;  %v756_v14 = vrot.slane %v684_v38, 6  ;;  %v760_v63 = vrot.slane %v684_v38, 7  ;;  %v796_v18 = vadd.f32 %v684_v38, %v5930_v22  ;;  %v5949_v23 = vpop.f32.mrf.mxu0  ;;  %v5951_v28 = vpop.f32.mrf.mxu1 }
 0x12c   :  { %v800_v34 = vadd.f32 %v736_v3, %v5932_v27  ;;  %v804_v41 = vadd.f32 %v740_v6, %v5934_v0  ;;  %v808_v42 = vadd.f32 %v744_v2, %v5936_v32  ;;  %v812_v61 = vadd.f32 %v748_v10, %v5938_v5 }
 0x12d   :  { %v816_v59 = vadd.f32 %v752_v1, %v5940_v36  ;;  %v820_v38 = vadd.f32 %v756_v14, %v5942_v37  ;;  %v4192_v22 = vmul.f32 -1.442695, %v796_v18  ;;  %v688_v58 = vpop.f32.mrf.mxu0  ;;  %v729_v57 = vpop.f32.mrf.mxu1  ;;  %v824_v56 = vadd.f32 %v760_v63, %v5944_v33 }
 0x12e   :  { %v4193_v3 = vmul.f32 -1.442695, %v800_v34  ;;  %v4194_v27 = vmul.f32 -1.442695, %v804_v41  ;;  %v4195_v6 = vmul.f32 -1.442695, %v808_v42  ;;  %v5966_v2 = vadd.f32 %v5875_v8, %v5922_v45 }
 0x12f   :  { %4493 = vpow2.f32 %v4192_v22  ;;  %v4196_v1 = vmul.f32 -1.442695, %v812_v61  ;;  %v689_v10 = vpop.f32.mrf.mxu0  ;;  %v730_v14 = vpop.f32.mrf.mxu1  ;;  %v5974_v57 = vadd.f32 %v5879_v11, %v5920_v44  ;;  %v4197_v58 = vmul.f32 -1.442695, %v816_v59 }
 0x130   :  { %7590 = vst [vmem:[#allocation31_spill] sm:$0xff] %v5966_v2  ;;  %4495 = vpow2.f32 %v4193_v3  ;;  %v738_v63 = vrot.slane %v5946_v4, 1  ;;  %v5979_v8 = vadd.f32 %v5885_v15, %v5920_v44  ;;  %v4198_v18 = vmul.f32 -1.442695, %v820_v38 }
 0x131   :  { %7592 = vst [vmem:[#allocation33_spill] sm:$0xff] %v5974_v57  ;;  %4497 = vpow2.f32 %v4194_v27  ;;  %v742_v9 = vrot.slane %v5946_v4, 2  ;;  %v5984_v61 = vadd.f32 %v5891_v19, %v5920_v44  ;;  %v4199_v22 = vmul.f32 -1.442695, %v824_v56 }
 0x132   :  { %7593 = vst [vmem:[#allocation34_spill] sm:$0xff] %v5979_v8  ;;  %4499 = vpow2.f32 %v4195_v6  ;;  %v746_v11 = vrot.slane %v5946_v4, 3  ;;  %v5989_v59 = vadd.f32 %v5897_v24, %v5920_v44  ;;  %v750_v15 = vrot.slane %v5946_v4, 4 }
 0x133   :  { %7594 = vst [vmem:[#allocation35_spill] sm:$0xff] %v5984_v61  ;;  %4501 = vpow2.f32 %v4196_v1  ;;  %v798_v27 = vadd.f32 %v5946_v4, %v5959_v60  ;;  %v5996_v34 = vadd.f32 %v5903_v29, %v5920_v44  ;;  %v754_v19 = vrot.slane %v5946_v4, 5 }
 0x134   :  { %7595 = vst [vmem:[#allocation36_spill] sm:$0xff] %v5989_v59  ;;  %4503 = vpow2.f32 %v4197_v58  ;;  %v802_v56 = vadd.f32 %v738_v63, %v5974_v57  ;;  %v6002_v41 = vadd.f32 %v5912_v35, %v5920_v44  ;;  %v758_v24 = vrot.slane %v5946_v4, 6 }
 0x135   :  { %7596 = vst [vmem:[#allocation37_spill] sm:$0xff] %v5996_v34  ;;  %4505 = vpow2.f32 %v4198_v18  ;;  %v806_v42 = vadd.f32 %v742_v9, %v5979_v8  ;;  %v6008_v38 = vadd.f32 %v5918_v43, %v5920_v44  ;;  %v762_v29 = vrot.slane %v5946_v4, 7 }
 0x136   :  { %7597 = vst [vmem:[#allocation38_spill] sm:$0xff] %v6002_v41  ;;  %4507 = vpow2.f32 %v4199_v22  ;;  %v810_v3 = vadd.f32 %v746_v11, %v5984_v61  ;;  %v6014_v6 = vadd.f32 %v5881_v12, %v5922_v45  ;;  %v6018_v35 = vadd.f32 %v5883_v13, %v5924_v46 }
 0x137   :  { %7598 = vst [vmem:[#allocation39_spill] sm:$0xff] %v6008_v38  ;;  %v814_v1 = vadd.f32 %v750_v15, %v5989_v59  ;;  %4509 = vtanh.f32 %v798_v27  ;;  %v6023_v43 = vadd.f32 %v5887_v16, %v5922_v45  ;;  %v6027_v4 = vadd.f32 %v5889_v17, %v5924_v46 }
 0x138   :  { %7599 = vst [vmem:[#allocation40_spill] sm:$0xff] %v6014_v6  ;;  %7600 = vst [vmem:[#allocation41_spill] sm:$0xff] %v6018_v35  ;;  %v818_v44 = vadd.f32 %v754_v19, %v5996_v34  ;;  %4511 = vtanh.f32 %v802_v56  ;;  %v6032_v12 = vadd.f32 %v5893_v20, %v5922_v45  ;;  %v6036_v13 = vadd.f32 %v5895_v21, %v5924_v46 }
 0x139   :  { %7601 = vst [vmem:[#allocation42_spill] sm:$0xff] %v6023_v43  ;;  %7602 = vst [vmem:[#allocation43_spill] sm:$0xff] %v6027_v4  ;;  %v822_v10 = vadd.f32 %v758_v24, %v6002_v41  ;;  %4513 = vtanh.f32 %v806_v42  ;;  %v6041_v16 = vadd.f32 %v5899_v25, %v5922_v45  ;;  %v6045_v17 = vadd.f32 %v5901_v26, %v5924_v46 }
 0x13a   :  { %7603 = vst [vmem:[#allocation44_spill] sm:$0xff] %v6032_v12  ;;  %7604 = vst [vmem:[#allocation45_spill] sm:$0xff] %v6036_v13  ;;  %v826_v14 = vadd.f32 %v762_v29, %v6008_v38  ;;  %4515 = vtanh.f32 %v810_v3  ;;  %v6050_v20 = vadd.f32 %v5905_v30, %v5922_v45  ;;  %v6054_v21 = vadd.f32 %v5907_v31, %v5924_v46 }
 0x13b   :  { %7605 = vst [vmem:[#allocation46_spill] sm:$0xff] %v6041_v16  ;;  %7606 = vst [vmem:[#allocation47_spill] sm:$0xff] %v6045_v17  ;;  %v6058_v58 = vadd.f32 %v5914_v39, %v5922_v45  ;;  %4517 = vtanh.f32 %v814_v1  ;;  %v6062_v26 = vadd.f32 %v5916_v40, %v5924_v46  ;;  %v6066_v63 = vadd.f32 %v5926_v53, %v5922_v45 }
 0x13c   :  { %7607 = vst [vmem:[#allocation48_spill] sm:$0xff] %v6050_v20  ;;  %7608 = vst [vmem:[#allocation49_spill] sm:$0xff] %v6054_v21  ;;  %v4494_v25 = vpop.eup %4493  ;;  %4519 = vtanh.f32 %v818_v44  ;;  %v737_v30 = vrot.slane %v5949_v23, 1  ;;  %v6071_v31 = vadd.f32 %v5928_v62, %v5924_v46  ;;  %v741_v9 = vrot.slane %v5949_v23, 2 }
 0x13d   :  { %7609 = vst [vmem:[#allocation50_spill] sm:$0xff] %v6058_v58  ;;  %7610 = vst [vmem:[#allocation51_spill] sm:$0xff] %v6062_v26  ;;  %v4496_v18 = vpop.eup %4495  ;;  %v852_v39 = vadd.f32 1.0, %v4494_v25  ;;  %4521 = vtanh.f32 %v822_v10  ;;  %v745_v40 = vrot.slane %v5949_v23, 3  ;;  %v749_v45 = vrot.slane %v5949_v23, 4 }
 0x13e   :  { %7611 = vst [vmem:[#allocation52_spill] sm:$0xff] %v6066_v63  ;;  %7612 = vst [vmem:[#allocation53_spill] sm:$0xff] %v6071_v31  ;;  %v4498_v22 = vpop.eup %4497  ;;  %v853_v11 = vadd.f32 1.0, %v4496_v18  ;;  %4523 = vtanh.f32 %v826_v14  ;;  %v753_v27 = vrot.slane %v5949_v23, 5  ;;  %v797_v46 = vadd.f32 %v5949_v23, %v5966_v2 }
 0x13f   :  { %v4500_v53 = vpop.eup %4499  ;;  %v854_v15 = vadd.f32 1.0, %v4498_v22  ;;  %4525 = vrcp.f32 %v852_v39  ;;  %v757_v56 = vrot.slane %v5949_v23, 6  ;;  %v801_v24 = vadd.f32 %v737_v30, %v6014_v6 }
 0x140   :  { %v4502_v62 = vpop.eup %4501  ;;  %v855_v19 = vadd.f32 1.0, %v4500_v53  ;;  %4527 = vrcp.f32 %v853_v11  ;;  %v761_v3 = vrot.slane %v5949_v23, 7  ;;  %v805_v1 = vadd.f32 %v741_v9, %v6023_v43 }
 0x141   :  { %v4504_v42 = vpop.eup %4503  ;;  %v856_v29 = vadd.f32 1.0, %v4502_v62  ;;  %4529 = vrcp.f32 %v854_v15  ;;  %v809_v14 = vadd.f32 %v745_v40, %v6032_v12  ;;  %v813_v25 = vadd.f32 %v749_v45, %v6041_v16 }
 0x142   :  { %v4506_v44 = vpop.eup %4505  ;;  %v857_v10 = vadd.f32 1.0, %v4504_v42  ;;  %4531 = vrcp.f32 %v855_v19  ;;  %v817_v22 = vadd.f32 %v753_v27, %v6050_v20  ;;  %v4200_v30 = vmul.f32 -1.442695, %v797_v46 }
 0x143   :  { %v4508_v18 = vpop.eup %4507  ;;  %v858_v39 = vadd.f32 1.0, %v4506_v44  ;;  %4533 = vrcp.f32 %v856_v29  ;;  %v4201_v23 = vmul.f32 -1.442695, %v801_v24  ;;  %v739_v9 = vrot.slane %v5951_v28, 1 }
 0x144   :  { %v6086_v11 = vpop.eup %4509  ;;  %v859_v53 = vadd.f32 1.0, %v4508_v18  ;;  %4535 = vrcp.f32 %v857_v10  ;;  %v821_v40 = vadd.f32 %v757_v56, %v6058_v58  ;;  %v4202_v62 = vmul.f32 -1.442695, %v805_v1 }
 0x145   :  { %v6089_v15 = vpop.eup %4511  ;;  %4537 = vrcp.f32 %v858_v39  ;;  %v743_v45 = vrot.slane %v5951_v28, 2  ;;  %v825_v27 = vadd.f32 %v761_v3, %v6066_v63  ;;  %v4203_v46 = vmul.f32 -1.442695, %v809_v14 }
 0x146   :  { %v6093_v19 = vpop.eup %4513  ;;  %4539 = vrcp.f32 %v859_v53  ;;  %v747_v42 = vrot.slane %v5951_v28, 3  ;;  %v4204_v24 = vmul.f32 -1.442695, %v813_v25  ;;  %v751_v44 = vrot.slane %v5951_v28, 4 }
 0x147   :  { %v6097_v29 = vpop.eup %4515  ;;  %4541 = vpow2.f32 %v4200_v30  ;;  %v799_v56 = vadd.f32 %v5951_v28, %v5970_v7  ;;  %v4205_v10 = vmul.f32 -1.442695, %v817_v22  ;;  %v755_v18 = vrot.slane %v5951_v28, 5 }
 0x148   :  { %v6102_v1 = vpop.eup %4517  ;;  %4543 = vpow2.f32 %v4201_v23  ;;  %v803_v3 = vadd.f32 %v739_v9, %v6018_v35  ;;  %v4206_v39 = vmul.f32 -1.442695, %v821_v40  ;;  %v759_v30 = vrot.slane %v5951_v28, 6 }
 0x149   :  { %v6106_v14 = vpop.eup %4519  ;;  %4545 = vpow2.f32 %v4202_v62  ;;  %v807_v25 = vadd.f32 %v743_v45, %v6027_v4  ;;  %v4207_v7 = vmul.f32 -1.442695, %v825_v27  ;;  %v763_v63 = vrot.slane %v5951_v28, 7 }
 0x14a   :  { %v6110_v53 = vpop.eup %4521  ;;  %4547 = vpow2.f32 %v4203_v46  ;;  %v811_v22 = vadd.f32 %v747_v42, %v6036_v13  ;;  %v815_v9 = vadd.f32 %v751_v44, %v6045_v17  ;;  %v4208_v35 = vmul.f32 -1.442695, %v799_v56 }
 0x14b   :  { %v6114_v23 = vpop.eup %4523  ;;  %4549 = vpow2.f32 %v4204_v24  ;;  %v819_v40 = vadd.f32 %v755_v18, %v6054_v21  ;;  %v4209_v45 = vmul.f32 -1.442695, %v803_v3  ;;  %v823_v27 = vadd.f32 %v759_v30, %v6062_v26 }
 0x14c   :  { %v6117_v62 = vpop.eup %4525  ;;  %4551 = vpow2.f32 %v4205_v10  ;;  %v4210_v28 = vmul.f32 -1.442695, %v807_v25  ;;  %v827_v42 = vadd.f32 %v763_v63, %v6071_v31  ;;  %v4211_v24 = vmul.f32 -1.442695, %v811_v22 }
 0x14d   :  { %v6120_v4 = vpop.eup %4527  ;;  %4553 = vpow2.f32 %v4206_v39  ;;  %v4212_v56 = vmul.f32 -1.442695, %v815_v9  ;;  %v4213_v18 = vmul.f32 -1.442695, %v819_v40  ;;  %v4214_v39 = vmul.f32 -1.442695, %v823_v27 }
 0x14e   :  { %v6123_v46 = vpop.eup %4529  ;;  %4555 = vpow2.f32 %v4207_v7  ;;  %v4215_v25 = vmul.f32 -1.442695, %v827_v42 }
 0x14f   :  { %v6126_v44 = vpop.eup %4531  ;;  %4557 = vpow2.f32 %v4208_v35 }
 0x150   :  { %v6128_v10 = vpop.eup %4533  ;;  %4559 = vpow2.f32 %v4209_v45 }
 0x151   :  { %v6130_v3 = vpop.eup %4535  ;;  %4561 = vpow2.f32 %v4210_v28 }
 0x152   :  { %v6132_v30 = vpop.eup %4537  ;;  %4563 = vpow2.f32 %v4211_v24 }
 0x153   :  { %v6134_v7 = vpop.eup %4539  ;;  %4565 = vpow2.f32 %v4212_v56 }
 0x154   :  { %v4542_v63 = vpop.eup %4541  ;;  %4567 = vpow2.f32 %v4213_v18 }
 0x155   :  { %v4544_v22 = vpop.eup %4543  ;;  %v900_v35 = vadd.f32 1.0, %v4542_v63  ;;  %4569 = vpow2.f32 %v4214_v39 }
 0x156   :  { %v4546_v9 = vpop.eup %4545  ;;  %v901_v31 = vadd.f32 1.0, %v4544_v22  ;;  %4571 = vpow2.f32 %v4215_v25 }
 0x157   :  { %v4548_v40 = vpop.eup %4547  ;;  %v902_v45 = vadd.f32 1.0, %v4546_v9  ;;  %4573 = vrcp.f32 %v900_v35 }
 0x158   :  { %v4550_v28 = vpop.eup %4549  ;;  %v903_v27 = vadd.f32 1.0, %v4548_v40  ;;  %4575 = vrcp.f32 %v901_v31 }
 0x159   :  { %v4552_v26 = vpop.eup %4551  ;;  %v904_v24 = vadd.f32 1.0, %v4550_v28  ;;  %4577 = vrcp.f32 %v902_v45 }
 0x15a   :  { %v4554_v42 = vpop.eup %4553  ;;  %v905_v21 = vadd.f32 1.0, %v4552_v26  ;;  %4579 = vrcp.f32 %v903_v27 }
 0x15b   :  { %v4556_v56 = vpop.eup %4555  ;;  %v906_v18 = vadd.f32 1.0, %v4554_v42  ;;  %4581 = vrcp.f32 %v904_v24 }
 0x15c   :  { %v4558_v63 = vpop.eup %4557  ;;  %v907_v39 = vadd.f32 1.0, %v4556_v56  ;;  %4583 = vrcp.f32 %v905_v21 }
 0x15d   :  { %v4560_v22 = vpop.eup %4559  ;;  %4585 = vrcp.f32 %v906_v18  ;;  %v956_v25 = vadd.f32 1.0, %v4558_v63 }
 0x15e   :  { %v4562_v9 = vpop.eup %4561  ;;  %4587 = vrcp.f32 %v907_v39  ;;  %v957_v35 = vadd.f32 1.0, %v4560_v22  ;;  %v988_v39 = vmul.f32 %v6117_v62, %v6086_v11  ;;  %v991_v11 = vmul.f32 %v6126_v44, %v6097_v29 }
 0x15f   :  { %v4564_v40 = vpop.eup %4563  ;;  %v958_v31 = vadd.f32 1.0, %v4562_v9  ;;  %4589 = vrcp.f32 %v956_v25 }
 0x160   :  { %v4566_v17 = vpop.eup %4565  ;;  %v959_v28 = vadd.f32 1.0, %v4564_v40  ;;  %4591 = vrcp.f32 %v957_v35  ;;  %v990_v40 = vmul.f32 %v6123_v46, %v6093_v19 }
 0x161   :  { %v4568_v45 = vpop.eup %4567  ;;  %v960_v13 = vadd.f32 1.0, %v4566_v17  ;;  %4593 = vrcp.f32 %v958_v31  ;;  %v989_v17 = vmul.f32 %v6120_v4, %v6089_v15  ;;  %v992_v4 = vmul.f32 %v6128_v10, %v6102_v1 }
 0x162   :  { %v4570_v26 = vpop.eup %4569  ;;  %v961_v27 = vadd.f32 1.0, %v4568_v45  ;;  %4595 = vrcp.f32 %v959_v28  ;;  %v994_v1 = vmul.f32 %v6132_v30, %v6110_v53 }
 0x163   :  { %v4572_v24 = vpop.eup %4571  ;;  %v962_v42 = vadd.f32 1.0, %v4570_v26  ;;  %4597 = vrcp.f32 %v960_v13 }
 0x164   :  { %v4574_v21 = vpop.eup %4573  ;;  %v963_v56 = vadd.f32 1.0, %v4572_v24  ;;  %4599 = vrcp.f32 %v961_v27  ;;  %v993_v27 = vmul.f32 %v6130_v3, %v6106_v14  ;;  %v995_v14 = vmul.f32 %v6134_v7, %v6114_v23 }
 0x165   :  { %v4576_v18 = vpop.eup %4575  ;;  %v980_v63 = vmul.f32 0.0, %v4574_v21  ;;  %4601 = vrcp.f32 %v962_v42 }
 0x166   :  { %v4578_v22 = vpop.eup %4577  ;;  %v981_v9 = vmul.f32 0.0, %v4576_v18  ;;  %4603 = vrcp.f32 %v963_v56 }
 0x167   :  { %v4580_v25 = vpop.eup %4579  ;;  %v982_v35 = vmul.f32 0.0, %v4578_v22  ;;  %v6142_v31 = vadd.f32 %v988_v39, %v980_v63 }
 0x168   :  { %v4582_v28 = vpop.eup %4581  ;;  %v983_v45 = vmul.f32 0.0, %v4580_v25  ;;  %v6146_v13 = vadd.f32 %v989_v17, %v981_v9 }
 0x169   :  { %v4584_v62 = vpop.eup %4583  ;;  %v984_v26 = vmul.f32 0.0, %v4582_v28  ;;  %v6150_v15 = vadd.f32 %v990_v40, %v982_v35  ;;  %4605 = vtanh.f32 %v6142_v31 }
 0x16a   :  { %v4586_v19 = vpop.eup %4585  ;;  %v985_v46 = vmul.f32 0.0, %v4584_v62  ;;  %v6155_v24 = vadd.f32 %v991_v11, %v983_v45  ;;  %4607 = vtanh.f32 %v6146_v13 }
 0x16b   :  { %v4588_v29 = vpop.eup %4587  ;;  %v986_v44 = vmul.f32 0.0, %v4586_v19  ;;  %v6158_v42 = vadd.f32 %v992_v4, %v984_v26  ;;  %4609 = vtanh.f32 %v6150_v15 }
 0x16c   :  { %v987_v10 = vmul.f32 0.0, %v4588_v29  ;;  %v6163_v21 = vadd.f32 %v993_v27, %v985_v46  ;;  %4611 = vtanh.f32 %v6155_v24  ;;  %v4590_v56 = vpop.eup %4589 }
 0x16d   :  { %4613 = vtanh.f32 %v6158_v42  ;;  %v6169_v3 = vadd.f32 %v994_v1, %v986_v44  ;;  %v4592_v63 = vpop.eup %4591 }
 0x16e   :  { %v6171_v18 = vadd.f32 %v995_v14, %v987_v10  ;;  %4615 = vtanh.f32 %v6163_v21  ;;  %v4594_v53 = vpop.eup %4593 }
 0x16f   :  { %4617 = vtanh.f32 %v6169_v3  ;;  %v4596_v30 = vpop.eup %4595 }
 0x170   :  { %4619 = vtanh.f32 %v6171_v18  ;;  %v4598_v39 = vpop.eup %4597 }
 0x171   :  { %v4600_v22 = vpop.eup %4599 }
 0x172   :  { %v4602_v9 = vpop.eup %4601 }
 0x173   :  { %v4604_v23 = vpop.eup %4603 }
 0x176   :  { %v4606_v7 = vpop.eup %4605 }
 0x177   :  { %v4608_v17 = vpop.eup %4607  ;;  %v1012_v25 = vmul.f32 %v4606_v7, %v4590_v56 }
 0x178   :  { %v4610_v35 = vpop.eup %4609  ;;  %v1013_v40 = vmul.f32 %v4608_v17, %v4592_v63 }
 0x179   :  { %v4612_v28 = vpop.eup %4611  ;;  %v1014_v45 = vmul.f32 %v4610_v35, %v4594_v53  ;;  %v1020_v11 = vpack.c.bf16 %v1012_v25, %v1012_v25 }
 0x17a   :  { %v4614_v62 = vpop.eup %4613  ;;  %v1015_v26 = vmul.f32 %v4612_v28, %v4596_v30  ;;  %v1021_v4 = vpack.c.bf16 %v1013_v40, %v1013_v40 }
 0x17b   :  { %v4616_v19 = vpop.eup %4615  ;;  %v1016_v46 = vmul.f32 %v4614_v62, %v4598_v39  ;;  %v1022_v27 = vpack.c.bf16 %v1014_v45, %v1014_v45  ;;  %v1036_v63 = vunpack.c.l.b16 %v1020_v11 }
 0x17c   :  { %v4618_v29 = vpop.eup %4617  ;;  %v1017_v44 = vmul.f32 %v4616_v19, %v4600_v22  ;;  %v1023_v1 = vpack.c.bf16 %v1015_v26, %v1015_v26  ;;  %v1037_v10 = vunpack.c.l.b16 %v1021_v4 }
 0x17d   :  { %v4620_v14 = vpop.eup %4619  ;;  %v1018_v56 = vmul.f32 %v4618_v29, %v4602_v9  ;;  %v1024_v7 = vpack.c.bf16 %v1016_v46, %v1016_v46  ;;  %v1038_v17 = vunpack.c.l.b16 %v1022_v27 }
 0x17e   :  { %v1019_v53 = vmul.f32 %v4620_v14, %v4604_v23  ;;  %v1025_v25 = vpack.c.bf16 %v1017_v44, %v1017_v44  ;;  %v1039_v35 = vunpack.c.l.b16 %v1023_v1  ;;  %v1044_v30 = vrot.slane %v1037_v10, 7 }
 0x17f   :  { %v1026_v40 = vpack.c.bf16 %v1018_v56, %v1018_v56  ;;  %v1040_v28 = vunpack.c.l.b16 %v1024_v7  ;;  %v1047_v39 = vrot.slane %v1038_v17, 6  ;;  %v6183_v7 = vld [vmem:[#allocation7 + $0xe0] ss:$16 sps:$4 sm:$0xff]   ;;  %v6189_v17 = vld [vmem:[#allocation7 + $0xc4] ss:$16 sps:$4 sm:$0xff]  }
 0x180   :  { %v1027_v45 = vpack.c.bf16 %v1019_v53, %v1019_v53  ;;  %v1041_v62 = vunpack.c.l.b16 %v1025_v25  ;;  %v1046_v22 = vsel %vm1045_vm0, %v1044_v30, %v1036_v63  ;;  %v1050_v26 = vrot.slane %v1039_v35, 5  ;;  %v6186_v63 = vld [vmem:[#allocation7 + $0xe8] ss:$16 sps:$4 sm:$0xff]   ;;  %v6192_v53 = vld [vmem:[#allocation7 + $0xcc] ss:$16 sps:$4 sm:$0xff]  }
 0x181   :  { %v1042_v4 = vunpack.c.l.b16 %v1026_v40  ;;  %v1049_v19 = vsel %vm1048_vm1, %v1047_v39, %v1046_v22  ;;  %v1053_v9 = vrot.slane %v1040_v28, 4  ;;  %v7613_v25 = vmov 0   ;;  %v6197_v35 = vld [vmem:[#allocation7 + $0xc0] ss:$16 sps:$4 sm:$0xff]   ;;  %v6200_v30 = vld [vmem:[#allocation7 + $0xc8] ss:$16 sps:$4 sm:$0xff]  }
 0x182   :  { %v1043_v11 = vunpack.c.l.b16 %v1027_v45  ;;  %v1052_v23 = vsel %vm1051_vm2, %v1050_v26, %v1049_v19  ;;  %v1056_v46 = vrot.slane %v1041_v62, 3  ;;  %v6203_v40 = vld [vmem:[#allocation7 + $0xa4] ss:$16 sps:$4 sm:$0xff]   ;;  %v6206_v28 = vld [vmem:[#allocation7 + $0xac] ss:$16 sps:$4 sm:$0xff]  }
 0x183   :  { %v1055_v27 = vsel %vm1054_vm3, %v1053_v9, %v1052_v23  ;;  %v1059_v29 = vrot.slane %v1042_v4, 2  ;;  %v6209_v39 = vld [vmem:[#allocation7 + $0xa0] ss:$16 sps:$4 sm:$0xff]   ;;  %v6212_v45 = vld [vmem:[#allocation7 + $0xa8] ss:$16 sps:$4 sm:$0xff]  }
 0x184   :  { %v1058_v44 = vsel %vm1057_vm4, %v1056_v46, %v1055_v27  ;;  %v1062_v1 = vrot.slane %v1043_v11, 1  ;;  %7614 = vst [vmem:[#allocation54_spill] sm:$0xff] %v6212_v45  ;;  %v7615_v62 = vld [vmem:[#allocation10_spill] sm:$0xff]  ;;  %v7616_v22 = vld [vmem:[#allocation11_spill] sm:$0xff]  ;;  %v7617_v26 = vld [vmem:[#allocation12_spill] sm:$0xff] }
 0x185   :  { %v1061_v10 = vsel %vm1060_vm5, %v1059_v29, %v1058_v44  ;;  %v7626_v4 = vld [vmem:[#allocation21_spill] sm:$0xff]  ;;  %v6235_v19 = vld [vmem:[#allocation7 + $0xe4] ss:$16 sps:$4 sm:$0xff]  }
 0x186   :  { %v1064_v14 = vsel %vm1063_vm6, %v1062_v1, %v1061_v10  ;;  %7627 = vst [vmem:[#allocation10_spill] sm:$0xff] %v6235_v19  ;;  %v6238_v9 = vld [vmem:[#allocation7 + $0xec] ss:$16 sps:$4 sm:$0xff]  }
 0x187   :  { %v1065_v56 = vpack.c.b16 %v1064_v14, %v1064_v14  ;;  %7628 = vst [vmem:[#allocation11_spill] sm:$0xff] %v6238_v9 }
 0x189   :  { %1100 = vmatmul.mubr.bf16.vlgmr.msra.gmra.mxu0 %v1065_v56  ;;  %1141 = vmatmul.mubr.bf16.vlgmr.msra.gmra.mxu1 %v1065_v56  ;;  %v7629_v56 = vld [vmem:[#allocation23_spill] sm:$0xff] }
 0x18a   :  { %1502 = vmatpush1.bf16.msra.mxu0 %v6183_v7  ;;  %1543 = vmatpush1.bf16.msra.mxu1 %v6186_v63 }
 0x18b   :  { %1503 = vmatprep.subr.bf16.mxu0 %v6189_v17  ;;  %1544 = vmatprep.subr.bf16.mxu1 %v6192_v53 }
 0x18c   :  { %1533 = vmatprep.mubr.bf16.mxu0 %v7613_v25  ;;  %1574 = vmatprep.mubr.bf16.mxu1 %v7613_v25 }
 0x18e   :  { %1504 = vmatpush1.bf16.msra.mxu0 %v6197_v35  ;;  %1545 = vmatpush1.bf16.msra.mxu1 %v6200_v30 }
 0x18f   :  { %1505 = vmatprep.subr.bf16.mxu0 %v6203_v40  ;;  %1546 = vmatprep.subr.bf16.mxu1 %v6206_v28 }
 0x192   :  { %1506 = vmatpush1.bf16.msra.mxu0 %v6209_v39  ;;  %1547 = vmatpush1.bf16.msra.mxu1 %v6212_v45 }
 0x193   :  { %1507 = vmatprep.subr.bf16.mxu0 %v5765_v47  ;;  %1548 = vmatprep.subr.bf16.mxu1 %v5769_v48  ;;  %v7618_v47 = vld [vmem:[#allocation13_spill] sm:$0xff]  ;;  %v7619_v48 = vld [vmem:[#allocation14_spill] sm:$0xff] }
 0x196   :  { %1508 = vmatpush1.bf16.msra.mxu0 %v5771_v49  ;;  %1549 = vmatpush1.bf16.msra.mxu1 %v5773_v50  ;;  %v7620_v49 = vld [vmem:[#allocation15_spill] sm:$0xff]  ;;  %v7621_v50 = vld [vmem:[#allocation16_spill] sm:$0xff] }
 0x197   :  { %1509 = vmatprep.subr.bf16.mxu0 %v5777_v51  ;;  %1550 = vmatprep.subr.bf16.mxu1 %v5781_v52  ;;  %v7622_v51 = vld [vmem:[#allocation17_spill] sm:$0xff]  ;;  %v7623_v52 = vld [vmem:[#allocation18_spill] sm:$0xff] }
 0x19a   :  { %1510 = vmatpush1.bf16.msra.mxu0 %v5787_v54  ;;  %1551 = vmatpush1.bf16.msra.mxu1 %v5789_v55  ;;  %v7624_v54 = vld [vmem:[#allocation19_spill] sm:$0xff]  ;;  %v7625_v55 = vld [vmem:[#allocation20_spill] sm:$0xff] }
 0x19b   :  { %1511 = vmatprep.subr.bf16.mxu0 %v7615_v62  ;;  %1552 = vmatprep.subr.bf16.mxu1 %v7616_v22 }
 0x19e   :  { %1512 = vmatpush1.bf16.msra.mxu0 %v7617_v26  ;;  %1553 = vmatpush1.bf16.msra.mxu1 %v7618_v47  ;;  %v7630_v47 = vld [vmem:[#allocation22_spill] sm:$0xff] }
 0x19f   :  { %1513 = vmatprep.subr.bf16.mxu0 %v7619_v48  ;;  %1554 = vmatprep.subr.bf16.mxu1 %v7620_v49 }
 0x1a2   :  { %1514 = vmatpush1.bf16.msra.mxu0 %v7621_v50  ;;  %1555 = vmatpush1.bf16.msra.mxu1 %v7622_v51 }
 0x1a3   :  { %1515 = vmatprep.subr.bf16.mxu0 %v7623_v52  ;;  %1556 = vmatprep.subr.bf16.mxu1 %v7624_v54 }
 0x1a6   :  { %1516 = vmatpush1.bf16.msra.mxu0 %v7625_v55  ;;  %1557 = vmatpush1.bf16.msra.mxu1 %v7626_v4 }
 0x1a7   :  { %1935 = vmatprep.subr.bf16.mxu0 %v6235_v19  ;;  %1976 = vmatprep.subr.bf16.mxu1 %v6238_v9 }
 0x249   :  { %v1101_v11 = vpop.f32.mrf.mxu0  ;;  %v1142_v23 = vpop.f32.mrf.mxu1 }
 0x24a   :  { %v1153_v46 = vrot.slane %v1101_v11, 7  ;;  %v1157_v27 = vrot.slane %v1101_v11, 1  ;;  %v1161_v29 = vrot.slane %v1101_v11, 2  ;;  %v1165_v44 = vrot.slane %v1101_v11, 3 }
 0x24b   :  { %v1169_v1 = vrot.slane %v1101_v11, 4  ;;  %v1173_v10 = vrot.slane %v1101_v11, 5  ;;  %v1177_v14 = vrot.slane %v1101_v11, 6  ;;  %v1217_v62 = vadd.f32 %v1101_v11, %v7629_v56  ;;  %v6242_v22 = vpop.f32.mrf.mxu0  ;;  %v6244_v26 = vpop.f32.mrf.mxu1 }
 0x24c   :  { %v1213_v48 = vadd.f32 %v1153_v46, %v7630_v47  ;;  %v1221_v49 = vadd.f32 %v1157_v27, %v5934_v0  ;;  %v1225_v50 = vadd.f32 %v1161_v29, %v5936_v32  ;;  %v1229_v51 = vadd.f32 %v1165_v44, %v5938_v5 }
 0x24d   :  { %v1233_v52 = vadd.f32 %v1169_v1, %v5940_v36  ;;  %v1237_v54 = vadd.f32 %v1173_v10, %v5942_v37  ;;  %v4217_v55 = vmul.f32 -1.442695, %v1217_v62  ;;  %v1105_v4 = vpop.f32.mrf.mxu0  ;;  %v1146_v9 = vpop.f32.mrf.mxu1  ;;  %v1241_v11 = vadd.f32 %v1177_v14, %v5944_v33 }
 0x24e   :  { %v4216_v56 = vmul.f32 -1.442695, %v1213_v48  ;;  %v4218_v19 = vmul.f32 -1.442695, %v1221_v49  ;;  %v4219_v45 = vmul.f32 -1.442695, %v1225_v50  ;;  %v1219_v49 = vadd.f32 %v1142_v23, %v5974_v57 }
 0x24f   :  { %4621 = vpow2.f32 %v4217_v55  ;;  %v4220_v46 = vmul.f32 -1.442695, %v1229_v51  ;;  %v1106_v47 = vpop.f32.mrf.mxu0  ;;  %v1147_v27 = vpop.f32.mrf.mxu1  ;;  %v4221_v29 = vmul.f32 -1.442695, %v1233_v52  ;;  %v1155_v32 = vrot.slane %v1142_v23, 7 }
 0x250   :  { %4623 = vpow2.f32 %v4216_v56  ;;  %v4222_v44 = vmul.f32 -1.442695, %v1237_v54  ;;  %v1159_v1 = vrot.slane %v1142_v23, 1  ;;  %v4223_v10 = vmul.f32 -1.442695, %v1241_v11 }
 0x251   :  { %4625 = vpow2.f32 %v4218_v19  ;;  %v1163_v62 = vrot.slane %v1142_v23, 2  ;;  %v1167_v9 = vrot.slane %v1142_v23, 3  ;;  %v1215_v14 = vadd.f32 %v1155_v32, %v5959_v60 }
 0x252   :  { %4627 = vpow2.f32 %v4219_v45  ;;  %v1171_v48 = vrot.slane %v1142_v23, 4  ;;  %v1175_v47 = vrot.slane %v1142_v23, 5  ;;  %v1223_v56 = vadd.f32 %v1159_v1, %v5979_v8 }
 0x253   :  { %4629 = vpow2.f32 %v4220_v46  ;;  %v1179_v50 = vrot.slane %v1142_v23, 6  ;;  %v1227_v19 = vadd.f32 %v1163_v62, %v5984_v61  ;;  %v1231_v45 = vadd.f32 %v1167_v9, %v5989_v59 }
 0x254   :  { %4631 = vpow2.f32 %v4221_v29  ;;  %v1235_v51 = vadd.f32 %v1171_v48, %v5996_v34  ;;  %v1239_v32 = vadd.f32 %v1175_v47, %v6002_v41  ;;  %v1154_v54 = vrot.slane %v6242_v22, 7 }
 0x255   :  { %4633 = vpow2.f32 %v4222_v44  ;;  %v1243_v52 = vadd.f32 %v1179_v50, %v6008_v38  ;;  %v1158_v11 = vrot.slane %v6242_v22, 1  ;;  %v1162_v29 = vrot.slane %v6242_v22, 2 }
 0x256   :  { %4635 = vpow2.f32 %v4223_v10  ;;  %v1166_v44 = vrot.slane %v6242_v22, 3  ;;  %v1170_v62 = vrot.slane %v6242_v22, 4  ;;  %v1214_v9 = vadd.f32 %v1154_v54, %v5966_v2 }
 0x257   :  { %4637 = vtanh.f32 %v1215_v14  ;;  %v1218_v47 = vadd.f32 %v6242_v22, %v6014_v6 }
 0x258   :  { %4639 = vtanh.f32 %v1219_v49  ;;  %v1174_v49 = vrot.slane %v6242_v22, 5  ;;  %v1230_v54 = vadd.f32 %v1166_v44, %v6041_v16  ;;  %v1160_v44 = vrot.slane %v6244_v26, 1 }
 0x259   :  { %4641 = vtanh.f32 %v1223_v56 }
 0x25a   :  { %4643 = vtanh.f32 %v1227_v19  ;;  %v1178_v19 = vrot.slane %v6242_v22, 6  ;;  %v1234_v22 = vadd.f32 %v1170_v62, %v6050_v20  ;;  %v4228_v62 = vmul.f32 -1.442695, %v1230_v54  ;;  %v7634_v54 = vld [vmem:[#allocation43_spill] sm:$0xff] }
 0x25b   :  { %4645 = vtanh.f32 %v1231_v45  ;;  %v1222_v45 = vadd.f32 %v1158_v11, %v6023_v43  ;;  %v4225_v11 = vmul.f32 -1.442695, %v1218_v47  ;;  %v1168_v47 = vrot.slane %v6244_v26, 3 }
 0x25c   :  { %v4622_v55 = vpop.eup %4621  ;;  %4647 = vtanh.f32 %v1235_v51  ;;  %v1224_v20 = vadd.f32 %v1160_v44, %v7634_v54 }
 0x25d   :  { %v4624_v23 = vpop.eup %4623  ;;  %v1270_v4 = vadd.f32 1.0, %v4622_v55  ;;  %4649 = vtanh.f32 %v1239_v32 }
 0x25e   :  { %v4626_v46 = vpop.eup %4625  ;;  %v1269_v27 = vadd.f32 1.0, %v4624_v23  ;;  %4651 = vtanh.f32 %v1243_v52  ;;  %v1226_v52 = vadd.f32 %v1162_v29, %v6032_v12  ;;  %v1238_v29 = vadd.f32 %v1174_v49, %v6058_v58 }
 0x25f   :  { %v4628_v1 = vpop.eup %4627  ;;  %v1271_v10 = vadd.f32 1.0, %v4626_v46  ;;  %4653 = vrcp.f32 %v1270_v4  ;;  %v4224_v4 = vmul.f32 -1.442695, %v1214_v9  ;;  %v1156_v46 = vrot.slane %v6244_v26, 7  ;;  %v7631_v9 = vld [vmem:[#allocation52_spill] sm:$0xff] }
 0x260   :  { %v4630_v14 = vpop.eup %4629  ;;  %v1272_v48 = vadd.f32 1.0, %v4628_v1  ;;  %4655 = vrcp.f32 %v1269_v27  ;;  %v1172_v58 = vrot.slane %v6244_v26, 4 }
 0x261   :  { %v4632_v56 = vpop.eup %4631  ;;  %v1273_v50 = vadd.f32 1.0, %v4630_v14  ;;  %4657 = vrcp.f32 %v1271_v10  ;;  %v4226_v14 = vmul.f32 -1.442695, %v1222_v45  ;;  %v4229_v45 = vmul.f32 -1.442695, %v1234_v22  ;;  %v7635_v22 = vld [vmem:[#allocation45_spill] sm:$0xff] }
 0x262   :  { %v4634_v51 = vpop.eup %4633  ;;  %v1274_v32 = vadd.f32 1.0, %v4632_v56  ;;  %4659 = vrcp.f32 %v1272_v48  ;;  %v1242_v56 = vadd.f32 %v1178_v19, %v7631_v9  ;;  %v4230_v9 = vmul.f32 -1.442695, %v1238_v29  ;;  %v7637_v29 = vld [vmem:[#allocation49_spill] sm:$0xff] }
 0x263   :  { %v4636_v55 = vpop.eup %4635  ;;  %v1275_v23 = vadd.f32 1.0, %v4634_v51  ;;  %4661 = vrcp.f32 %v1273_v50  ;;  %v4227_v50 = vmul.f32 -1.442695, %v1226_v52  ;;  %v1164_v51 = vrot.slane %v6244_v26, 2 }
 0x264   :  { %v6275_v27 = vpop.eup %4637  ;;  %v1276_v1 = vadd.f32 1.0, %v4636_v55  ;;  %4663 = vrcp.f32 %v1274_v32  ;;  %v7632_v55 = vld [vmem:[#allocation32_spill] sm:$0xff]  ;;  %v1236_v2 = vadd.f32 %v1172_v58, %v7637_v29 }
 0x265   :  { %v6278_v10 = vpop.eup %4639  ;;  %4665 = vrcp.f32 %v1275_v23  ;;  %v1216_v23 = vadd.f32 %v1156_v46, %v7632_v55  ;;  %v4231_v46 = vmul.f32 -1.442695, %v1242_v56  ;;  %v1228_v55 = vadd.f32 %v1164_v51, %v7635_v22  ;;  %v7638_v56 = vld [vmem:[#allocation51_spill] sm:$0xff]  ;;  %v7639_v51 = vld [vmem:[#allocation53_spill] sm:$0xff] }
 0x266   :  { %v6282_v48 = vpop.eup %4641  ;;  %4667 = vrcp.f32 %v1276_v1  ;;  %v7633_v1 = vld [vmem:[#allocation41_spill] sm:$0xff]  ;;  %v4237_v58 = vmul.f32 -1.442695, %v1236_v2 }
 0x267   :  { %v6286_v32 = vpop.eup %4643  ;;  %4669 = vpow2.f32 %v4224_v4  ;;  %v1220_v19 = vadd.f32 %v6244_v26, %v7633_v1  ;;  %v1176_v4 = vrot.slane %v6244_v26, 5  ;;  %v7636_v1 = vld [vmem:[#allocation47_spill] sm:$0xff]  ;;  %v4232_v6 = vmul.f32 -1.442695, %v1216_v23 }
 0x268   :  { %v6290_v49 = vpop.eup %4645  ;;  %4671 = vpow2.f32 %v4225_v11  ;;  %v1180_v11 = vrot.slane %v6244_v26, 6  ;;  %v1232_v43 = vadd.f32 %v1168_v47, %v7636_v1  ;;  %v4234_v26 = vmul.f32 -1.442695, %v1224_v20 }
 0x269   :  { %v6295_v52 = vpop.eup %4647  ;;  %4673 = vpow2.f32 %v4226_v14  ;;  %v4233_v44 = vmul.f32 -1.442695, %v1220_v19  ;;  %v4235_v22 = vmul.f32 -1.442695, %v1228_v55 }
 0x26a   :  { %v6299_v16 = vpop.eup %4649  ;;  %4675 = vpow2.f32 %v4227_v50  ;;  %v1240_v50 = vadd.f32 %v1176_v4, %v7638_v56  ;;  %v4236_v23 = vmul.f32 -1.442695, %v1232_v43 }
 0x26b   :  { %v6303_v12 = vpop.eup %4651  ;;  %4677 = vpow2.f32 %v4228_v62  ;;  %v1244_v62 = vadd.f32 %v1180_v11, %v7639_v51 }
 0x26c   :  { %v6306_v14 = vpop.eup %4653  ;;  %4679 = vpow2.f32 %v4229_v45 }
 0x26d   :  { %v6309_v54 = vpop.eup %4655  ;;  %4681 = vpow2.f32 %v4230_v9  ;;  %v4238_v9 = vmul.f32 -1.442695, %v1240_v50  ;;  %v4239_v20 = vmul.f32 -1.442695, %v1244_v62 }
 0x26e   :  { %v6312_v38 = vpop.eup %4657  ;;  %4683 = vpow2.f32 %v4231_v46 }
 0x26f   :  { %v6315_v47 = vpop.eup %4659  ;;  %4685 = vpow2.f32 %v4232_v6 }
 0x270   :  { %v6317_v45 = vpop.eup %4661  ;;  %4687 = vpow2.f32 %v4233_v44 }
 0x271   :  { %v6319_v19 = vpop.eup %4663  ;;  %4689 = vpow2.f32 %v4234_v26 }
 0x272   :  { %v6321_v4 = vpop.eup %4665  ;;  %4691 = vpow2.f32 %v4235_v22 }
 0x273   :  { %v6323_v46 = vpop.eup %4667  ;;  %4693 = vpow2.f32 %v4236_v23 }
 0x274   :  { %v4670_v55 = vpop.eup %4669  ;;  %4695 = vpow2.f32 %v4237_v58 }
 0x275   :  { %v4672_v11 = vpop.eup %4671  ;;  %v1317_v6 = vadd.f32 1.0, %v4670_v55  ;;  %4697 = vpow2.f32 %v4238_v9 }
 0x276   :  { %v4674_v43 = vpop.eup %4673  ;;  %v1318_v51 = vadd.f32 1.0, %v4672_v11  ;;  %4699 = vpow2.f32 %v4239_v20 }
 0x277   :  { %v4676_v2 = vpop.eup %4675  ;;  %v1319_v44 = vadd.f32 1.0, %v4674_v43  ;;  %4701 = vrcp.f32 %v1317_v6 }
 0x278   :  { %v4678_v26 = vpop.eup %4677  ;;  %v1320_v50 = vadd.f32 1.0, %v4676_v2  ;;  %4703 = vrcp.f32 %v1318_v51 }
 0x279   :  { %v4680_v56 = vpop.eup %4679  ;;  %v1321_v22 = vadd.f32 1.0, %v4678_v26  ;;  %4705 = vrcp.f32 %v1319_v44 }
 0x27a   :  { %v4682_v62 = vpop.eup %4681  ;;  %v1322_v29 = vadd.f32 1.0, %v4680_v56  ;;  %4707 = vrcp.f32 %v1320_v50  ;;  %v1405_v50 = vrot.slane %v6142_v31, 7  ;;  %v1411_v31 = vrot.slane %v6169_v3, 7 }
 0x27b   :  { %v4684_v23 = vpop.eup %4683  ;;  %v1323_v58 = vadd.f32 1.0, %v4682_v62  ;;  %4709 = vrcp.f32 %v1321_v22  ;;  %v1406_v22 = vrot.slane %v6146_v13, 7  ;;  %v1429_v13 = vmul.f32 %v6309_v54, %v6275_v27 }
 0x27c   :  { %v4686_v55 = vpop.eup %4685  ;;  %v1324_v9 = vadd.f32 1.0, %v4684_v23  ;;  %4711 = vrcp.f32 %v1322_v29  ;;  %v1407_v23 = vrot.slane %v6150_v15, 7 }
 0x27d   :  { %v4688_v11 = vpop.eup %4687  ;;  %4713 = vrcp.f32 %v1323_v58  ;;  %v1373_v20 = vadd.f32 1.0, %v4686_v55  ;;  %v1408_v58 = vrot.slane %v6155_v24, 7  ;;  %v1412_v24 = vrot.slane %v6171_v18, 7 }
 0x27e   :  { %v4690_v43 = vpop.eup %4689  ;;  %4715 = vrcp.f32 %v1324_v9  ;;  %v1374_v6 = vadd.f32 1.0, %v4688_v11  ;;  %v1409_v11 = vrot.slane %v6158_v42, 7 }
 0x27f   :  { %v4692_v2 = vpop.eup %4691  ;;  %v1375_v51 = vadd.f32 1.0, %v4690_v43  ;;  %4717 = vrcp.f32 %v1373_v20 }
 0x280   :  { %v4694_v1 = vpop.eup %4693  ;;  %v1376_v26 = vadd.f32 1.0, %v4692_v2  ;;  %4719 = vrcp.f32 %v1374_v6  ;;  %v1430_v2 = vmul.f32 %v6306_v14, %v6278_v10  ;;  %v1433_v10 = vmul.f32 %v6317_v45, %v6290_v49 }
 0x281   :  { %v4696_v44 = vpop.eup %4695  ;;  %v1377_v41 = vadd.f32 1.0, %v4694_v1  ;;  %4721 = vrcp.f32 %v1375_v51  ;;  %v1410_v1 = vrot.slane %v6163_v21, 7  ;;  %v1431_v21 = vmul.f32 %v6312_v38, %v6282_v48 }
 0x282   :  { %v4698_v56 = vpop.eup %4697  ;;  %v1378_v62 = vadd.f32 1.0, %v4696_v44  ;;  %4723 = vrcp.f32 %v1376_v26 }
 0x283   :  { %v4700_v29 = vpop.eup %4699  ;;  %v1379_v55 = vadd.f32 1.0, %v4698_v56  ;;  %4725 = vrcp.f32 %v1377_v41  ;;  %v1432_v41 = vmul.f32 %v6315_v47, %v6286_v32 }
 0x284   :  { %v4702_v9 = vpop.eup %4701  ;;  %v1380_v20 = vadd.f32 1.0, %v4700_v29  ;;  %4727 = vrcp.f32 %v1378_v62  ;;  %v1435_v62 = vmul.f32 %v6321_v4, %v6299_v16  ;;  %v1436_v29 = vmul.f32 %v6323_v46, %v6303_v12 }
 0x285   :  { %v4704_v43 = vpop.eup %4703  ;;  %v1421_v6 = vmul.f32 %v4702_v9, %v1405_v50  ;;  %4729 = vrcp.f32 %v1379_v55  ;;  %v1434_v50 = vmul.f32 %v6319_v19, %v6295_v52 }
 0x286   :  { %v4706_v15 = vpop.eup %4705  ;;  %v1422_v51 = vmul.f32 %v4704_v43, %v1406_v22  ;;  %4731 = vrcp.f32 %v1380_v20 }
 0x287   :  { %v4708_v42 = vpop.eup %4707  ;;  %v1423_v26 = vmul.f32 %v4706_v15, %v1407_v23  ;;  %v6339_v44 = vadd.f32 %v1429_v13, %v1421_v6 }
 0x288   :  { %v4710_v3 = vpop.eup %4709  ;;  %v6343_v27 = vadd.f32 %v1430_v2, %v1422_v51  ;;  %v1424_v18 = vmul.f32 %v4708_v42, %v1408_v58 }
 0x289   :  { %v4712_v54 = vpop.eup %4711  ;;  %v1425_v14 = vmul.f32 %v4710_v3, %v1409_v11  ;;  %v6347_v56 = vadd.f32 %v1431_v21, %v1423_v26  ;;  %4733 = vtanh.f32 %v6339_v44 }
 0x28a   :  { %v4714_v38 = vpop.eup %4713  ;;  %v1426_v48 = vmul.f32 %v4712_v54, %v1410_v1  ;;  %v6352_v22 = vadd.f32 %v1432_v41, %v1424_v18  ;;  %4735 = vtanh.f32 %v6343_v27 }
 0x28b   :  { %v4716_v32 = vpop.eup %4715  ;;  %v1427_v47 = vmul.f32 %v4714_v38, %v1411_v31  ;;  %v6357_v49 = vadd.f32 %v1433_v10, %v1425_v14  ;;  %4737 = vtanh.f32 %v6347_v56 }
 0x28c   :  { %v1428_v45 = vmul.f32 %v4716_v32, %v1412_v24  ;;  %v6362_v23 = vadd.f32 %v1434_v50, %v1426_v48  ;;  %4739 = vtanh.f32 %v6352_v22  ;;  %v4718_v19 = vpop.eup %4717 }
 0x28d   :  { %v6365_v52 = vadd.f32 %v1435_v62, %v1427_v47  ;;  %4741 = vtanh.f32 %v6357_v49  ;;  %v4720_v16 = vpop.eup %4719 }
 0x28e   :  { %v6368_v58 = vadd.f32 %v1436_v29, %v1428_v45  ;;  %4743 = vtanh.f32 %v6362_v23  ;;  %v4722_v4 = vpop.eup %4721 }
 0x28f   :  { %4745 = vtanh.f32 %v6365_v52  ;;  %v4724_v12 = vpop.eup %4723 }
 0x290   :  { %4747 = vtanh.f32 %v6368_v58  ;;  %v4726_v46 = vpop.eup %4725 }
 0x291   :  { %v4728_v55 = vpop.eup %4727 }
 0x292   :  { %v4730_v9 = vpop.eup %4729 }
 0x293   :  { %v4732_v11 = vpop.eup %4731 }
 0x296   :  { %v4734_v1 = vpop.eup %4733 }
 0x297   :  { %v4736_v20 = vpop.eup %4735  ;;  %v1453_v43 = vmul.f32 %v4734_v1, %v4718_v19 }
 0x298   :  { %v4738_v31 = vpop.eup %4737  ;;  %v1454_v13 = vmul.f32 %v4736_v20, %v4720_v16 }
 0x299   :  { %v4740_v6 = vpop.eup %4739  ;;  %v1455_v15 = vmul.f32 %v4738_v31, %v4722_v4  ;;  %v1461_v24 = vpack.c.bf16 %v1453_v43, %v1453_v43 }
 0x29a   :  { %v4742_v2 = vpop.eup %4741  ;;  %v1456_v51 = vmul.f32 %v4740_v6, %v4724_v12  ;;  %v1462_v42 = vpack.c.bf16 %v1454_v13, %v1454_v13 }
 0x29b   :  { %v4744_v21 = vpop.eup %4743  ;;  %v1457_v26 = vmul.f32 %v4742_v2, %v4726_v46  ;;  %v1463_v3 = vpack.c.bf16 %v1455_v15, %v1455_v15  ;;  %v1477_v41 = vunpack.c.l.b16 %v1461_v24 }
 0x29c   :  { %v4746_v18 = vpop.eup %4745  ;;  %v1458_v54 = vmul.f32 %v4744_v21, %v4728_v55  ;;  %v1464_v10 = vpack.c.bf16 %v1456_v51, %v1456_v51  ;;  %v1478_v14 = vunpack.c.l.b16 %v1462_v42 }
 0x29d   :  { %v4748_v38 = vpop.eup %4747  ;;  %v1459_v48 = vmul.f32 %v4746_v18, %v4730_v9  ;;  %v1465_v50 = vpack.c.bf16 %v1457_v26, %v1457_v26  ;;  %v1479_v32 = vunpack.c.l.b16 %v1463_v3  ;;  %v1485_v47 = vrot.slane %v1477_v41, 1  ;;  %v6416_v26 = vld [vmem:[#allocation7 + $0x44] ss:$16 sps:$4 sm:$0xff]   ;;  %v6419_v3 = vld [vmem:[#allocation7 + $0x4c] ss:$16 sps:$4 sm:$0xff]  }
 0x29e   :  { %v1460_v62 = vmul.f32 %v4748_v38, %v4732_v11  ;;  %v1466_v45 = vpack.c.bf16 %v1458_v54, %v1458_v54  ;;  %v1480_v29 = vunpack.c.l.b16 %v1464_v10  ;;  %v6422_v41 = vld [vmem:[#allocation7 + $0x40] ss:$16 sps:$4 sm:$0xff]   ;;  %v6425_v18 = vld [vmem:[#allocation7 + $0x48] ss:$16 sps:$4 sm:$0xff]   ;;  %v6428_v54 = vld [vmem:[#allocation7 + $0x24] ss:$16 sps:$4 sm:$0xff]  }
 0x29f   :  { %v1467_v19 = vpack.c.bf16 %v1459_v48, %v1459_v48  ;;  %v1481_v16 = vunpack.c.l.b16 %v1465_v50  ;;  %v1486_v4 = vsel %vm1045_vm0, %v1478_v14, %v1485_v47  ;;  %v1487_v12 = vrot.slane %v1479_v32, 7  ;;  %v6431_v10 = vld [vmem:[#allocation7 + $0x2c] ss:$16 sps:$4 sm:$0xff]   ;;  %v6434_v14 = vld [vmem:[#allocation7 + $0x20] ss:$16 sps:$4 sm:$0xff]  }
 0x2a0   :  { %v1468_v46 = vpack.c.bf16 %v1460_v62, %v1460_v62  ;;  %v1482_v1 = vunpack.c.l.b16 %v1466_v45  ;;  %v1489_v20 = vrot.slane %v1480_v29, 6  ;;  %v6437_v38 = vld [vmem:[#allocation7 + $0x28] ss:$16 sps:$4 sm:$0xff]   ;;  %v6440_v48 = vld [vmem:[#allocation7 + $0x4] ss:$16 sps:$4 sm:$0xff]  }
 0x2a1   :  { %v1483_v43 = vunpack.c.l.b16 %v1467_v19  ;;  %v1488_v55 = vsel %vm1048_vm1, %v1487_v12, %v1486_v4  ;;  %v1491_v31 = vrot.slane %v1481_v16, 5  ;;  %v6443_v50 = vld [vmem:[#allocation7 + $0xc] ss:$16 sps:$4 sm:$0xff]   ;;  %v6446_v32 = vld [vmem:[#allocation7] ss:$16 sps:$4 sm:$0xff]  }
 0x2a2   :  { %v1484_v13 = vunpack.c.l.b16 %v1468_v46  ;;  %v1490_v9 = vsel %vm1051_vm2, %v1489_v20, %v1488_v55  ;;  %v1493_v6 = vrot.slane %v1482_v1, 4  ;;  %7641 = vst [vmem:[#allocation12_spill] sm:$0xff] %v6446_v32  ;;  %v6449_v47 = vld [vmem:[#allocation7 + $0x8] ss:$16 sps:$4 sm:$0xff]   ;;  %v7643_v62 = vld [vmem:[#allocation10_spill] sm:$0xff] }
 0x2a3   :  { %v1492_v11 = vsel %vm1054_vm3, %v1491_v31, %v1490_v9  ;;  %v1495_v15 = vrot.slane %v1483_v43, 3  ;;  %7642 = vst [vmem:[#allocation13_spill] sm:$0xff] %v6449_v47  ;;  %v7644_v45 = vld [vmem:[#allocation11_spill] sm:$0xff]  ;;  %v7645_v9 = vld [vmem:[#allocation22_spill] sm:$0xff] }
 0x2a4   :  { %v1494_v24 = vsel %vm1057_vm4, %v1493_v6, %v1492_v11  ;;  %v1497_v2 = vrot.slane %v1484_v13, 2  ;;  %v7646_v11 = vld [vmem:[#allocation23_spill] sm:$0xff] }
 0x2a5   :  { %v1496_v51 = vsel %vm1060_vm5, %v1495_v15, %v1494_v24  ;;  %v7647_v24 = vld [vmem:[#allocation25_spill] sm:$0xff] }
 0x2a6   :  { %v1498_v42 = vsel %vm1063_vm6, %v1497_v2, %v1496_v51 }
 0x2a7   :  { %v1499_v21 = vpack.c.b16 %v1498_v42, %v1498_v42 }
 0x2a9   :  { %1534 = vmatmul.mubr.bf16.vlgmr.msra.gmra.mxu0 %v1499_v21  ;;  %1575 = vmatmul.mubr.bf16.vlgmr.msra.gmra.mxu1 %v1499_v21 }
 0x2aa   :  { %1936 = vmatpush1.bf16.msra.mxu0 %v6183_v7  ;;  %1977 = vmatpush1.bf16.msra.mxu1 %v6186_v63  ;;  %v7640_v7 = vld [vmem:[#allocation54_spill] sm:$0xff] }
 0x2ab   :  { %1937 = vmatprep.subr.bf16.mxu0 %v6189_v17  ;;  %1978 = vmatprep.subr.bf16.mxu1 %v6192_v53  ;;  %v6392_v63 = vld [vmem:[#allocation7 + $0x84] ss:$16 sps:$4 sm:$0xff]   ;;  %v6395_v17 = vld [vmem:[#allocation7 + $0x8c] ss:$16 sps:$4 sm:$0xff]   ;;  %v6398_v53 = vld [vmem:[#allocation7 + $0x80] ss:$16 sps:$4 sm:$0xff]  }
 0x2ac   :  { %1967 = vmatprep.mubr.bf16.mxu0 %v7613_v25  ;;  %2008 = vmatprep.mubr.bf16.mxu1 %v7613_v25 }
 0x2ae   :  { %1938 = vmatpush1.bf16.msra.mxu0 %v6197_v35  ;;  %1979 = vmatpush1.bf16.msra.mxu1 %v6200_v30  ;;  %v6401_v35 = vld [vmem:[#allocation7 + $0x88] ss:$16 sps:$4 sm:$0xff]   ;;  %v6404_v30 = vld [vmem:[#allocation7 + $0x64] ss:$16 sps:$4 sm:$0xff]  }
 0x2af   :  { %1939 = vmatprep.subr.bf16.mxu0 %v6203_v40  ;;  %1980 = vmatprep.subr.bf16.mxu1 %v6206_v28  ;;  %v6407_v40 = vld [vmem:[#allocation7 + $0x6c] ss:$16 sps:$4 sm:$0xff]   ;;  %v6410_v28 = vld [vmem:[#allocation7 + $0x60] ss:$16 sps:$4 sm:$0xff]  }
 0x2b2   :  { %1940 = vmatpush1.bf16.msra.mxu0 %v6209_v39  ;;  %1981 = vmatpush1.bf16.msra.mxu1 %v7640_v7  ;;  %v6413_v39 = vld [vmem:[#allocation7 + $0x68] ss:$16 sps:$4 sm:$0xff]  }
 0x2b3   :  { %1941 = vmatprep.subr.bf16.mxu0 %v6392_v63  ;;  %1982 = vmatprep.subr.bf16.mxu1 %v6395_v17 }
 0x2b6   :  { %1942 = vmatpush1.bf16.msra.mxu0 %v6398_v53  ;;  %1983 = vmatpush1.bf16.msra.mxu1 %v6401_v35 }
 0x2b7   :  { %1943 = vmatprep.subr.bf16.mxu0 %v6404_v30  ;;  %1984 = vmatprep.subr.bf16.mxu1 %v6407_v40 }
 0x2ba   :  { %1944 = vmatpush1.bf16.msra.mxu0 %v6410_v28  ;;  %1985 = vmatpush1.bf16.msra.mxu1 %v6413_v39 }
 0x2bb   :  { %1945 = vmatprep.subr.bf16.mxu0 %v6416_v26  ;;  %1986 = vmatprep.subr.bf16.mxu1 %v6419_v3 }
 0x2be   :  { %1946 = vmatpush1.bf16.msra.mxu0 %v6422_v41  ;;  %1987 = vmatpush1.bf16.msra.mxu1 %v6425_v18 }
 0x2bf   :  { %1947 = vmatprep.subr.bf16.mxu0 %v6428_v54  ;;  %1988 = vmatprep.subr.bf16.mxu1 %v6431_v10 }
 0x2c2   :  { %1948 = vmatpush1.bf16.msra.mxu0 %v6434_v14  ;;  %1989 = vmatpush1.bf16.msra.mxu1 %v6437_v38 }
 0x2c3   :  { %1949 = vmatprep.subr.bf16.mxu0 %v6440_v48  ;;  %1990 = vmatprep.subr.bf16.mxu1 %v6443_v50 }
 0x2c6   :  { %1950 = vmatpush1.bf16.msra.mxu0 %v6446_v32  ;;  %1991 = vmatpush1.bf16.msra.mxu1 %v6449_v47 }
 0x2c7   :  { %2369 = vmatprep.subr.bf16.mxu0 %v7643_v62  ;;  %2410 = vmatprep.subr.bf16.mxu1 %v7644_v45 }
 0x369   :  { %v1535_v29 = vpop.f32.mrf.mxu0  ;;  %v1576_v19 = vpop.f32.mrf.mxu1 }
 0x36a   :  { %v1587_v16 = vrot.slane %v1535_v29, 6  ;;  %v1591_v4 = vrot.slane %v1535_v29, 7  ;;  %v1595_v12 = vrot.slane %v1535_v29, 1  ;;  %v1599_v46 = vrot.slane %v1535_v29, 2 }
 0x36b   :  { %v1603_v1 = vrot.slane %v1535_v29, 3  ;;  %v1607_v20 = vrot.slane %v1535_v29, 4  ;;  %v1611_v43 = vrot.slane %v1535_v29, 5  ;;  %v1655_v55 = vadd.f32 %v1535_v29, %v5934_v0  ;;  %v6455_v31 = vpop.f32.mrf.mxu0  ;;  %v6457_v13 = vpop.f32.mrf.mxu1 }
 0x36c   :  { %v1647_v6 = vadd.f32 %v1587_v16, %v7645_v9  ;;  %v1651_v15 = vadd.f32 %v1591_v4, %v7646_v11  ;;  %v1659_v2 = vadd.f32 %v1595_v12, %v7647_v24  ;;  %v1663_v51 = vadd.f32 %v1599_v46, %v5938_v5 }
 0x36d   :  { %v1667_v42 = vadd.f32 %v1603_v1, %v5940_v36  ;;  %v1671_v21 = vadd.f32 %v1607_v20, %v5942_v37  ;;  %v4242_v7 = vmul.f32 -1.442695, %v1655_v55  ;;  %v1539_v62 = vpop.f32.mrf.mxu0  ;;  %v1580_v45 = vpop.f32.mrf.mxu1  ;;  %v1675_v29 = vadd.f32 %v1611_v43, %v5944_v33 }
 0x36e   :  { %v4240_v0 = vmul.f32 -1.442695, %v1647_v6  ;;  %v4241_v47 = vmul.f32 -1.442695, %v1651_v15  ;;  %v4243_v32 = vmul.f32 -1.442695, %v1659_v2 }
 0x36f   :  { %4749 = vpow2.f32 %v4242_v7  ;;  %v4244_v16 = vmul.f32 -1.442695, %v1663_v51  ;;  %v1540_v9 = vpop.f32.mrf.mxu0  ;;  %v1581_v4 = vpop.f32.mrf.mxu1  ;;  %v4245_v12 = vmul.f32 -1.442695, %v1667_v42  ;;  %v1589_v11 = vrot.slane %v1576_v19, 6  ;;  %v7648_v42 = vld [vmem:[#allocation38_spill] sm:$0xff] }
 0x370   :  { %4751 = vpow2.f32 %v4240_v0  ;;  %v1593_v46 = vrot.slane %v1576_v19, 7  ;;  %v4246_v1 = vmul.f32 -1.442695, %v1671_v21  ;;  %v4247_v20 = vmul.f32 -1.442695, %v1675_v29  ;;  %v7649_v21 = vld [vmem:[#allocation39_spill] sm:$0xff] }
 0x371   :  { %4753 = vpow2.f32 %v4241_v47  ;;  %v1597_v55 = vrot.slane %v1576_v19, 1  ;;  %v1601_v62 = vrot.slane %v1576_v19, 2  ;;  %v1649_v43 = vadd.f32 %v1589_v11, %v5959_v60 }
 0x372   :  { %4755 = vpow2.f32 %v4243_v32  ;;  %v1605_v6 = vrot.slane %v1576_v19, 3  ;;  %v1653_v15 = vadd.f32 %v1593_v46, %v5974_v57  ;;  %v1609_v9 = vrot.slane %v1576_v19, 4  ;;  %v7663_v57 = vld [vmem:[#allocation49_spill] sm:$0xff] }
 0x373   :  { %4757 = vpow2.f32 %v4244_v16  ;;  %v1657_v0 = vadd.f32 %v1576_v19, %v5979_v8  ;;  %v1613_v2 = vrot.slane %v1576_v19, 5  ;;  %v1661_v47 = vadd.f32 %v1597_v55, %v5984_v61 }
 0x374   :  { %4759 = vpow2.f32 %v4245_v12  ;;  %v1665_v32 = vadd.f32 %v1601_v62, %v5989_v59  ;;  %v1669_v51 = vadd.f32 %v1605_v6, %v5996_v34  ;;  %v1673_v11 = vadd.f32 %v1609_v9, %v7648_v42  ;;  %v7654_v34 = vld [vmem:[#allocation46_spill] sm:$0xff] }
 0x375   :  { %4761 = vpow2.f32 %v4246_v1  ;;  %v1677_v7 = vadd.f32 %v1613_v2, %v7649_v21  ;;  %v1588_v45 = vrot.slane %v6455_v31, 6  ;;  %v1592_v19 = vrot.slane %v6455_v31, 7  ;;  %v7653_v21 = vld [vmem:[#allocation44_spill] sm:$0xff] }
 0x376   :  { %4763 = vpow2.f32 %v4247_v20  ;;  %v1596_v12 = vrot.slane %v6455_v31, 1  ;;  %v1600_v20 = vrot.slane %v6455_v31, 2  ;;  %v1604_v55 = vrot.slane %v6455_v31, 3 }
 0x377   :  { %4765 = vtanh.f32 %v1649_v43  ;;  %v1608_v6 = vrot.slane %v6455_v31, 4 }
 0x378   :  { %4767 = vtanh.f32 %v1653_v15  ;;  %v7650_v15 = vld [vmem:[#allocation31_spill] sm:$0xff] }
 0x379   :  { %4769 = vtanh.f32 %v1657_v0  ;;  %v1648_v9 = vadd.f32 %v1588_v45, %v7650_v15  ;;  %v1664_v45 = vadd.f32 %v1600_v20, %v7654_v34  ;;  %v7655_v15 = vld [vmem:[#allocation48_spill] sm:$0xff] }
 0x37a   :  { %4771 = vtanh.f32 %v1661_v47  ;;  %v1612_v47 = vrot.slane %v6455_v31, 5 }
 0x37b   :  { %4773 = vtanh.f32 %v1665_v32  ;;  %v7651_v32 = vld [vmem:[#allocation40_spill] sm:$0xff]  ;;  %v4248_v61 = vmul.f32 -1.442695, %v1648_v9 }
 0x37c   :  { %v4750_v29 = vpop.eup %4749  ;;  %4775 = vtanh.f32 %v1669_v51  ;;  %v1652_v51 = vadd.f32 %v1592_v19, %v7651_v32  ;;  %v1590_v19 = vrot.slane %v6457_v13, 6 }
 0x37d   :  { %v4752_v16 = vpop.eup %4751  ;;  %v1705_v4 = vadd.f32 1.0, %v4750_v29  ;;  %4777 = vtanh.f32 %v1673_v11  ;;  %v7652_v29 = vld [vmem:[#allocation42_spill] sm:$0xff] }
 0x37e   :  { %v4754_v46 = vpop.eup %4753  ;;  %v1703_v1 = vadd.f32 1.0, %v4752_v16  ;;  %4779 = vtanh.f32 %v1677_v7  ;;  %v1656_v16 = vadd.f32 %v6455_v31, %v7652_v29  ;;  %v4249_v31 = vmul.f32 -1.442695, %v1652_v51 }
 0x37f   :  { %v4756_v62 = vpop.eup %4755  ;;  %v1704_v43 = vadd.f32 1.0, %v4754_v46  ;;  %4781 = vrcp.f32 %v1705_v4  ;;  %v1660_v46 = vadd.f32 %v1596_v12, %v7653_v21  ;;  %v1594_v12 = vrot.slane %v6457_v13, 7 }
 0x380   :  { %v4758_v0 = vpop.eup %4757  ;;  %v1706_v2 = vadd.f32 1.0, %v4756_v62  ;;  %4783 = vrcp.f32 %v1703_v1  ;;  %v1668_v62 = vadd.f32 %v1604_v55, %v7655_v15  ;;  %v1598_v15 = vrot.slane %v6457_v13, 1 }
 0x381   :  { %v4760_v11 = vpop.eup %4759  ;;  %v1707_v7 = vadd.f32 1.0, %v4758_v0  ;;  %4785 = vrcp.f32 %v1704_v43  ;;  %v1602_v51 = vrot.slane %v6457_v13, 2 }
 0x382   :  { %v4762_v4 = vpop.eup %4761  ;;  %v1708_v42 = vadd.f32 1.0, %v4760_v11  ;;  %4787 = vrcp.f32 %v1706_v2  ;;  %v7656_v2 = vld [vmem:[#allocation50_spill] sm:$0xff]  ;;  %v4250_v11 = vmul.f32 -1.442695, %v1656_v16  ;;  %v1606_v16 = vrot.slane %v6457_v13, 3 }
 0x383   :  { %v4764_v1 = vpop.eup %4763  ;;  %v1709_v59 = vadd.f32 1.0, %v4762_v4  ;;  %4789 = vrcp.f32 %v1707_v7  ;;  %v1672_v20 = vadd.f32 %v1608_v6, %v7656_v2  ;;  %v7657_v7 = vld [vmem:[#allocation52_spill] sm:$0xff]  ;;  %v4251_v4 = vmul.f32 -1.442695, %v1660_v46 }
 0x384   :  { %v6489_v0 = vpop.eup %4765  ;;  %v1710_v43 = vadd.f32 1.0, %v4764_v1  ;;  %4791 = vrcp.f32 %v1708_v42  ;;  %v1676_v9 = vadd.f32 %v1612_v47, %v7657_v7  ;;  %v4252_v42 = vmul.f32 -1.442695, %v1664_v45  ;;  %v7658_v1 = vld [vmem:[#allocation32_spill] sm:$0xff] }
 0x385   :  { %v6492_v21 = vpop.eup %4767  ;;  %4793 = vrcp.f32 %v1709_v59  ;;  %v1650_v29 = vadd.f32 %v1590_v19, %v7658_v1  ;;  %v4253_v6 = vmul.f32 -1.442695, %v1668_v62  ;;  %v4254_v46 = vmul.f32 -1.442695, %v1672_v20  ;;  %v7661_v62 = vld [vmem:[#allocation45_spill] sm:$0xff] }
 0x386   :  { %v6495_v55 = vpop.eup %4769  ;;  %4795 = vrcp.f32 %v1710_v43  ;;  %v7659_v43 = vld [vmem:[#allocation41_spill] sm:$0xff]  ;;  %v1610_v7 = vrot.slane %v6457_v13, 4  ;;  %v4255_v19 = vmul.f32 -1.442695, %v1676_v9  ;;  %v1662_v1 = vadd.f32 %v1598_v15, %v7661_v62  ;;  %v7664_v9 = vld [vmem:[#allocation51_spill] sm:$0xff] }
 0x387   :  { %v6499_v34 = vpop.eup %4771  ;;  %4797 = vpow2.f32 %v4248_v61  ;;  %v1654_v2 = vadd.f32 %v1594_v12, %v7659_v43  ;;  %v7660_v61 = vld [vmem:[#allocation43_spill] sm:$0xff]  ;;  %v1670_v60 = vadd.f32 %v1606_v16, %v7663_v57  ;;  %v7665_v15 = vld [vmem:[#allocation53_spill] sm:$0xff] }
 0x388   :  { %v6503_v59 = vpop.eup %4773  ;;  %4799 = vpow2.f32 %v4249_v31  ;;  %v1658_v45 = vadd.f32 %v6457_v13, %v7660_v61  ;;  %v1614_v31 = vrot.slane %v6457_v13, 5  ;;  %v7662_v12 = vld [vmem:[#allocation47_spill] sm:$0xff]  ;;  %v4259_v62 = vmul.f32 -1.442695, %v1662_v1 }
 0x389   :  { %v6507_v47 = vpop.eup %4775  ;;  %4801 = vpow2.f32 %v4250_v11  ;;  %v1666_v43 = vadd.f32 %v1602_v51, %v7662_v12  ;;  %v4256_v11 = vmul.f32 -1.442695, %v1650_v29  ;;  %v4257_v61 = vmul.f32 -1.442695, %v1654_v2 }
 0x38a   :  { %v6512_v32 = vpop.eup %4777  ;;  %4803 = vpow2.f32 %v4251_v4  ;;  %v1674_v4 = vadd.f32 %v1610_v7, %v7664_v9  ;;  %v4258_v13 = vmul.f32 -1.442695, %v1658_v45  ;;  %v4261_v2 = vmul.f32 -1.442695, %v1670_v60 }
 0x38b   :  { %v6516_v8 = vpop.eup %4779  ;;  %4805 = vpow2.f32 %v4252_v42  ;;  %v1678_v42 = vadd.f32 %v1614_v31, %v7665_v15  ;;  %v4260_v29 = vmul.f32 -1.442695, %v1666_v43 }
 0x38c   :  { %v6519_v20 = vpop.eup %4781  ;;  %4807 = vpow2.f32 %v4253_v6 }
 0x38d   :  { %v6522_v33 = vpop.eup %4783  ;;  %4809 = vpow2.f32 %v4254_v46  ;;  %v4262_v46 = vmul.f32 -1.442695, %v1674_v4  ;;  %v4263_v45 = vmul.f32 -1.442695, %v1678_v42 }
 0x38e   :  { %v6525_v37 = vpop.eup %4785  ;;  %4811 = vpow2.f32 %v4255_v19 }
 0x38f   :  { %v6528_v51 = vpop.eup %4787  ;;  %4813 = vpow2.f32 %v4256_v11 }
 0x390   :  { %v6530_v6 = vpop.eup %4789  ;;  %4815 = vpow2.f32 %v4257_v61 }
 0x391   :  { %v6532_v16 = vpop.eup %4791  ;;  %4817 = vpow2.f32 %v4258_v13 }
 0x392   :  { %v6534_v7 = vpop.eup %4793  ;;  %4819 = vpow2.f32 %v4259_v62 }
 0x393   :  { %v6536_v19 = vpop.eup %4795  ;;  %4821 = vpow2.f32 %v4260_v29 }
 0x394   :  { %v4798_v1 = vpop.eup %4797  ;;  %4823 = vpow2.f32 %v4261_v2 }
 0x395   :  { %v4800_v31 = vpop.eup %4799  ;;  %v1751_v11 = vadd.f32 1.0, %v4798_v1  ;;  %4825 = vpow2.f32 %v4262_v46 }
 0x396   :  { %v4802_v43 = vpop.eup %4801  ;;  %v1752_v15 = vadd.f32 1.0, %v4800_v31  ;;  %4827 = vpow2.f32 %v4263_v45 }
 0x397   :  { %v4804_v60 = vpop.eup %4803  ;;  %v1753_v61 = vadd.f32 1.0, %v4802_v43  ;;  %4829 = vrcp.f32 %v1751_v11 }
 0x398   :  { %v4806_v13 = vpop.eup %4805  ;;  %v1754_v4 = vadd.f32 1.0, %v4804_v60  ;;  %4831 = vrcp.f32 %v1752_v15 }
 0x399   :  { %v4808_v9 = vpop.eup %4807  ;;  %v1755_v62 = vadd.f32 1.0, %v4806_v13  ;;  %4833 = vrcp.f32 %v1753_v61 }
 0x39a   :  { %v4810_v42 = vpop.eup %4809  ;;  %v1756_v57 = vadd.f32 1.0, %v4808_v9  ;;  %4835 = vrcp.f32 %v1754_v4  ;;  %v1839_v4 = vrot.slane %v6339_v44, 7  ;;  %v1845_v44 = vrot.slane %v6365_v52, 7 }
 0x39b   :  { %v4812_v29 = vpop.eup %4811  ;;  %v1757_v2 = vadd.f32 1.0, %v4810_v42  ;;  %4837 = vrcp.f32 %v1755_v62  ;;  %v1840_v62 = vrot.slane %v6343_v27, 7  ;;  %v1863_v27 = vmul.f32 %v6522_v33, %v6489_v0 }
 0x39c   :  { %v4814_v1 = vpop.eup %4813  ;;  %v1758_v46 = vadd.f32 1.0, %v4812_v29  ;;  %4839 = vrcp.f32 %v1756_v57  ;;  %v1842_v29 = vrot.slane %v6352_v22, 7 }
 0x39d   :  { %v4816_v31 = vpop.eup %4815  ;;  %4841 = vrcp.f32 %v1757_v2  ;;  %v1807_v45 = vadd.f32 1.0, %v4814_v1  ;;  %v1841_v2 = vrot.slane %v6347_v56, 7  ;;  %v1846_v56 = vrot.slane %v6368_v58, 7 }
 0x39e   :  { %v4818_v43 = vpop.eup %4817  ;;  %4843 = vrcp.f32 %v1758_v46  ;;  %v1808_v11 = vadd.f32 1.0, %v4816_v31  ;;  %v1843_v31 = vrot.slane %v6357_v49, 7 }
 0x39f   :  { %v4820_v60 = vpop.eup %4819  ;;  %v1809_v15 = vadd.f32 1.0, %v4818_v43  ;;  %4845 = vrcp.f32 %v1807_v45 }
 0x3a0   :  { %v4822_v12 = vpop.eup %4821  ;;  %v1810_v13 = vadd.f32 1.0, %v4820_v60  ;;  %4847 = vrcp.f32 %v1808_v11  ;;  %v1864_v60 = vmul.f32 %v6525_v37, %v6492_v21  ;;  %v1867_v37 = vmul.f32 %v6530_v6, %v6503_v59 }
 0x3a1   :  { %v4824_v61 = vpop.eup %4823  ;;  %v1811_v36 = vadd.f32 1.0, %v4822_v12  ;;  %4849 = vrcp.f32 %v1809_v15  ;;  %v1844_v12 = vrot.slane %v6362_v23, 7  ;;  %v1865_v23 = vmul.f32 %v6519_v20, %v6495_v55 }
 0x3a2   :  { %v4826_v9 = vpop.eup %4825  ;;  %v1812_v42 = vadd.f32 1.0, %v4824_v61  ;;  %4851 = vrcp.f32 %v1810_v13 }
 0x3a3   :  { %v4828_v57 = vpop.eup %4827  ;;  %v1813_v1 = vadd.f32 1.0, %v4826_v9  ;;  %4853 = vrcp.f32 %v1811_v36  ;;  %v1866_v36 = vmul.f32 %v6528_v51, %v6499_v34 }
 0x3a4   :  { %v4830_v46 = vpop.eup %4829  ;;  %v1814_v45 = vadd.f32 1.0, %v4828_v57  ;;  %4855 = vrcp.f32 %v1812_v42  ;;  %v1869_v42 = vmul.f32 %v6534_v7, %v6512_v32  ;;  %v1870_v57 = vmul.f32 %v6536_v19, %v6516_v8 }
 0x3a5   :  { %v4832_v43 = vpop.eup %4831  ;;  %v1855_v11 = vmul.f32 %v4830_v46, %v1839_v4  ;;  %4857 = vrcp.f32 %v1813_v1  ;;  %v1868_v4 = vmul.f32 %v6532_v16, %v6507_v47 }
 0x3a6   :  { %v4834_v22 = vpop.eup %4833  ;;  %v1856_v15 = vmul.f32 %v4832_v43, %v1840_v62  ;;  %4859 = vrcp.f32 %v1814_v45 }
 0x3a7   :  { %v4836_v49 = vpop.eup %4835  ;;  %v1857_v13 = vmul.f32 %v4834_v22, %v1841_v2  ;;  %v6552_v61 = vadd.f32 %v1863_v27, %v1855_v11 }
 0x3a8   :  { %v4838_v52 = vpop.eup %4837  ;;  %v6556_v33 = vadd.f32 %v1864_v60, %v1856_v15  ;;  %v1858_v58 = vmul.f32 %v4836_v49, %v1842_v29 }
 0x3a9   :  { %v4840_v0 = vpop.eup %4839  ;;  %v1859_v21 = vmul.f32 %v4838_v52, %v1843_v31  ;;  %v6560_v9 = vadd.f32 %v1865_v23, %v1857_v13  ;;  %4861 = vtanh.f32 %v6552_v61 }
 0x3aa   :  { %v4842_v55 = vpop.eup %4841  ;;  %v1860_v20 = vmul.f32 %v4840_v0, %v1844_v12  ;;  %v6565_v62 = vadd.f32 %v1866_v36, %v1858_v58  ;;  %4863 = vtanh.f32 %v6556_v33 }
 0x3ab   :  { %v4844_v34 = vpop.eup %4843  ;;  %v1861_v51 = vmul.f32 %v4842_v55, %v1845_v44  ;;  %v6570_v59 = vadd.f32 %v1867_v37, %v1859_v21  ;;  %4865 = vtanh.f32 %v6560_v9 }
 0x3ac   :  { %v1862_v6 = vmul.f32 %v4844_v34, %v1846_v56  ;;  %v6575_v29 = vadd.f32 %v1868_v4, %v1860_v20  ;;  %4867 = vtanh.f32 %v6565_v62  ;;  %v4846_v16 = vpop.eup %4845 }
 0x3ad   :  { %v6578_v47 = vadd.f32 %v1869_v42, %v1861_v51  ;;  %4869 = vtanh.f32 %v6570_v59  ;;  %v4848_v32 = vpop.eup %4847 }
 0x3ae   :  { %v6581_v2 = vadd.f32 %v1870_v57, %v1862_v6  ;;  %4871 = vtanh.f32 %v6575_v29  ;;  %v4850_v7 = vpop.eup %4849 }
 0x3af   :  { %4873 = vtanh.f32 %v6578_v47  ;;  %v4852_v8 = vpop.eup %4851 }
 0x3b0   :  { %4875 = vtanh.f32 %v6581_v2  ;;  %v4854_v19 = vpop.eup %4853 }
 0x3b1   :  { %v4856_v1 = vpop.eup %4855 }
 0x3b2   :  { %v4858_v46 = vpop.eup %4857 }
 0x3b3   :  { %v4860_v31 = vpop.eup %4859 }
 0x3b6   :  { %v4862_v12 = vpop.eup %4861 }
 0x3b7   :  { %v4864_v45 = vpop.eup %4863  ;;  %v1887_v43 = vmul.f32 %v4862_v12, %v4846_v16 }
 0x3b8   :  { %v4866_v44 = vpop.eup %4865  ;;  %v1888_v27 = vmul.f32 %v4864_v45, %v4848_v32 }
 0x3b9   :  { %v4868_v11 = vpop.eup %4867  ;;  %v1889_v22 = vmul.f32 %v4866_v44, %v4850_v7  ;;  %v1895_v56 = vpack.c.bf16 %v1887_v43, %v1887_v43 }
 0x3ba   :  { %v4870_v60 = vpop.eup %4869  ;;  %v1890_v15 = vmul.f32 %v4868_v11, %v4852_v8  ;;  %v1896_v49 = vpack.c.bf16 %v1888_v27, %v1888_v27 }
 0x3bb   :  { %v4872_v23 = vpop.eup %4871  ;;  %v1891_v13 = vmul.f32 %v4870_v60, %v4854_v19  ;;  %v1897_v52 = vpack.c.bf16 %v1889_v22, %v1889_v22  ;;  %v1911_v36 = vunpack.c.l.b16 %v1895_v56 }
 0x3bc   :  { %v4874_v58 = vpop.eup %4873  ;;  %v1892_v0 = vmul.f32 %v4872_v23, %v4856_v1  ;;  %v1898_v37 = vpack.c.bf16 %v1890_v15, %v1890_v15  ;;  %v1912_v21 = vunpack.c.l.b16 %v1896_v49 }
 0x3bd   :  { %v4876_v55 = vpop.eup %4875  ;;  %v1893_v20 = vmul.f32 %v4874_v58, %v4858_v46  ;;  %v1899_v4 = vpack.c.bf16 %v1891_v13, %v1891_v13  ;;  %v1919_v34 = vrot.slane %v1911_v36, 2  ;;  %v1913_v32 = vunpack.c.l.b16 %v1897_v52  ;;  %v6593_v13 = vld [vmem:[#allocation7 + $0xe0] ss:$16 sps:$4 sm:$0xff]   ;;  %v6596_v52 = vld [vmem:[#allocation7 + $0xe8] ss:$16 sps:$4 sm:$0xff]  }
 0x3be   :  { %v1894_v51 = vmul.f32 %v4876_v55, %v4860_v31  ;;  %v1900_v42 = vpack.c.bf16 %v1892_v0, %v1892_v0  ;;  %v1914_v6 = vunpack.c.l.b16 %v1898_v37  ;;  %v1920_v57 = vrot.slane %v1912_v21, 1  ;;  %v6599_v36 = vld [vmem:[#allocation7 + $0xc4] ss:$16 sps:$4 sm:$0xff]   ;;  %v6602_v58 = vld [vmem:[#allocation7 + $0xcc] ss:$16 sps:$4 sm:$0xff]  }
 0x3bf   :  { %v1901_v16 = vpack.c.bf16 %v1893_v20, %v1893_v20  ;;  %v1915_v7 = vunpack.c.l.b16 %v1899_v4  ;;  %v6607_v0 = vld [vmem:[#allocation7 + $0xc0] ss:$16 sps:$4 sm:$0xff]   ;;  %v6610_v37 = vld [vmem:[#allocation7 + $0xc8] ss:$16 sps:$4 sm:$0xff]   ;;  %v6613_v21 = vld [vmem:[#allocation7 + $0xa4] ss:$16 sps:$4 sm:$0xff]  }
 0x3c0   :  { %v1902_v8 = vpack.c.bf16 %v1894_v51, %v1894_v51  ;;  %v1916_v12 = vunpack.c.l.b16 %v1900_v42  ;;  %v1921_v19 = vsel %vm1045_vm0, %v1920_v57, %v1919_v34  ;;  %v1923_v45 = vrot.slane %v1914_v6, 7  ;;  %v6616_v55 = vld [vmem:[#allocation7 + $0xac] ss:$16 sps:$4 sm:$0xff]   ;;  %v6619_v20 = vld [vmem:[#allocation7 + $0xa0] ss:$16 sps:$4 sm:$0xff]  }
 0x3c1   :  { %v1917_v43 = vunpack.c.l.b16 %v1901_v16  ;;  %v1922_v1 = vsel %vm1048_vm1, %v1913_v32, %v1921_v19  ;;  %v1925_v44 = vrot.slane %v1915_v7, 6  ;;  %v6622_v4 = vld [vmem:[#allocation7 + $0xa8] ss:$16 sps:$4 sm:$0xff]   ;;  %v7670_v42 = vld [vmem:[#allocation24_spill] sm:$0xff] }
 0x3c2   :  { %v1918_v27 = vunpack.c.l.b16 %v1902_v8  ;;  %v1924_v46 = vsel %vm1051_vm2, %v1923_v45, %v1922_v1  ;;  %v1927_v11 = vrot.slane %v1916_v12, 5  ;;  %v7669_v34 = vld [vmem:[#allocation23_spill] sm:$0xff]  ;;  %v7672_v7 = vld [vmem:[#allocation28_spill] sm:$0xff] }
 0x3c3   :  { %v1926_v31 = vsel %vm1054_vm3, %v1925_v44, %v1924_v46  ;;  %v1929_v22 = vrot.slane %v1917_v43, 4  ;;  %v7671_v16 = vld [vmem:[#allocation27_spill] sm:$0xff]  ;;  %v7673_v43 = vld [vmem:[#allocation29_spill] sm:$0xff] }
 0x3c4   :  { %v1928_v56 = vsel %vm1057_vm4, %v1927_v11, %v1926_v31  ;;  %v1931_v60 = vrot.slane %v1918_v27, 3 }
 0x3c5   :  { %v1930_v15 = vsel %vm1060_vm5, %v1929_v22, %v1928_v56 }
 0x3c6   :  { %v1932_v49 = vsel %vm1063_vm6, %v1931_v60, %v1930_v15 }
 0x3c7   :  { %v1933_v23 = vpack.c.b16 %v1932_v49, %v1932_v49 }
 0x3c9   :  { %1968 = vmatmul.mubr.bf16.vlgmr.msra.gmra.mxu0 %v1933_v23  ;;  %2009 = vmatmul.mubr.bf16.vlgmr.msra.gmra.mxu1 %v1933_v23 }
 0x3ca   :  { %2370 = vmatpush1.bf16.msra.mxu0 %v6593_v13  ;;  %2411 = vmatpush1.bf16.msra.mxu1 %v6596_v52 }
 0x3cb   :  { %2371 = vmatprep.subr.bf16.mxu0 %v6599_v36  ;;  %2412 = vmatprep.subr.bf16.mxu1 %v6602_v58 }
 0x3cc   :  { %2401 = vmatprep.mubr.bf16.mxu0 %v7613_v25  ;;  %2442 = vmatprep.mubr.bf16.mxu1 %v7613_v25 }
 0x3ce   :  { %2372 = vmatpush1.bf16.msra.mxu0 %v6607_v0  ;;  %2413 = vmatpush1.bf16.msra.mxu1 %v6610_v37 }
 0x3cf   :  { %2373 = vmatprep.subr.bf16.mxu0 %v6613_v21  ;;  %2414 = vmatprep.subr.bf16.mxu1 %v6616_v55 }
 0x3d2   :  { %2374 = vmatpush1.bf16.msra.mxu0 %v6619_v20  ;;  %2415 = vmatpush1.bf16.msra.mxu1 %v6622_v4 }
 0x3d3   :  { %2375 = vmatprep.subr.bf16.mxu0 %v6392_v63  ;;  %2416 = vmatprep.subr.bf16.mxu1 %v6395_v17  ;;  %v7666_v63 = vld [vmem:[#allocation12_spill] sm:$0xff]  ;;  %v7667_v17 = vld [vmem:[#allocation13_spill] sm:$0xff] }
 0x3d6   :  { %2376 = vmatpush1.bf16.msra.mxu0 %v6398_v53  ;;  %2417 = vmatpush1.bf16.msra.mxu1 %v6401_v35  ;;  %v6645_v53 = vld [vmem:[#allocation7 + $0xe4] ss:$16 sps:$4 sm:$0xff]   ;;  %v6648_v35 = vld [vmem:[#allocation7 + $0xec] ss:$16 sps:$4 sm:$0xff]  }
 0x3d7   :  { %2377 = vmatprep.subr.bf16.mxu0 %v6404_v30  ;;  %2418 = vmatprep.subr.bf16.mxu1 %v6407_v40 }
 0x3da   :  { %2378 = vmatpush1.bf16.msra.mxu0 %v6410_v28  ;;  %2419 = vmatpush1.bf16.msra.mxu1 %v6413_v39 }
 0x3db   :  { %2379 = vmatprep.subr.bf16.mxu0 %v6416_v26  ;;  %2420 = vmatprep.subr.bf16.mxu1 %v6419_v3 }
 0x3de   :  { %2380 = vmatpush1.bf16.msra.mxu0 %v6422_v41  ;;  %2421 = vmatpush1.bf16.msra.mxu1 %v6425_v18 }
 0x3df   :  { %2381 = vmatprep.subr.bf16.mxu0 %v6428_v54  ;;  %2422 = vmatprep.subr.bf16.mxu1 %v6431_v10 }
 0x3e2   :  { %2382 = vmatpush1.bf16.msra.mxu0 %v6434_v14  ;;  %2423 = vmatpush1.bf16.msra.mxu1 %v6437_v38 }
 0x3e3   :  { %2383 = vmatprep.subr.bf16.mxu0 %v6440_v48  ;;  %2424 = vmatprep.subr.bf16.mxu1 %v6443_v50  ;;  %v7668_v48 = vld [vmem:[#allocation22_spill] sm:$0xff] }
 0x3e6   :  { %2384 = vmatpush1.bf16.msra.mxu0 %v7666_v63  ;;  %2425 = vmatpush1.bf16.msra.mxu1 %v7667_v17 }
 0x3e7   :  { %2803 = vmatprep.subr.bf16.mxu0 %v6645_v53  ;;  %2844 = vmatprep.subr.bf16.mxu1 %v6648_v35 }
 0x489   :  { %v1969_v30 = vpop.f32.mrf.mxu0  ;;  %v2010_v40 = vpop.f32.mrf.mxu1 }
 0x48a   :  { %v2021_v28 = vrot.slane %v1969_v30, 5  ;;  %v2025_v39 = vrot.slane %v1969_v30, 6  ;;  %v2029_v26 = vrot.slane %v1969_v30, 7  ;;  %v2033_v3 = vrot.slane %v1969_v30, 1 }
 0x48b   :  { %v2037_v41 = vrot.slane %v1969_v30, 2  ;;  %v2041_v18 = vrot.slane %v1969_v30, 3  ;;  %v2045_v54 = vrot.slane %v1969_v30, 4  ;;  %v2093_v10 = vadd.f32 %v1969_v30, %v7647_v24  ;;  %v6652_v14 = vpop.f32.mrf.mxu0  ;;  %v6654_v38 = vpop.f32.mrf.mxu1  ;;  %v7674_v30 = vld [vmem:[#allocation30_spill] sm:$0xff] }
 0x48c   :  { %v2081_v50 = vadd.f32 %v2021_v28, %v7668_v48  ;;  %v2085_v51 = vadd.f32 %v2025_v39, %v7669_v34  ;;  %v2089_v6 = vadd.f32 %v2029_v26, %v7670_v42  ;;  %v2097_v57 = vadd.f32 %v2033_v3, %v5938_v5  ;;  %v7675_v26 = vld [vmem:[#allocation33_spill] sm:$0xff] }
 0x48d   :  { %v2101_v32 = vadd.f32 %v2037_v41, %v7671_v16  ;;  %v2105_v8 = vadd.f32 %v2041_v18, %v7672_v7  ;;  %v4267_v12 = vmul.f32 -1.442695, %v2093_v10  ;;  %v1973_v19 = vpop.f32.mrf.mxu0  ;;  %v2014_v45 = vpop.f32.mrf.mxu1  ;;  %v2109_v1 = vadd.f32 %v2045_v54, %v7673_v43  ;;  %v7676_v18 = vld [vmem:[#allocation34_spill] sm:$0xff] }
 0x48e   :  { %v4264_v44 = vmul.f32 -1.442695, %v2081_v50  ;;  %v4265_v27 = vmul.f32 -1.442695, %v2085_v51  ;;  %v4266_v46 = vmul.f32 -1.442695, %v2089_v6 }
 0x48f   :  { %4877 = vpow2.f32 %v4267_v12  ;;  %v4268_v11 = vmul.f32 -1.442695, %v2097_v57  ;;  %v1974_v31 = vpop.f32.mrf.mxu0  ;;  %v2015_v22 = vpop.f32.mrf.mxu1  ;;  %v4269_v56 = vmul.f32 -1.442695, %v2101_v32  ;;  %v2023_v60 = vrot.slane %v2010_v40, 5  ;;  %v7677_v50 = vld [vmem:[#allocation35_spill] sm:$0xff] }
 0x490   :  { %4879 = vpow2.f32 %v4264_v44  ;;  %v2027_v15 = vrot.slane %v2010_v40, 6  ;;  %v4270_v49 = vmul.f32 -1.442695, %v2105_v8  ;;  %v2031_v23 = vrot.slane %v2010_v40, 7  ;;  %v7678_v6 = vld [vmem:[#allocation36_spill] sm:$0xff]  ;;  %v7679_v32 = vld [vmem:[#allocation37_spill] sm:$0xff] }
 0x491   :  { %4881 = vpow2.f32 %v4265_v27  ;;  %v4271_v63 = vmul.f32 -1.442695, %v2109_v1  ;;  %v2035_v17 = vrot.slane %v2010_v40, 1  ;;  %v2083_v28 = vadd.f32 %v2023_v60, %v7674_v30  ;;  %v7680_v12 = vld [vmem:[#allocation38_spill] sm:$0xff]  ;;  %v7681_v45 = vld [vmem:[#allocation39_spill] sm:$0xff] }
 0x492   :  { %4883 = vpow2.f32 %v4266_v46  ;;  %v2039_v39 = vrot.slane %v2010_v40, 2  ;;  %v2087_v3 = vadd.f32 %v2027_v15, %v7675_v26  ;;  %v2043_v41 = vrot.slane %v2010_v40, 3 }
 0x493   :  { %4885 = vpow2.f32 %v4268_v11  ;;  %v2091_v54 = vadd.f32 %v2031_v23, %v7676_v18  ;;  %v2047_v10 = vrot.slane %v2010_v40, 4  ;;  %v2095_v51 = vadd.f32 %v2010_v40, %v7677_v50 }
 0x494   :  { %4887 = vpow2.f32 %v4269_v56  ;;  %v2099_v57 = vadd.f32 %v2035_v17, %v7678_v6  ;;  %v2103_v8 = vadd.f32 %v2039_v39, %v7679_v32  ;;  %v2107_v19 = vadd.f32 %v2043_v41, %v7680_v12  ;;  %v7682_v17 = vld [vmem:[#allocation31_spill] sm:$0xff]  ;;  %v7695_v6 = vld [vmem:[#allocation49_spill] sm:$0xff] }
 0x495   :  { %4889 = vpow2.f32 %v4270_v49  ;;  %v2111_v1 = vadd.f32 %v2047_v10, %v7681_v45  ;;  %v2022_v44 = vrot.slane %v6652_v14, 5  ;;  %v2026_v46 = vrot.slane %v6652_v14, 6 }
 0x496   :  { %4891 = vpow2.f32 %v4271_v63  ;;  %v2030_v31 = vrot.slane %v6652_v14, 7  ;;  %v2034_v60 = vrot.slane %v6652_v14, 1  ;;  %v2038_v15 = vrot.slane %v6652_v14, 2 }
 0x497   :  { %4893 = vtanh.f32 %v2083_v28  ;;  %v2042_v63 = vrot.slane %v6652_v14, 3  ;;  %v2082_v28 = vadd.f32 %v2022_v44, %v7682_v17  ;;  %v2046_v41 = vrot.slane %v6652_v14, 4  ;;  %v7687_v17 = vld [vmem:[#allocation48_spill] sm:$0xff] }
 0x498   :  { %4895 = vtanh.f32 %v2087_v3 }
 0x499   :  { %4897 = vtanh.f32 %v2091_v54  ;;  %v7683_v54 = vld [vmem:[#allocation40_spill] sm:$0xff]  ;;  %v4272_v12 = vmul.f32 -1.442695, %v2082_v28 }
 0x49a   :  { %4899 = vtanh.f32 %v2095_v51  ;;  %v2086_v10 = vadd.f32 %v2026_v46, %v7683_v54  ;;  %v2024_v46 = vrot.slane %v6654_v38, 5  ;;  %v7689_v28 = vld [vmem:[#allocation52_spill] sm:$0xff] }
 0x49b   :  { %4901 = vtanh.f32 %v2099_v57 }
 0x49c   :  { %v4878_v27 = vpop.eup %4877  ;;  %4903 = vtanh.f32 %v2103_v8  ;;  %v7684_v8 = vld [vmem:[#allocation42_spill] sm:$0xff] }
 0x49d   :  { %v4880_v40 = vpop.eup %4879  ;;  %v2140_v11 = vadd.f32 1.0, %v4878_v27  ;;  %4905 = vtanh.f32 %v2107_v19  ;;  %v2090_v19 = vadd.f32 %v2030_v31, %v7684_v8  ;;  %v4273_v31 = vmul.f32 -1.442695, %v2086_v10 }
 0x49e   :  { %v4882_v22 = vpop.eup %4881  ;;  %v2137_v56 = vadd.f32 1.0, %v4880_v40  ;;  %4907 = vtanh.f32 %v2111_v1  ;;  %v7685_v1 = vld [vmem:[#allocation44_spill] sm:$0xff] }
 0x49f   :  { %v4884_v49 = vpop.eup %4883  ;;  %v2138_v23 = vadd.f32 1.0, %v4882_v22  ;;  %4909 = vrcp.f32 %v2140_v11  ;;  %v2094_v27 = vadd.f32 %v6652_v14, %v7685_v1  ;;  %v7686_v22 = vld [vmem:[#allocation46_spill] sm:$0xff]  ;;  %v2028_v14 = vrot.slane %v6654_v38, 6 }
 0x4a0   :  { %v4886_v39 = vpop.eup %4885  ;;  %v2139_v3 = vadd.f32 1.0, %v4884_v49  ;;  %4911 = vrcp.f32 %v2137_v56  ;;  %v2098_v44 = vadd.f32 %v2034_v60, %v7686_v22  ;;  %v2102_v49 = vadd.f32 %v2038_v15, %v7687_v17 }
 0x4a1   :  { %v4888_v51 = vpop.eup %4887  ;;  %v2141_v57 = vadd.f32 1.0, %v4886_v39  ;;  %4913 = vrcp.f32 %v2138_v23  ;;  %v2032_v15 = vrot.slane %v6654_v38, 7  ;;  %v4275_v17 = vmul.f32 -1.442695, %v2094_v27 }
 0x4a2   :  { %v4890_v40 = vpop.eup %4889  ;;  %v2142_v11 = vadd.f32 1.0, %v4888_v51  ;;  %4915 = vrcp.f32 %v2139_v3  ;;  %v7688_v3 = vld [vmem:[#allocation50_spill] sm:$0xff]  ;;  %v4274_v51 = vmul.f32 -1.442695, %v2090_v19  ;;  %v4276_v10 = vmul.f32 -1.442695, %v2098_v44 }
 0x4a3   :  { %v4892_v56 = vpop.eup %4891  ;;  %v2143_v45 = vadd.f32 1.0, %v4890_v40  ;;  %4917 = vrcp.f32 %v2141_v57  ;;  %v2106_v60 = vadd.f32 %v2042_v63, %v7688_v3  ;;  %v2110_v57 = vadd.f32 %v2046_v41, %v7689_v28  ;;  %v7691_v3 = vld [vmem:[#allocation41_spill] sm:$0xff] }
 0x4a4   :  { %v6686_v39 = vpop.eup %4893  ;;  %v2144_v23 = vadd.f32 1.0, %v4892_v56  ;;  %4919 = vrcp.f32 %v2142_v11  ;;  %v2036_v11 = vrot.slane %v6654_v38, 1  ;;  %v7690_v56 = vld [vmem:[#allocation32_spill] sm:$0xff]  ;;  %v4277_v63 = vmul.f32 -1.442695, %v2102_v49 }
 0x4a5   :  { %v6689_v1 = vpop.eup %4895  ;;  %4921 = vrcp.f32 %v2143_v45  ;;  %v2084_v8 = vadd.f32 %v2024_v46, %v7690_v56  ;;  %v2040_v19 = vrot.slane %v6654_v38, 2  ;;  %v2088_v54 = vadd.f32 %v2028_v14, %v7691_v3  ;;  %v7694_v14 = vld [vmem:[#allocation47_spill] sm:$0xff] }
 0x4a6   :  { %v6693_v40 = vpop.eup %4897  ;;  %4923 = vrcp.f32 %v2144_v23  ;;  %v4278_v41 = vmul.f32 -1.442695, %v2106_v60  ;;  %v2044_v27 = vrot.slane %v6654_v38, 3  ;;  %v4279_v46 = vmul.f32 -1.442695, %v2110_v57 }
 0x4a7   :  { %v6696_v22 = vpop.eup %4899  ;;  %4925 = vpow2.f32 %v4272_v12  ;;  %v7692_v12 = vld [vmem:[#allocation43_spill] sm:$0xff]  ;;  %v2048_v56 = vrot.slane %v6654_v38, 4  ;;  %v2100_v3 = vadd.f32 %v2036_v11, %v7694_v14 }
 0x4a8   :  { %v6700_v45 = vpop.eup %4901  ;;  %4927 = vpow2.f32 %v4273_v31  ;;  %v2092_v44 = vadd.f32 %v2032_v15, %v7692_v12  ;;  %v7693_v31 = vld [vmem:[#allocation45_spill] sm:$0xff]  ;;  %v2104_v15 = vadd.f32 %v2040_v19, %v7695_v6  ;;  %v4281_v12 = vmul.f32 -1.442695, %v2088_v54 }
 0x4a9   :  { %v6704_v23 = vpop.eup %4903  ;;  %4929 = vpow2.f32 %v4274_v51  ;;  %v2096_v49 = vadd.f32 %v6654_v38, %v7693_v31  ;;  %v4280_v51 = vmul.f32 -1.442695, %v2084_v8  ;;  %v7697_v38 = vld [vmem:[#allocation53_spill] sm:$0xff]  ;;  %v4284_v8 = vmul.f32 -1.442695, %v2100_v3 }
 0x4aa   :  { %v6708_v28 = vpop.eup %4905  ;;  %4931 = vpow2.f32 %v4275_v17  ;;  %v7696_v17 = vld [vmem:[#allocation51_spill] sm:$0xff]  ;;  %v4282_v18 = vmul.f32 -1.442695, %v2092_v44  ;;  %v4285_v54 = vmul.f32 -1.442695, %v2104_v15 }
 0x4ab   :  { %v6713_v32 = vpop.eup %4907  ;;  %4933 = vpow2.f32 %v4276_v10  ;;  %v2108_v57 = vadd.f32 %v2044_v27, %v7696_v17  ;;  %v2112_v10 = vadd.f32 %v2048_v56, %v7697_v38  ;;  %v4283_v31 = vmul.f32 -1.442695, %v2096_v49 }
 0x4ac   :  { %v6716_v60 = vpop.eup %4909  ;;  %4935 = vpow2.f32 %v4277_v63 }
 0x4ad   :  { %v6719_v50 = vpop.eup %4911  ;;  %4937 = vpow2.f32 %v4278_v41  ;;  %v4286_v41 = vmul.f32 -1.442695, %v2108_v57  ;;  %v4287_v44 = vmul.f32 -1.442695, %v2112_v10 }
 0x4ae   :  { %v6722_v26 = vpop.eup %4913  ;;  %4939 = vpow2.f32 %v4279_v46 }
 0x4af   :  { %v6725_v11 = vpop.eup %4915  ;;  %4941 = vpow2.f32 %v4280_v51 }
 0x4b0   :  { %v6727_v63 = vpop.eup %4917  ;;  %4943 = vpow2.f32 %v4281_v12 }
 0x4b1   :  { %v6729_v19 = vpop.eup %4919  ;;  %4945 = vpow2.f32 %v4282_v18 }
 0x4b2   :  { %v6731_v27 = vpop.eup %4921  ;;  %4947 = vpow2.f32 %v4283_v31 }
 0x4b3   :  { %v6733_v46 = vpop.eup %4923  ;;  %4949 = vpow2.f32 %v4284_v8 }
 0x4b4   :  { %v4926_v56 = vpop.eup %4925  ;;  %4951 = vpow2.f32 %v4285_v54 }
 0x4b5   :  { %v4928_v49 = vpop.eup %4927  ;;  %v2185_v51 = vadd.f32 1.0, %v4926_v56  ;;  %4953 = vpow2.f32 %v4286_v41 }
 0x4b6   :  { %v4930_v3 = vpop.eup %4929  ;;  %v2186_v38 = vadd.f32 1.0, %v4928_v49  ;;  %4955 = vpow2.f32 %v4287_v44 }
 0x4b7   :  { %v4932_v12 = vpop.eup %4931  ;;  %v2187_v15 = vadd.f32 1.0, %v4930_v3  ;;  %4957 = vrcp.f32 %v2185_v51 }
 0x4b8   :  { %v4934_v18 = vpop.eup %4933  ;;  %v2188_v57 = vadd.f32 1.0, %v4932_v12  ;;  %4959 = vrcp.f32 %v2186_v38 }
 0x4b9   :  { %v4936_v17 = vpop.eup %4935  ;;  %v2189_v31 = vadd.f32 1.0, %v4934_v18  ;;  %4961 = vrcp.f32 %v2187_v15 }
 0x4ba   :  { %v4938_v10 = vpop.eup %4937  ;;  %v2190_v6 = vadd.f32 1.0, %v4936_v17  ;;  %4963 = vrcp.f32 %v2188_v57  ;;  %v2273_v57 = vrot.slane %v6552_v61, 7  ;;  %v2279_v61 = vrot.slane %v6578_v47, 7 }
 0x4bb   :  { %v4940_v8 = vpop.eup %4939  ;;  %v2191_v54 = vadd.f32 1.0, %v4938_v10  ;;  %4965 = vrcp.f32 %v2189_v31  ;;  %v2274_v31 = vrot.slane %v6556_v33, 7  ;;  %v2297_v33 = vmul.f32 %v6719_v50, %v6686_v39 }
 0x4bc   :  { %v4942_v56 = vpop.eup %4941  ;;  %v2192_v41 = vadd.f32 1.0, %v4940_v8  ;;  %4967 = vrcp.f32 %v2190_v6  ;;  %v2275_v8 = vrot.slane %v6560_v9, 7 }
 0x4bd   :  { %v4944_v49 = vpop.eup %4943  ;;  %4969 = vrcp.f32 %v2191_v54  ;;  %v2241_v44 = vadd.f32 1.0, %v4942_v56  ;;  %v2276_v54 = vrot.slane %v6565_v62, 7  ;;  %v2280_v62 = vrot.slane %v6581_v2, 7 }
 0x4be   :  { %v4946_v3 = vpop.eup %4945  ;;  %4971 = vrcp.f32 %v2192_v41  ;;  %v2242_v51 = vadd.f32 1.0, %v4944_v49  ;;  %v2277_v49 = vrot.slane %v6570_v59, 7 }
 0x4bf   :  { %v4948_v12 = vpop.eup %4947  ;;  %v2243_v38 = vadd.f32 1.0, %v4946_v3  ;;  %4973 = vrcp.f32 %v2241_v44 }
 0x4c0   :  { %v4950_v14 = vpop.eup %4949  ;;  %v2244_v18 = vadd.f32 1.0, %v4948_v12  ;;  %4975 = vrcp.f32 %v2242_v51  ;;  %v2298_v12 = vmul.f32 %v6722_v26, %v6689_v1  ;;  %v2301_v26 = vmul.f32 %v6727_v63, %v6700_v45 }
 0x4c1   :  { %v4952_v15 = vpop.eup %4951  ;;  %v2245_v30 = vadd.f32 1.0, %v4950_v14  ;;  %4977 = vrcp.f32 %v2243_v38  ;;  %v2278_v14 = vrot.slane %v6575_v29, 7  ;;  %v2299_v29 = vmul.f32 %v6725_v11, %v6693_v40 }
 0x4c2   :  { %v4954_v17 = vpop.eup %4953  ;;  %v2246_v10 = vadd.f32 1.0, %v4952_v15  ;;  %4979 = vrcp.f32 %v2244_v18 }
 0x4c3   :  { %v4956_v6 = vpop.eup %4955  ;;  %v2247_v56 = vadd.f32 1.0, %v4954_v17  ;;  %4981 = vrcp.f32 %v2245_v30  ;;  %v2300_v30 = vmul.f32 %v6716_v60, %v6696_v22 }
 0x4c4   :  { %v4958_v41 = vpop.eup %4957  ;;  %v2248_v44 = vadd.f32 1.0, %v4956_v6  ;;  %4983 = vrcp.f32 %v2246_v10  ;;  %v2303_v10 = vmul.f32 %v6731_v27, %v6708_v28  ;;  %v2304_v6 = vmul.f32 %v6733_v46, %v6713_v32 }
 0x4c5   :  { %v4960_v3 = vpop.eup %4959  ;;  %v2289_v51 = vmul.f32 %v4958_v41, %v2273_v57  ;;  %4985 = vrcp.f32 %v2247_v56  ;;  %v2302_v57 = vmul.f32 %v6729_v19, %v6704_v23 }
 0x4c6   :  { %v4962_v9 = vpop.eup %4961  ;;  %v2290_v38 = vmul.f32 %v4960_v3, %v2274_v31  ;;  %4987 = vrcp.f32 %v2248_v44 }
 0x4c7   :  { %v4964_v59 = vpop.eup %4963  ;;  %v2291_v18 = vmul.f32 %v4962_v9, %v2275_v8  ;;  %v6749_v15 = vadd.f32 %v2297_v33, %v2289_v51 }
 0x4c8   :  { %v4966_v47 = vpop.eup %4965  ;;  %v2292_v50 = vmul.f32 %v4964_v59, %v2276_v54  ;;  %v6753_v39 = vadd.f32 %v2298_v12, %v2290_v38 }
 0x4c9   :  { %v4968_v2 = vpop.eup %4967  ;;  %v2293_v1 = vmul.f32 %v4966_v47, %v2277_v49  ;;  %v6757_v17 = vadd.f32 %v2299_v29, %v2291_v18  ;;  %4989 = vtanh.f32 %v6749_v15 }
 0x4ca   :  { %v4970_v40 = vpop.eup %4969  ;;  %v2294_v11 = vmul.f32 %v4968_v2, %v2278_v14  ;;  %v6762_v31 = vadd.f32 %v2300_v30, %v2292_v50  ;;  %4991 = vtanh.f32 %v6753_v39 }
 0x4cb   :  { %v4972_v22 = vpop.eup %4971  ;;  %v2295_v60 = vmul.f32 %v4970_v40, %v2279_v61  ;;  %v6767_v45 = vadd.f32 %v2301_v26, %v2293_v1  ;;  %4993 = vtanh.f32 %v6757_v17 }
 0x4cc   :  { %v2296_v63 = vmul.f32 %v4972_v22, %v2280_v62  ;;  %v6772_v8 = vadd.f32 %v2302_v57, %v2294_v11  ;;  %4995 = vtanh.f32 %v6762_v31  ;;  %v4974_v19 = vpop.eup %4973 }
 0x4cd   :  { %v6775_v23 = vadd.f32 %v2303_v10, %v2295_v60  ;;  %4997 = vtanh.f32 %v6767_v45  ;;  %v4976_v28 = vpop.eup %4975 }
 0x4ce   :  { %v6778_v54 = vadd.f32 %v2304_v6, %v2296_v63  ;;  %4999 = vtanh.f32 %v6772_v8  ;;  %v4978_v27 = vpop.eup %4977 }
 0x4cf   :  { %5001 = vtanh.f32 %v6775_v23  ;;  %v4980_v32 = vpop.eup %4979 }
 0x4d0   :  { %5003 = vtanh.f32 %v6778_v54  ;;  %v4982_v46 = vpop.eup %4981 }
 0x4d1   :  { %v4984_v56 = vpop.eup %4983 }
 0x4d2   :  { %v4986_v41 = vpop.eup %4985 }
 0x4d3   :  { %v4988_v49 = vpop.eup %4987 }
 0x4d6   :  { %v4990_v14 = vpop.eup %4989 }
 0x4d7   :  { %v4992_v44 = vpop.eup %4991  ;;  %v2321_v3 = vmul.f32 %v4990_v14, %v4974_v19 }
 0x4d8   :  { %v4994_v61 = vpop.eup %4993  ;;  %v2322_v33 = vmul.f32 %v4992_v44, %v4976_v28 }
 0x4d9   :  { %v4996_v51 = vpop.eup %4995  ;;  %v2323_v9 = vmul.f32 %v4994_v61, %v4978_v27  ;;  %v2329_v62 = vpack.c.bf16 %v2321_v3, %v2321_v3 }
 0x4da   :  { %v4998_v12 = vpop.eup %4997  ;;  %v2324_v38 = vmul.f32 %v4996_v51, %v4980_v32  ;;  %v2330_v59 = vpack.c.bf16 %v2322_v33, %v2322_v33 }
 0x4db   :  { %v5000_v29 = vpop.eup %4999  ;;  %v2325_v18 = vmul.f32 %v4998_v12, %v4982_v46  ;;  %v2331_v47 = vpack.c.bf16 %v2323_v9, %v2323_v9  ;;  %v2345_v30 = vunpack.c.l.b16 %v2329_v62 }
 0x4dc   :  { %v5002_v50 = vpop.eup %5001  ;;  %v2326_v2 = vmul.f32 %v5000_v29, %v4984_v56  ;;  %v2332_v26 = vpack.c.bf16 %v2324_v38, %v2324_v38  ;;  %v2346_v1 = vunpack.c.l.b16 %v2330_v59 }
 0x4dd   :  { %v5004_v40 = vpop.eup %5003  ;;  %v2327_v11 = vmul.f32 %v5002_v50, %v4986_v41  ;;  %v2333_v57 = vpack.c.bf16 %v2325_v18, %v2325_v18  ;;  %v2347_v22 = vunpack.c.l.b16 %v2331_v47  ;;  %v2353_v60 = vrot.slane %v2345_v30, 3  ;;  %v6832_v18 = vld [vmem:[#allocation7 + $0x40] ss:$16 sps:$4 sm:$0xff]   ;;  %v6835_v47 = vld [vmem:[#allocation7 + $0x48] ss:$16 sps:$4 sm:$0xff]  }
 0x4de   :  { %v2328_v10 = vmul.f32 %v5004_v40, %v4988_v49  ;;  %v2334_v63 = vpack.c.bf16 %v2326_v2, %v2326_v2  ;;  %v2354_v6 = vrot.slane %v2346_v1, 2  ;;  %v2348_v14 = vunpack.c.l.b16 %v2332_v26  ;;  %v6838_v30 = vld [vmem:[#allocation7 + $0x24] ss:$16 sps:$4 sm:$0xff]   ;;  %v6841_v50 = vld [vmem:[#allocation7 + $0x2c] ss:$16 sps:$4 sm:$0xff]  }
 0x4df   :  { %v2335_v19 = vpack.c.bf16 %v2327_v11, %v2327_v11  ;;  %v2349_v28 = vunpack.c.l.b16 %v2333_v57  ;;  %v2356_v27 = vrot.slane %v2347_v22, 1  ;;  %v6844_v2 = vld [vmem:[#allocation7 + $0x20] ss:$16 sps:$4 sm:$0xff]   ;;  %v6847_v26 = vld [vmem:[#allocation7 + $0x28] ss:$16 sps:$4 sm:$0xff]  }
 0x4e0   :  { %v2336_v32 = vpack.c.bf16 %v2328_v10, %v2328_v10  ;;  %v2350_v46 = vunpack.c.l.b16 %v2334_v63  ;;  %v2355_v44 = vsel %vm1045_vm0, %v2354_v6, %v2353_v60  ;;  %v6850_v1 = vld [vmem:[#allocation7 + $0x4] ss:$16 sps:$4 sm:$0xff]   ;;  %v6853_v40 = vld [vmem:[#allocation7 + $0xc] ss:$16 sps:$4 sm:$0xff]   ;;  %v6856_v11 = vld [vmem:[#allocation7] ss:$16 sps:$4 sm:$0xff]  }
 0x4e1   :  { %v2351_v3 = vunpack.c.l.b16 %v2335_v19  ;;  %v2357_v56 = vsel %vm1048_vm1, %v2356_v27, %v2355_v44  ;;  %v2359_v61 = vrot.slane %v2349_v28, 7  ;;  %v6859_v57 = vld [vmem:[#allocation7 + $0x8] ss:$16 sps:$4 sm:$0xff]  }
 0x4e2   :  { %v2352_v33 = vunpack.c.l.b16 %v2336_v32  ;;  %v2358_v41 = vsel %vm1051_vm2, %v2348_v14, %v2357_v56  ;;  %v2361_v51 = vrot.slane %v2350_v46, 6 }
 0x4e3   :  { %v2360_v49 = vsel %vm1054_vm3, %v2359_v61, %v2358_v41  ;;  %v2363_v9 = vrot.slane %v2351_v3, 5 }
 0x4e4   :  { %v2362_v62 = vsel %vm1057_vm4, %v2361_v51, %v2360_v49  ;;  %v2365_v12 = vrot.slane %v2352_v33, 4 }
 0x4e5   :  { %v2364_v38 = vsel %vm1060_vm5, %v2363_v9, %v2362_v62 }
 0x4e6   :  { %v2366_v59 = vsel %vm1063_vm6, %v2365_v12, %v2364_v38 }
 0x4e7   :  { %v2367_v29 = vpack.c.b16 %v2366_v59, %v2366_v59 }
 0x4e9   :  { %2402 = vmatmul.mubr.bf16.vlgmr.msra.gmra.mxu0 %v2367_v29  ;;  %2443 = vmatmul.mubr.bf16.vlgmr.msra.gmra.mxu1 %v2367_v29 }
 0x4ea   :  { %2804 = vmatpush1.bf16.msra.mxu0 %v6593_v13  ;;  %2845 = vmatpush1.bf16.msra.mxu1 %v6596_v52  ;;  %v6802_v13 = vld [vmem:[#allocation7 + $0x84] ss:$16 sps:$4 sm:$0xff]   ;;  %v6805_v52 = vld [vmem:[#allocation7 + $0x8c] ss:$16 sps:$4 sm:$0xff]  }
 0x4eb   :  { %2805 = vmatprep.subr.bf16.mxu0 %v6599_v36  ;;  %2846 = vmatprep.subr.bf16.mxu1 %v6602_v58  ;;  %v6808_v36 = vld [vmem:[#allocation7 + $0x80] ss:$16 sps:$4 sm:$0xff]   ;;  %v6811_v58 = vld [vmem:[#allocation7 + $0x88] ss:$16 sps:$4 sm:$0xff]  }
 0x4ec   :  { %2835 = vmatprep.mubr.bf16.mxu0 %v7613_v25  ;;  %2876 = vmatprep.mubr.bf16.mxu1 %v7613_v25 }
 0x4ee   :  { %2806 = vmatpush1.bf16.msra.mxu0 %v6607_v0  ;;  %2847 = vmatpush1.bf16.msra.mxu1 %v6610_v37  ;;  %v6814_v0 = vld [vmem:[#allocation7 + $0x64] ss:$16 sps:$4 sm:$0xff]   ;;  %v6817_v37 = vld [vmem:[#allocation7 + $0x6c] ss:$16 sps:$4 sm:$0xff]  }
 0x4ef   :  { %2807 = vmatprep.subr.bf16.mxu0 %v6613_v21  ;;  %2848 = vmatprep.subr.bf16.mxu1 %v6616_v55  ;;  %v6820_v21 = vld [vmem:[#allocation7 + $0x60] ss:$16 sps:$4 sm:$0xff]   ;;  %v6823_v55 = vld [vmem:[#allocation7 + $0x68] ss:$16 sps:$4 sm:$0xff]  }
 0x4f2   :  { %2808 = vmatpush1.bf16.msra.mxu0 %v6619_v20  ;;  %2849 = vmatpush1.bf16.msra.mxu1 %v6622_v4  ;;  %v6826_v20 = vld [vmem:[#allocation7 + $0x44] ss:$16 sps:$4 sm:$0xff]   ;;  %v6829_v4 = vld [vmem:[#allocation7 + $0x4c] ss:$16 sps:$4 sm:$0xff]  }
 0x4f3   :  { %2809 = vmatprep.subr.bf16.mxu0 %v6802_v13  ;;  %2850 = vmatprep.subr.bf16.mxu1 %v6805_v52 }
 0x4f6   :  { %2810 = vmatpush1.bf16.msra.mxu0 %v6808_v36  ;;  %2851 = vmatpush1.bf16.msra.mxu1 %v6811_v58 }
 0x4f7   :  { %2811 = vmatprep.subr.bf16.mxu0 %v6814_v0  ;;  %2852 = vmatprep.subr.bf16.mxu1 %v6817_v37 }
 0x4fa   :  { %2812 = vmatpush1.bf16.msra.mxu0 %v6820_v21  ;;  %2853 = vmatpush1.bf16.msra.mxu1 %v6823_v55 }
 0x4fb   :  { %2813 = vmatprep.subr.bf16.mxu0 %v6826_v20  ;;  %2854 = vmatprep.subr.bf16.mxu1 %v6829_v4 }
 0x4fe   :  { %2814 = vmatpush1.bf16.msra.mxu0 %v6832_v18  ;;  %2855 = vmatpush1.bf16.msra.mxu1 %v6835_v47 }
 0x4ff   :  { %2815 = vmatprep.subr.bf16.mxu0 %v6838_v30  ;;  %2856 = vmatprep.subr.bf16.mxu1 %v6841_v50 }
 0x502   :  { %2816 = vmatpush1.bf16.msra.mxu0 %v6844_v2  ;;  %2857 = vmatpush1.bf16.msra.mxu1 %v6847_v26 }
 0x503   :  { %2817 = vmatprep.subr.bf16.mxu0 %v6850_v1  ;;  %2858 = vmatprep.subr.bf16.mxu1 %v6853_v40 }
 0x506   :  { %2818 = vmatpush1.bf16.msra.mxu0 %v6856_v11  ;;  %2859 = vmatpush1.bf16.msra.mxu1 %v6859_v57 }
 0x507   :  { %3237 = vmatprep.subr.bf16.mxu0 %v6645_v53  ;;  %3278 = vmatprep.subr.bf16.mxu1 %v6648_v35 }
 0x5a9   :  { %v2403_v22 = vpop.f32.mrf.mxu0  ;;  %v2444_v60 = vpop.f32.mrf.mxu1 }
 0x5aa   :  { %v2455_v10 = vrot.slane %v2403_v22, 4  ;;  %v2459_v63 = vrot.slane %v2403_v22, 5  ;;  %v2463_v6 = vrot.slane %v2403_v22, 6  ;;  %v2467_v19 = vrot.slane %v2403_v22, 7 }
 0x5ab   :  { %v2471_v28 = vrot.slane %v2403_v22, 1  ;;  %v2475_v27 = vrot.slane %v2403_v22, 2  ;;  %v2479_v32 = vrot.slane %v2403_v22, 3  ;;  %v2531_v14 = vadd.f32 %v2403_v22, %v5938_v5  ;;  %v6865_v46 = vpop.f32.mrf.mxu0  ;;  %v6867_v44 = vpop.f32.mrf.mxu1 }
 0x5ac   :  { %v2515_v3 = vadd.f32 %v2455_v10, %v7668_v48  ;;  %v2519_v53 = vadd.f32 %v2459_v63, %v7669_v34  ;;  %v2523_v35 = vadd.f32 %v2463_v6, %v7670_v42  ;;  %v2527_v56 = vadd.f32 %v2467_v19, %v7647_v24  ;;  %v7719_v24 = vld [vmem:[#allocation49_spill] sm:$0xff] }
 0x5ad   :  { %v2535_v61 = vadd.f32 %v2471_v28, %v7671_v16  ;;  %v2539_v33 = vadd.f32 %v2475_v27, %v7672_v7  ;;  %v4292_v41 = vmul.f32 -1.442695, %v2531_v14  ;;  %v2407_v51 = vpop.f32.mrf.mxu0  ;;  %v2448_v49 = vpop.f32.mrf.mxu1  ;;  %v2543_v9 = vadd.f32 %v2479_v32, %v7673_v43 }
 0x5ae   :  { %v4288_v62 = vmul.f32 -1.442695, %v2515_v3  ;;  %v4289_v12 = vmul.f32 -1.442695, %v2519_v53  ;;  %v4290_v38 = vmul.f32 -1.442695, %v2523_v35 }
 0x5af   :  { %v4291_v59 = vmul.f32 -1.442695, %v2527_v56  ;;  %5005 = vpow2.f32 %v4292_v41  ;;  %v2408_v29 = vpop.f32.mrf.mxu0  ;;  %v2449_v22 = vpop.f32.mrf.mxu1  ;;  %v4293_v10 = vmul.f32 -1.442695, %v2535_v61  ;;  %v2457_v63 = vrot.slane %v2444_v60, 4  ;;  %v7698_v51 = vld [vmem:[#allocation30_spill] sm:$0xff] }
 0x5b0   :  { %5007 = vpow2.f32 %v4288_v62  ;;  %v2461_v6 = vrot.slane %v2444_v60, 5  ;;  %v4294_v19 = vmul.f32 -1.442695, %v2539_v33  ;;  %v2465_v28 = vrot.slane %v2444_v60, 6  ;;  %v7699_v53 = vld [vmem:[#allocation33_spill] sm:$0xff]  ;;  %v7700_v41 = vld [vmem:[#allocation34_spill] sm:$0xff] }
 0x5b1   :  { %5009 = vpow2.f32 %v4289_v12  ;;  %v4295_v27 = vmul.f32 -1.442695, %v2543_v9  ;;  %v2469_v14 = vrot.slane %v2444_v60, 7  ;;  %v2517_v32 = vadd.f32 %v2457_v63, %v7698_v51  ;;  %v7701_v62 = vld [vmem:[#allocation35_spill] sm:$0xff]  ;;  %v7702_v33 = vld [vmem:[#allocation36_spill] sm:$0xff]  ;;  %v7703_v9 = vld [vmem:[#allocation37_spill] sm:$0xff] }
 0x5b2   :  { %5011 = vpow2.f32 %v4290_v38  ;;  %v2473_v3 = vrot.slane %v2444_v60, 1  ;;  %v2521_v35 = vadd.f32 %v2461_v6, %v7699_v53  ;;  %v2477_v56 = vrot.slane %v2444_v60, 2  ;;  %v7710_v51 = vld [vmem:[#allocation46_spill] sm:$0xff] }
 0x5b3   :  { %5013 = vpow2.f32 %v4291_v59  ;;  %v2525_v49 = vadd.f32 %v2465_v28, %v7700_v41  ;;  %v2481_v61 = vrot.slane %v2444_v60, 3  ;;  %v2529_v12 = vadd.f32 %v2469_v14, %v7701_v62  ;;  %v7704_v59 = vld [vmem:[#allocation38_spill] sm:$0xff]  ;;  %v7709_v41 = vld [vmem:[#allocation44_spill] sm:$0xff] }
 0x5b4   :  { %5015 = vpow2.f32 %v4293_v10  ;;  %v2533_v29 = vadd.f32 %v2444_v60, %v7702_v33  ;;  %v2537_v38 = vadd.f32 %v2473_v3, %v7703_v9  ;;  %v2541_v22 = vadd.f32 %v2477_v56, %v7704_v59  ;;  %v7705_v10 = vld [vmem:[#allocation39_spill] sm:$0xff] }
 0x5b5   :  { %5017 = vpow2.f32 %v4294_v19  ;;  %v2545_v63 = vadd.f32 %v2481_v61, %v7705_v10  ;;  %v2456_v6 = vrot.slane %v6865_v46, 4  ;;  %v2460_v28 = vrot.slane %v6865_v46, 5 }
 0x5b6   :  { %5019 = vpow2.f32 %v4295_v27  ;;  %v2464_v60 = vrot.slane %v6865_v46, 6  ;;  %v2472_v56 = vrot.slane %v6865_v46, 1 }
 0x5b7   :  { %5021 = vtanh.f32 %v2517_v32  ;;  %v2468_v32 = vrot.slane %v6865_v46, 7 }
 0x5b8   :  { %5023 = vtanh.f32 %v2521_v35 }
 0x5b9   :  { %5025 = vtanh.f32 %v2525_v49  ;;  %v2528_v53 = vadd.f32 %v2468_v32, %v7709_v41  ;;  %v2462_v32 = vrot.slane %v6867_v44, 5  ;;  %v7714_v41 = vld [vmem:[#allocation32_spill] sm:$0xff] }
 0x5ba   :  { %5027 = vtanh.f32 %v2529_v12  ;;  %v2476_v12 = vrot.slane %v6865_v46, 2 }
 0x5bb   :  { %5029 = vtanh.f32 %v2533_v29  ;;  %v7706_v29 = vld [vmem:[#allocation31_spill] sm:$0xff] }
 0x5bc   :  { %v5006_v19 = vpop.eup %5005  ;;  %5031 = vtanh.f32 %v2537_v38  ;;  %v2516_v38 = vadd.f32 %v2456_v6, %v7706_v29  ;;  %v2532_v6 = vadd.f32 %v6865_v46, %v7710_v51  ;;  %v7711_v29 = vld [vmem:[#allocation48_spill] sm:$0xff] }
 0x5bd   :  { %v5008_v27 = vpop.eup %5007  ;;  %v2575_v14 = vadd.f32 1.0, %v5006_v19  ;;  %5033 = vtanh.f32 %v2541_v22  ;;  %v2480_v22 = vrot.slane %v6865_v46, 3  ;;  %v7707_v19 = vld [vmem:[#allocation40_spill] sm:$0xff] }
 0x5be   :  { %v5010_v3 = vpop.eup %5009  ;;  %v2571_v35 = vadd.f32 1.0, %v5008_v27  ;;  %5035 = vtanh.f32 %v2545_v63  ;;  %v2520_v9 = vadd.f32 %v2460_v28, %v7707_v19  ;;  %v7708_v63 = vld [vmem:[#allocation42_spill] sm:$0xff]  ;;  %v4296_v7 = vmul.f32 -1.442695, %v2516_v38 }
 0x5bf   :  { %v5012_v49 = vpop.eup %5011  ;;  %v2572_v61 = vadd.f32 1.0, %v5010_v3  ;;  %5037 = vrcp.f32 %v2575_v14  ;;  %v2524_v27 = vadd.f32 %v2464_v60, %v7708_v63  ;;  %v2458_v28 = vrot.slane %v6867_v44, 4 }
 0x5c0   :  { %v5014_v10 = vpop.eup %5013  ;;  %v2573_v59 = vadd.f32 1.0, %v5012_v49  ;;  %5039 = vrcp.f32 %v2571_v35  ;;  %v2536_v49 = vadd.f32 %v2472_v56, %v7711_v29  ;;  %v4297_v60 = vmul.f32 -1.442695, %v2520_v9 }
 0x5c1   :  { %v5016_v33 = vpop.eup %5015  ;;  %v2574_v62 = vadd.f32 1.0, %v5014_v10  ;;  %5041 = vrcp.f32 %v2572_v61  ;;  %v4298_v51 = vmul.f32 -1.442695, %v2524_v27  ;;  %v2466_v56 = vrot.slane %v6867_v44, 6 }
 0x5c2   :  { %v5018_v3 = vpop.eup %5017  ;;  %v2576_v14 = vadd.f32 1.0, %v5016_v33  ;;  %5043 = vrcp.f32 %v2573_v59  ;;  %v7712_v59 = vld [vmem:[#allocation50_spill] sm:$0xff]  ;;  %v4299_v29 = vmul.f32 -1.442695, %v2528_v53  ;;  %v4300_v9 = vmul.f32 -1.442695, %v2532_v6 }
 0x5c3   :  { %v5020_v35 = vpop.eup %5019  ;;  %v2577_v43 = vadd.f32 1.0, %v5018_v3  ;;  %5045 = vrcp.f32 %v2574_v62  ;;  %v2540_v46 = vadd.f32 %v2476_v12, %v7712_v59  ;;  %v7713_v62 = vld [vmem:[#allocation52_spill] sm:$0xff]  ;;  %v2518_v63 = vadd.f32 %v2458_v28, %v7714_v41  ;;  %v7715_v59 = vld [vmem:[#allocation41_spill] sm:$0xff] }
 0x5c4   :  { %v6899_v10 = vpop.eup %5021  ;;  %v2578_v61 = vadd.f32 1.0, %v5020_v35  ;;  %5047 = vrcp.f32 %v2576_v14  ;;  %v2544_v38 = vadd.f32 %v2480_v22, %v7713_v62  ;;  %v2470_v35 = vrot.slane %v6867_v44, 7  ;;  %v7716_v62 = vld [vmem:[#allocation43_spill] sm:$0xff] }
 0x5c5   :  { %v6902_v33 = vpop.eup %5023  ;;  %5049 = vrcp.f32 %v2577_v43  ;;  %v4301_v12 = vmul.f32 -1.442695, %v2536_v49  ;;  %v2474_v27 = vrot.slane %v6867_v44, 1  ;;  %v2522_v19 = vadd.f32 %v2462_v32, %v7715_v59  ;;  %v7718_v32 = vld [vmem:[#allocation47_spill] sm:$0xff] }
 0x5c6   :  { %v6906_v3 = vpop.eup %5025  ;;  %5051 = vrcp.f32 %v2578_v61  ;;  %v4302_v53 = vmul.f32 -1.442695, %v2540_v46  ;;  %v2478_v22 = vrot.slane %v6867_v44, 2  ;;  %v2526_v5 = vadd.f32 %v2466_v56, %v7716_v62 }
 0x5c7   :  { %v6910_v14 = vpop.eup %5027  ;;  %5053 = vpow2.f32 %v4296_v7  ;;  %v4303_v6 = vmul.f32 -1.442695, %v2544_v38  ;;  %v2482_v28 = vrot.slane %v6867_v44, 3  ;;  %v2534_v59 = vadd.f32 %v6867_v44, %v7718_v32 }
 0x5c8   :  { %v6913_v43 = vpop.eup %5029  ;;  %5055 = vpow2.f32 %v4297_v60  ;;  %v7717_v60 = vld [vmem:[#allocation45_spill] sm:$0xff]  ;;  %v2538_v56 = vadd.f32 %v2474_v27, %v7719_v24  ;;  %v4305_v62 = vmul.f32 -1.442695, %v2522_v19  ;;  %v4306_v34 = vmul.f32 -1.442695, %v2526_v5 }
 0x5c9   :  { %v6917_v61 = vpop.eup %5031  ;;  %5057 = vpow2.f32 %v4298_v51  ;;  %v2530_v49 = vadd.f32 %v2470_v35, %v7717_v60  ;;  %v4304_v51 = vmul.f32 -1.442695, %v2518_v63  ;;  %v4308_v63 = vmul.f32 -1.442695, %v2534_v59 }
 0x5ca   :  { %v6921_v7 = vpop.eup %5033  ;;  %5059 = vpow2.f32 %v4299_v29  ;;  %v7720_v29 = vld [vmem:[#allocation51_spill] sm:$0xff]  ;;  %v4309_v19 = vmul.f32 -1.442695, %v2538_v56 }
 0x5cb   :  { %v6925_v41 = vpop.eup %5035  ;;  %5061 = vpow2.f32 %v4300_v9  ;;  %v2542_v38 = vadd.f32 %v2478_v22, %v7720_v29  ;;  %v7721_v9 = vld [vmem:[#allocation53_spill] sm:$0xff]  ;;  %v4307_v48 = vmul.f32 -1.442695, %v2530_v49 }
 0x5cc   :  { %v6929_v46 = vpop.eup %5037  ;;  %5063 = vpow2.f32 %v4301_v12  ;;  %v2546_v60 = vadd.f32 %v2482_v28, %v7721_v9 }
 0x5cd   :  { %v6932_v42 = vpop.eup %5039  ;;  %5065 = vpow2.f32 %v4302_v53  ;;  %v4310_v53 = vmul.f32 -1.442695, %v2542_v38 }
 0x5ce   :  { %v6935_v35 = vpop.eup %5041  ;;  %5067 = vpow2.f32 %v4303_v6  ;;  %v4311_v5 = vmul.f32 -1.442695, %v2546_v60 }
 0x5cf   :  { %v6938_v44 = vpop.eup %5043  ;;  %5069 = vpow2.f32 %v4304_v51 }
 0x5d0   :  { %v6940_v12 = vpop.eup %5045  ;;  %5071 = vpow2.f32 %v4305_v62 }
 0x5d1   :  { %v6942_v27 = vpop.eup %5047  ;;  %5073 = vpow2.f32 %v4306_v34 }
 0x5d2   :  { %v6944_v22 = vpop.eup %5049  ;;  %5075 = vpow2.f32 %v4307_v48 }
 0x5d3   :  { %v6946_v6 = vpop.eup %5051  ;;  %5077 = vpow2.f32 %v4308_v63 }
 0x5d4   :  { %v5054_v28 = vpop.eup %5053  ;;  %5079 = vpow2.f32 %v4309_v19 }
 0x5d5   :  { %v5056_v49 = vpop.eup %5055  ;;  %v2619_v51 = vadd.f32 1.0, %v5054_v28  ;;  %5081 = vpow2.f32 %v4310_v53 }
 0x5d6   :  { %v5058_v59 = vpop.eup %5057  ;;  %v2620_v9 = vadd.f32 1.0, %v5056_v49  ;;  %5083 = vpow2.f32 %v4311_v5 }
 0x5d7   :  { %v5060_v62 = vpop.eup %5059  ;;  %v2621_v56 = vadd.f32 1.0, %v5058_v59  ;;  %5085 = vrcp.f32 %v2619_v51 }
 0x5d8   :  { %v5062_v34 = vpop.eup %5061  ;;  %v2622_v38 = vadd.f32 1.0, %v5060_v62  ;;  %5087 = vrcp.f32 %v2620_v9 }
 0x5d9   :  { %v5064_v29 = vpop.eup %5063  ;;  %v2623_v48 = vadd.f32 1.0, %v5062_v34  ;;  %5089 = vrcp.f32 %v2621_v56 }
 0x5da   :  { %v5066_v60 = vpop.eup %5065  ;;  %v2624_v24 = vadd.f32 1.0, %v5064_v29  ;;  %5091 = vrcp.f32 %v2622_v38  ;;  %v2707_v38 = vrot.slane %v6749_v15, 7  ;;  %v2713_v15 = vrot.slane %v6775_v23, 7 }
 0x5db   :  { %v5068_v63 = vpop.eup %5067  ;;  %v2625_v19 = vadd.f32 1.0, %v5066_v60  ;;  %5093 = vrcp.f32 %v2623_v48  ;;  %v2708_v48 = vrot.slane %v6753_v39, 7  ;;  %v2731_v39 = vmul.f32 %v6932_v42, %v6899_v10 }
 0x5dc   :  { %v5070_v28 = vpop.eup %5069  ;;  %v2626_v53 = vadd.f32 1.0, %v5068_v63  ;;  %5095 = vrcp.f32 %v2624_v24  ;;  %v2710_v63 = vrot.slane %v6762_v31, 7  ;;  %v2734_v42 = vmul.f32 %v6940_v12, %v6910_v14 }
 0x5dd   :  { %v5072_v49 = vpop.eup %5071  ;;  %5097 = vrcp.f32 %v2625_v19  ;;  %v2675_v5 = vadd.f32 1.0, %v5070_v28  ;;  %v2709_v19 = vrot.slane %v6757_v17, 7  ;;  %v2714_v17 = vrot.slane %v6778_v54, 7 }
 0x5de   :  { %v5074_v59 = vpop.eup %5073  ;;  %5099 = vrcp.f32 %v2626_v53  ;;  %v2676_v51 = vadd.f32 1.0, %v5072_v49  ;;  %v2711_v49 = vrot.slane %v6767_v45, 7 }
 0x5df   :  { %v5076_v62 = vpop.eup %5075  ;;  %v2677_v9 = vadd.f32 1.0, %v5074_v59  ;;  %5101 = vrcp.f32 %v2675_v5 }
 0x5e0   :  { %v5078_v32 = vpop.eup %5077  ;;  %v2678_v34 = vadd.f32 1.0, %v5076_v62  ;;  %5103 = vrcp.f32 %v2676_v51  ;;  %v2732_v62 = vmul.f32 %v6935_v35, %v6902_v33  ;;  %v2735_v33 = vmul.f32 %v6929_v46, %v6913_v43 }
 0x5e1   :  { %v5080_v56 = vpop.eup %5079  ;;  %v2679_v16 = vadd.f32 1.0, %v5078_v32  ;;  %5105 = vrcp.f32 %v2677_v9  ;;  %v2712_v32 = vrot.slane %v6772_v8, 7  ;;  %v2733_v8 = vmul.f32 %v6938_v44, %v6906_v3 }
 0x5e2   :  { %v5082_v29 = vpop.eup %5081  ;;  %v2680_v60 = vadd.f32 1.0, %v5080_v56  ;;  %5107 = vrcp.f32 %v2678_v34 }
 0x5e3   :  { %v5084_v24 = vpop.eup %5083  ;;  %v2681_v28 = vadd.f32 1.0, %v5082_v29  ;;  %5109 = vrcp.f32 %v2679_v16 }
 0x5e4   :  { %v5086_v53 = vpop.eup %5085  ;;  %v2682_v5 = vadd.f32 1.0, %v5084_v24  ;;  %5111 = vrcp.f32 %v2680_v60  ;;  %v2737_v60 = vmul.f32 %v6944_v22, %v6921_v7  ;;  %v2738_v24 = vmul.f32 %v6946_v6, %v6925_v41 }
 0x5e5   :  { %v5088_v59 = vpop.eup %5087  ;;  %v2723_v51 = vmul.f32 %v5086_v53, %v2707_v38  ;;  %5113 = vrcp.f32 %v2681_v28  ;;  %v2736_v38 = vmul.f32 %v6942_v27, %v6917_v61 }
 0x5e6   :  { %v5090_v31 = vpop.eup %5089  ;;  %v2724_v9 = vmul.f32 %v5088_v59, %v2708_v48  ;;  %5115 = vrcp.f32 %v2682_v5 }
 0x5e7   :  { %v5092_v45 = vpop.eup %5091  ;;  %v2725_v34 = vmul.f32 %v5090_v31, %v2709_v19  ;;  %v6962_v56 = vadd.f32 %v2731_v39, %v2723_v51 }
 0x5e8   :  { %v5094_v23 = vpop.eup %5093  ;;  %v6966_v16 = vadd.f32 %v2732_v62, %v2724_v9  ;;  %v2726_v54 = vmul.f32 %v5092_v45, %v2710_v63 }
 0x5e9   :  { %v5096_v10 = vpop.eup %5095  ;;  %v2727_v35 = vmul.f32 %v5094_v23, %v2711_v49  ;;  %v6970_v29 = vadd.f32 %v2733_v8, %v2725_v34  ;;  %5117 = vtanh.f32 %v6962_v56 }
 0x5ea   :  { %v5098_v3 = vpop.eup %5097  ;;  %v2728_v44 = vmul.f32 %v5096_v10, %v2712_v32  ;;  %v6975_v48 = vadd.f32 %v2734_v42, %v2726_v54  ;;  %5119 = vtanh.f32 %v6966_v16 }
 0x5eb   :  { %v5100_v14 = vpop.eup %5099  ;;  %v2729_v12 = vmul.f32 %v5098_v3, %v2713_v15  ;;  %v6980_v43 = vadd.f32 %v2735_v33, %v2727_v35  ;;  %5121 = vtanh.f32 %v6970_v29 }
 0x5ec   :  { %v2730_v46 = vmul.f32 %v5100_v14, %v2714_v17  ;;  %v6985_v63 = vadd.f32 %v2736_v38, %v2728_v44  ;;  %5123 = vtanh.f32 %v6975_v48  ;;  %v5102_v27 = vpop.eup %5101 }
 0x5ed   :  { %v6988_v61 = vadd.f32 %v2737_v60, %v2729_v12  ;;  %5125 = vtanh.f32 %v6980_v43  ;;  %v5104_v7 = vpop.eup %5103 }
 0x5ee   :  { %v6991_v19 = vadd.f32 %v2738_v24, %v2730_v46  ;;  %5127 = vtanh.f32 %v6985_v63  ;;  %v5106_v22 = vpop.eup %5105 }
 0x5ef   :  { %5129 = vtanh.f32 %v6988_v61  ;;  %v5108_v41 = vpop.eup %5107 }
 0x5f0   :  { %5131 = vtanh.f32 %v6991_v19  ;;  %v5110_v6 = vpop.eup %5109 }
 0x5f1   :  { %v5112_v28 = vpop.eup %5111 }
 0x5f2   :  { %v5114_v53 = vpop.eup %5113 }
 0x5f3   :  { %v5116_v49 = vpop.eup %5115 }
 0x5f6   :  { %v5118_v32 = vpop.eup %5117 }
 0x5f7   :  { %v5120_v5 = vpop.eup %5119  ;;  %v2755_v59 = vmul.f32 %v5118_v32, %v5102_v27 }
 0x5f8   :  { %v5122_v15 = vpop.eup %5121  ;;  %v2756_v39 = vmul.f32 %v5120_v5, %v5104_v7 }
 0x5f9   :  { %v5124_v51 = vpop.eup %5123  ;;  %v2757_v31 = vmul.f32 %v5122_v15, %v5106_v22  ;;  %v2763_v17 = vpack.c.bf16 %v2755_v59, %v2755_v59 }
 0x5fa   :  { %v5126_v62 = vpop.eup %5125  ;;  %v2758_v9 = vmul.f32 %v5124_v51, %v5108_v41  ;;  %v2764_v45 = vpack.c.bf16 %v2756_v39, %v2756_v39 }
 0x5fb   :  { %v5128_v8 = vpop.eup %5127  ;;  %v2759_v34 = vmul.f32 %v5126_v62, %v5110_v6  ;;  %v2765_v23 = vpack.c.bf16 %v2757_v31, %v2757_v31  ;;  %v2779_v42 = vunpack.c.l.b16 %v2763_v17 }
 0x5fc   :  { %v5130_v54 = vpop.eup %5129  ;;  %v2760_v10 = vmul.f32 %v5128_v8, %v5112_v28  ;;  %v2766_v33 = vpack.c.bf16 %v2758_v9, %v2758_v9  ;;  %v2780_v35 = vunpack.c.l.b16 %v2764_v45 }
 0x5fd   :  { %v5132_v3 = vpop.eup %5131  ;;  %v2761_v44 = vmul.f32 %v5130_v54, %v5114_v53  ;;  %v2767_v38 = vpack.c.bf16 %v2759_v34, %v2759_v34  ;;  %v2781_v14 = vunpack.c.l.b16 %v2765_v23  ;;  %v2787_v12 = vrot.slane %v2779_v42, 4  ;;  %v7003_v34 = vld [vmem:[#allocation7 + $0xe0] ss:$16 sps:$4 sm:$0xff]   ;;  %v7006_v23 = vld [vmem:[#allocation7 + $0xe8] ss:$16 sps:$4 sm:$0xff]  }
 0x5fe   :  { %v2762_v60 = vmul.f32 %v5132_v3, %v5116_v49  ;;  %v2768_v46 = vpack.c.bf16 %v2760_v10, %v2760_v10  ;;  %v2782_v24 = vunpack.c.l.b16 %v2766_v33  ;;  %v2788_v27 = vrot.slane %v2780_v35, 3  ;;  %v7009_v42 = vld [vmem:[#allocation7 + $0xc4] ss:$16 sps:$4 sm:$0xff]   ;;  %v7012_v54 = vld [vmem:[#allocation7 + $0xcc] ss:$16 sps:$4 sm:$0xff]  }
 0x5ff   :  { %v2769_v7 = vpack.c.bf16 %v2761_v44, %v2761_v44  ;;  %v2790_v22 = vrot.slane %v2781_v14, 2  ;;  %v2783_v59 = vunpack.c.l.b16 %v2767_v38  ;;  %v7017_v10 = vld [vmem:[#allocation7 + $0xc0] ss:$16 sps:$4 sm:$0xff]   ;;  %v7020_v33 = vld [vmem:[#allocation7 + $0xc8] ss:$16 sps:$4 sm:$0xff]  }
 0x600   :  { %v2770_v41 = vpack.c.bf16 %v2762_v60, %v2762_v60  ;;  %v2784_v32 = vunpack.c.l.b16 %v2768_v46  ;;  %v2789_v6 = vsel %vm1045_vm0, %v2788_v27, %v2787_v12  ;;  %v2792_v5 = vrot.slane %v2782_v24, 1  ;;  %v7023_v35 = vld [vmem:[#allocation7 + $0xa4] ss:$16 sps:$4 sm:$0xff]   ;;  %v7026_v3 = vld [vmem:[#allocation7 + $0xac] ss:$16 sps:$4 sm:$0xff]  }
 0x601   :  { %v2785_v28 = vunpack.c.l.b16 %v2769_v7  ;;  %v2791_v15 = vsel %vm1048_vm1, %v2790_v22, %v2789_v6  ;;  %v7029_v44 = vld [vmem:[#allocation7 + $0xa0] ss:$16 sps:$4 sm:$0xff]   ;;  %v7032_v38 = vld [vmem:[#allocation7 + $0xa8] ss:$16 sps:$4 sm:$0xff]  }
 0x602   :  { %v2786_v39 = vunpack.c.l.b16 %v2770_v41  ;;  %v2793_v53 = vsel %vm1051_vm2, %v2792_v5, %v2791_v15  ;;  %v2795_v51 = vrot.slane %v2784_v32, 7  ;;  %v7726_v12 = vld [vmem:[#allocation25_spill] sm:$0xff]  ;;  %v7727_v46 = vld [vmem:[#allocation26_spill] sm:$0xff]  ;;  %v7728_v27 = vld [vmem:[#allocation28_spill] sm:$0xff] }
 0x603   :  { %v2794_v49 = vsel %vm1054_vm3, %v2783_v59, %v2793_v53  ;;  %v2797_v31 = vrot.slane %v2785_v28, 6  ;;  %v7729_v6 = vld [vmem:[#allocation29_spill] sm:$0xff] }
 0x604   :  { %v2796_v17 = vsel %vm1057_vm4, %v2795_v51, %v2794_v49  ;;  %v2799_v62 = vrot.slane %v2786_v39, 5 }
 0x605   :  { %v2798_v9 = vsel %vm1060_vm5, %v2797_v31, %v2796_v17 }
 0x606   :  { %v2800_v45 = vsel %vm1063_vm6, %v2799_v62, %v2798_v9 }
 0x607   :  { %v2801_v8 = vpack.c.b16 %v2800_v45, %v2800_v45 }
 0x609   :  { %2836 = vmatmul.mubr.bf16.vlgmr.msra.gmra.mxu0 %v2801_v8  ;;  %2877 = vmatmul.mubr.bf16.vlgmr.msra.gmra.mxu1 %v2801_v8 }
 0x60a   :  { %3238 = vmatpush1.bf16.msra.mxu0 %v7003_v34  ;;  %3279 = vmatpush1.bf16.msra.mxu1 %v7006_v23 }
 0x60b   :  { %3239 = vmatprep.subr.bf16.mxu0 %v7009_v42  ;;  %3280 = vmatprep.subr.bf16.mxu1 %v7012_v54 }
 0x60c   :  { %3269 = vmatprep.mubr.bf16.mxu0 %v7613_v25  ;;  %3310 = vmatprep.mubr.bf16.mxu1 %v7613_v25 }
 0x60e   :  { %3240 = vmatpush1.bf16.msra.mxu0 %v7017_v10  ;;  %3281 = vmatpush1.bf16.msra.mxu1 %v7020_v33 }
 0x60f   :  { %3241 = vmatprep.subr.bf16.mxu0 %v7023_v35  ;;  %3282 = vmatprep.subr.bf16.mxu1 %v7026_v3 }
 0x612   :  { %3242 = vmatpush1.bf16.msra.mxu0 %v7029_v44  ;;  %3283 = vmatpush1.bf16.msra.mxu1 %v7032_v38 }
 0x613   :  { %3243 = vmatprep.subr.bf16.mxu0 %v6802_v13  ;;  %3284 = vmatprep.subr.bf16.mxu1 %v6805_v52  ;;  %v5591_v13 = vld [vmem:[#allocation7 + $0xe4] ss:$16 sps:$4 sm:$0xff]   ;;  %v5592_v52 = vld [vmem:[#allocation7 + $0xec] ss:$16 sps:$4 sm:$0xff]  }
 0x616   :  { %3244 = vmatpush1.bf16.msra.mxu0 %v6808_v36  ;;  %3285 = vmatpush1.bf16.msra.mxu1 %v6811_v58 }
 0x617   :  { %3245 = vmatprep.subr.bf16.mxu0 %v6814_v0  ;;  %3286 = vmatprep.subr.bf16.mxu1 %v6817_v37 }
 0x61a   :  { %3246 = vmatpush1.bf16.msra.mxu0 %v6820_v21  ;;  %3287 = vmatpush1.bf16.msra.mxu1 %v6823_v55 }
 0x61b   :  { %3247 = vmatprep.subr.bf16.mxu0 %v6826_v20  ;;  %3288 = vmatprep.subr.bf16.mxu1 %v6829_v4 }
 0x61e   :  { %3248 = vmatpush1.bf16.msra.mxu0 %v6832_v18  ;;  %3289 = vmatpush1.bf16.msra.mxu1 %v6835_v47  ;;  %v7722_v47 = vld [vmem:[#allocation27_spill] sm:$0xff] }
 0x61f   :  { %3249 = vmatprep.subr.bf16.mxu0 %v6838_v30  ;;  %3290 = vmatprep.subr.bf16.mxu1 %v6841_v50 }
 0x622   :  { %3250 = vmatpush1.bf16.msra.mxu0 %v6844_v2  ;;  %3291 = vmatpush1.bf16.msra.mxu1 %v6847_v26  ;;  %v7723_v26 = vld [vmem:[#allocation22_spill] sm:$0xff] }
 0x623   :  { %3251 = vmatprep.subr.bf16.mxu0 %v6850_v1  ;;  %3292 = vmatprep.subr.bf16.mxu1 %v6853_v40  ;;  %v7724_v40 = vld [vmem:[#allocation23_spill] sm:$0xff] }
 0x626   :  { %3252 = vmatpush1.bf16.msra.mxu0 %v6856_v11  ;;  %3293 = vmatpush1.bf16.msra.mxu1 %v6859_v57  ;;  %v7725_v57 = vld [vmem:[#allocation24_spill] sm:$0xff] }
 0x627   :  { %3671 = vmatprep.subr.bf16.mxu0 %v5591_v13  ;;  %3712 = vmatprep.subr.bf16.mxu1 %v5592_v52  ;;  %v7730_v52 = vld [vmem:[#allocation30_spill] sm:$0xff] }
 0x6c9   :  { %v2837_v36 = vpop.f32.mrf.mxu0  ;;  %v2878_v58 = vpop.f32.mrf.mxu1 }
 0x6ca   :  { %v2889_v0 = vrot.slane %v2837_v36, 3  ;;  %v2893_v37 = vrot.slane %v2837_v36, 4  ;;  %v2897_v21 = vrot.slane %v2837_v36, 5  ;;  %v2901_v55 = vrot.slane %v2837_v36, 6 }
 0x6cb   :  { %v2905_v20 = vrot.slane %v2837_v36, 7  ;;  %v2909_v4 = vrot.slane %v2837_v36, 1  ;;  %v2913_v18 = vrot.slane %v2837_v36, 2  ;;  %v2969_v30 = vadd.f32 %v2837_v36, %v7722_v47  ;;  %v7056_v50 = vpop.f32.mrf.mxu0  ;;  %v7058_v2 = vpop.f32.mrf.mxu1 }
 0x6cc   :  { %v2949_v1 = vadd.f32 %v2889_v0, %v7723_v26  ;;  %v2953_v11 = vadd.f32 %v2893_v37, %v7724_v40  ;;  %v2957_v14 = vadd.f32 %v2897_v21, %v7725_v57  ;;  %v2961_v60 = vadd.f32 %v2901_v55, %v7726_v12  ;;  %v7731_v0 = vld [vmem:[#allocation33_spill] sm:$0xff]  ;;  %v7732_v55 = vld [vmem:[#allocation34_spill] sm:$0xff] }
 0x6cd   :  { %v2965_v24 = vadd.f32 %v2905_v20, %v7727_v46  ;;  %v2973_v7 = vadd.f32 %v2909_v4, %v7728_v27  ;;  %v4317_v22 = vmul.f32 -1.442695, %v2969_v30  ;;  %v2841_v41 = vpop.f32.mrf.mxu0  ;;  %v2882_v32 = vpop.f32.mrf.mxu1  ;;  %v2977_v5 = vadd.f32 %v2913_v18, %v7729_v6  ;;  %v7733_v18 = vld [vmem:[#allocation35_spill] sm:$0xff] }
 0x6ce   :  { %v4312_v59 = vmul.f32 -1.442695, %v2949_v1  ;;  %v4313_v28 = vmul.f32 -1.442695, %v2953_v11  ;;  %v4314_v15 = vmul.f32 -1.442695, %v2957_v14 }
 0x6cf   :  { %v4315_v39 = vmul.f32 -1.442695, %v2961_v60  ;;  %5133 = vpow2.f32 %v4317_v22  ;;  %v2842_v53 = vpop.f32.mrf.mxu0  ;;  %v2883_v51 = vpop.f32.mrf.mxu1  ;;  %v4316_v49 = vmul.f32 -1.442695, %v2965_v24  ;;  %v2891_v31 = vrot.slane %v2878_v58, 3  ;;  %v7734_v1 = vld [vmem:[#allocation36_spill] sm:$0xff] }
 0x6d0   :  { %5135 = vpow2.f32 %v4312_v59  ;;  %v2895_v17 = vrot.slane %v2878_v58, 4  ;;  %v4318_v62 = vmul.f32 -1.442695, %v2973_v7  ;;  %v2899_v9 = vrot.slane %v2878_v58, 5  ;;  %v7735_v14 = vld [vmem:[#allocation37_spill] sm:$0xff]  ;;  %v7736_v24 = vld [vmem:[#allocation38_spill] sm:$0xff] }
 0x6d1   :  { %5137 = vpow2.f32 %v4313_v28  ;;  %v4319_v45 = vmul.f32 -1.442695, %v2977_v5  ;;  %v2903_v8 = vrot.slane %v2878_v58, 6  ;;  %v2907_v13 = vrot.slane %v2878_v58, 7  ;;  %v7737_v22 = vld [vmem:[#allocation39_spill] sm:$0xff] }
 0x6d2   :  { %5139 = vpow2.f32 %v4314_v15  ;;  %v2951_v36 = vadd.f32 %v2891_v31, %v7730_v52  ;;  %v2955_v37 = vadd.f32 %v2895_v17, %v7731_v0  ;;  %v2911_v21 = vrot.slane %v2878_v58, 1 }
 0x6d3   :  { %5141 = vpow2.f32 %v4315_v39  ;;  %v2959_v20 = vadd.f32 %v2899_v9, %v7732_v55  ;;  %v2915_v4 = vrot.slane %v2878_v58, 2  ;;  %v2963_v30 = vadd.f32 %v2903_v8, %v7733_v18  ;;  %v7738_v9 = vld [vmem:[#allocation31_spill] sm:$0xff] }
 0x6d4   :  { %5143 = vpow2.f32 %v4316_v49  ;;  %v2967_v11 = vadd.f32 %v2907_v13, %v7734_v1  ;;  %v2971_v60 = vadd.f32 %v2878_v58, %v7735_v14  ;;  %v2975_v7 = vadd.f32 %v2911_v21, %v7736_v24 }
 0x6d5   :  { %5145 = vpow2.f32 %v4318_v62  ;;  %v2979_v41 = vadd.f32 %v2915_v4, %v7737_v22  ;;  %v2890_v32 = vrot.slane %v7056_v50, 3  ;;  %v2894_v59 = vrot.slane %v7056_v50, 4 }
 0x6d6   :  { %5147 = vpow2.f32 %v4319_v45  ;;  %v2898_v39 = vrot.slane %v7056_v50, 5  ;;  %v2902_v58 = vrot.slane %v7056_v50, 6  ;;  %v2906_v49 = vrot.slane %v7056_v50, 7 }
 0x6d7   :  { %5149 = vtanh.f32 %v2951_v36  ;;  %v2910_v62 = vrot.slane %v7056_v50, 1  ;;  %v2950_v45 = vadd.f32 %v2890_v32, %v7738_v9  ;;  %v2914_v36 = vrot.slane %v7056_v50, 2  ;;  %v7743_v32 = vld [vmem:[#allocation48_spill] sm:$0xff] }
 0x6d8   :  { %5151 = vtanh.f32 %v2955_v37  ;;  %v7739_v37 = vld [vmem:[#allocation40_spill] sm:$0xff] }
 0x6d9   :  { %5153 = vtanh.f32 %v2959_v20  ;;  %v2954_v21 = vadd.f32 %v2894_v59, %v7739_v37  ;;  %v4320_v9 = vmul.f32 -1.442695, %v2950_v45  ;;  %v2892_v59 = vrot.slane %v7058_v2, 3  ;;  %v7745_v45 = vld [vmem:[#allocation52_spill] sm:$0xff] }
 0x6da   :  { %5155 = vtanh.f32 %v2963_v30  ;;  %v7740_v30 = vld [vmem:[#allocation42_spill] sm:$0xff] }
 0x6db   :  { %5157 = vtanh.f32 %v2967_v11  ;;  %v2958_v11 = vadd.f32 %v2898_v39, %v7740_v30  ;;  %v4321_v39 = vmul.f32 -1.442695, %v2954_v21 }
 0x6dc   :  { %v5134_v5 = vpop.eup %5133  ;;  %5159 = vtanh.f32 %v2971_v60  ;;  %v7741_v60 = vld [vmem:[#allocation44_spill] sm:$0xff] }
 0x6dd   :  { %v5136_v28 = vpop.eup %5135  ;;  %v3010_v15 = vadd.f32 1.0, %v5134_v5  ;;  %5161 = vtanh.f32 %v2975_v7  ;;  %v2962_v7 = vadd.f32 %v2902_v58, %v7741_v60  ;;  %v2896_v58 = vrot.slane %v7058_v2, 4 }
 0x6de   :  { %v5138_v53 = vpop.eup %5137  ;;  %v3005_v51 = vadd.f32 1.0, %v5136_v28  ;;  %5163 = vtanh.f32 %v2979_v41  ;;  %v7742_v28 = vld [vmem:[#allocation46_spill] sm:$0xff]  ;;  %v2908_v60 = vrot.slane %v7058_v2, 7 }
 0x6df   :  { %v5140_v31 = vpop.eup %5139  ;;  %v3006_v17 = vadd.f32 1.0, %v5138_v53  ;;  %5165 = vrcp.f32 %v3010_v15  ;;  %v2966_v15 = vadd.f32 %v2906_v49, %v7742_v28  ;;  %v2970_v53 = vadd.f32 %v7056_v50, %v7743_v32  ;;  %v7744_v49 = vld [vmem:[#allocation50_spill] sm:$0xff] }
 0x6e0   :  { %v5142_v8 = vpop.eup %5141  ;;  %v3007_v13 = vadd.f32 1.0, %v5140_v31  ;;  %5167 = vrcp.f32 %v3005_v51  ;;  %v4322_v28 = vmul.f32 -1.442695, %v2958_v11  ;;  %v2900_v50 = vrot.slane %v7058_v2, 5 }
 0x6e1   :  { %v5144_v20 = vpop.eup %5143  ;;  %v3008_v4 = vadd.f32 1.0, %v5142_v8  ;;  %5169 = vrcp.f32 %v3006_v17  ;;  %v4323_v32 = vmul.f32 -1.442695, %v2962_v7  ;;  %v4324_v21 = vmul.f32 -1.442695, %v2966_v15 }
 0x6e2   :  { %v5146_v41 = vpop.eup %5145  ;;  %v3009_v5 = vadd.f32 1.0, %v5144_v20  ;;  %5171 = vrcp.f32 %v3007_v13  ;;  %v2974_v13 = vadd.f32 %v2910_v62, %v7744_v49  ;;  %v4325_v11 = vmul.f32 -1.442695, %v2970_v53  ;;  %v7747_v49 = vld [vmem:[#allocation41_spill] sm:$0xff]  ;;  %v7750_v53 = vld [vmem:[#allocation47_spill] sm:$0xff] }
 0x6e3   :  { %v5148_v51 = vpop.eup %5147  ;;  %v3011_v31 = vadd.f32 1.0, %v5146_v41  ;;  %5173 = vrcp.f32 %v3008_v4  ;;  %v2978_v4 = vadd.f32 %v2914_v36, %v7745_v45  ;;  %v2956_v37 = vadd.f32 %v2896_v58, %v7747_v49  ;;  %v7748_v45 = vld [vmem:[#allocation43_spill] sm:$0xff] }
 0x6e4   :  { %v7090_v8 = vpop.eup %5149  ;;  %v3012_v17 = vadd.f32 1.0, %v5148_v51  ;;  %5175 = vrcp.f32 %v3009_v5  ;;  %v2904_v51 = vrot.slane %v7058_v2, 6  ;;  %v4326_v36 = vmul.f32 -1.442695, %v2974_v13  ;;  %v7751_v13 = vld [vmem:[#allocation49_spill] sm:$0xff] }
 0x6e5   :  { %v7093_v20 = vpop.eup %5151  ;;  %5177 = vrcp.f32 %v3011_v31  ;;  %v7746_v31 = vld [vmem:[#allocation32_spill] sm:$0xff]  ;;  %v2912_v7 = vrot.slane %v7058_v2, 1  ;;  %v2960_v22 = vadd.f32 %v2900_v50, %v7748_v45  ;;  %v4327_v15 = vmul.f32 -1.442695, %v2978_v4 }
 0x6e6   :  { %v7097_v41 = vpop.eup %5153  ;;  %5179 = vrcp.f32 %v3012_v17  ;;  %v2952_v30 = vadd.f32 %v2892_v59, %v7746_v31  ;;  %v2916_v59 = vrot.slane %v7058_v2, 2  ;;  %v7749_v31 = vld [vmem:[#allocation45_spill] sm:$0xff]  ;;  %v2968_v58 = vadd.f32 %v2908_v60, %v7750_v53 }
 0x6e7   :  { %v7101_v5 = vpop.eup %5155  ;;  %5181 = vpow2.f32 %v4320_v9  ;;  %v2964_v24 = vadd.f32 %v2904_v51, %v7749_v31  ;;  %v2972_v50 = vadd.f32 %v7058_v2, %v7751_v13  ;;  %v4329_v45 = vmul.f32 -1.442695, %v2956_v37 }
 0x6e8   :  { %v7105_v62 = vpop.eup %5157  ;;  %5183 = vpow2.f32 %v4321_v39  ;;  %v4328_v49 = vmul.f32 -1.442695, %v2952_v30  ;;  %v4330_v1 = vmul.f32 -1.442695, %v2960_v22 }
 0x6e9   :  { %v7108_v17 = vpop.eup %5159  ;;  %5185 = vpow2.f32 %v4322_v28  ;;  %v4331_v60 = vmul.f32 -1.442695, %v2964_v24  ;;  %v4333_v2 = vmul.f32 -1.442695, %v2972_v50 }
 0x6ea   :  { %v7112_v9 = vpop.eup %5161  ;;  %5187 = vpow2.f32 %v4323_v32  ;;  %v7752_v32 = vld [vmem:[#allocation51_spill] sm:$0xff] }
 0x6eb   :  { %v7116_v39 = vpop.eup %5163  ;;  %5189 = vpow2.f32 %v4324_v21  ;;  %v2976_v4 = vadd.f32 %v2912_v7, %v7752_v32  ;;  %v7753_v21 = vld [vmem:[#allocation53_spill] sm:$0xff] }
 0x6ec   :  { %v7119_v28 = vpop.eup %5165  ;;  %5191 = vpow2.f32 %v4325_v11  ;;  %v2980_v31 = vadd.f32 %v2916_v59, %v7753_v21  ;;  %v4332_v11 = vmul.f32 -1.442695, %v2968_v58 }
 0x6ed   :  { %v7123_v14 = vpop.eup %5167  ;;  %5193 = vpow2.f32 %v4326_v36  ;;  %v4334_v36 = vmul.f32 -1.442695, %v2976_v4 }
 0x6ee   :  { %v7126_v51 = vpop.eup %5169  ;;  %5195 = vpow2.f32 %v4327_v15  ;;  %v4335_v22 = vmul.f32 -1.442695, %v2980_v31 }
 0x6ef   :  { %v7129_v30 = vpop.eup %5171  ;;  %5197 = vpow2.f32 %v4328_v49 }
 0x6f0   :  { %v7131_v53 = vpop.eup %5173  ;;  %5199 = vpow2.f32 %v4329_v45 }
 0x6f1   :  { %v7133_v37 = vpop.eup %5175  ;;  %5201 = vpow2.f32 %v4330_v1 }
 0x6f2   :  { %v7135_v7 = vpop.eup %5177  ;;  %5203 = vpow2.f32 %v4331_v60 }
 0x6f3   :  { %v7137_v15 = vpop.eup %5179  ;;  %5205 = vpow2.f32 %v4332_v11 }
 0x6f4   :  { %v5182_v24 = vpop.eup %5181  ;;  %5207 = vpow2.f32 %v4333_v2 }
 0x6f5   :  { %v5184_v59 = vpop.eup %5183  ;;  %v3053_v49 = vadd.f32 1.0, %v5182_v24  ;;  %5209 = vpow2.f32 %v4334_v36 }
 0x6f6   :  { %v5186_v58 = vpop.eup %5185  ;;  %v3054_v21 = vadd.f32 1.0, %v5184_v59  ;;  %5211 = vpow2.f32 %v4335_v22 }
 0x6f7   :  { %v5188_v45 = vpop.eup %5187  ;;  %v3055_v50 = vadd.f32 1.0, %v5186_v58  ;;  %5213 = vrcp.f32 %v3053_v49 }
 0x6f8   :  { %v5190_v1 = vpop.eup %5189  ;;  %v3056_v4 = vadd.f32 1.0, %v5188_v45  ;;  %5215 = vrcp.f32 %v3054_v21 }
 0x6f9   :  { %v5192_v32 = vpop.eup %5191  ;;  %v3057_v60 = vadd.f32 1.0, %v5190_v1  ;;  %5217 = vrcp.f32 %v3055_v50 }
 0x6fa   :  { %v5194_v31 = vpop.eup %5193  ;;  %v3058_v13 = vadd.f32 1.0, %v5192_v32  ;;  %5219 = vrcp.f32 %v3056_v4  ;;  %v3141_v4 = vrot.slane %v6962_v56, 7  ;;  %v3147_v56 = vrot.slane %v6988_v61, 7 }
 0x6fb   :  { %v5196_v11 = vpop.eup %5195  ;;  %v3059_v2 = vadd.f32 1.0, %v5194_v31  ;;  %5221 = vrcp.f32 %v3057_v60  ;;  %v3142_v60 = vrot.slane %v6966_v16, 7  ;;  %v3165_v16 = vmul.f32 %v7123_v14, %v7090_v8 }
 0x6fc   :  { %v5198_v24 = vpop.eup %5197  ;;  %v3060_v36 = vadd.f32 1.0, %v5196_v11  ;;  %5223 = vrcp.f32 %v3058_v13  ;;  %v3144_v11 = vrot.slane %v6975_v48, 7 }
 0x6fd   :  { %v5200_v59 = vpop.eup %5199  ;;  %5225 = vrcp.f32 %v3059_v2  ;;  %v3109_v22 = vadd.f32 1.0, %v5198_v24  ;;  %v3143_v2 = vrot.slane %v6970_v29, 7  ;;  %v3148_v29 = vrot.slane %v6991_v19, 7 }
 0x6fe   :  { %v5202_v58 = vpop.eup %5201  ;;  %5227 = vrcp.f32 %v3060_v36  ;;  %v3110_v49 = vadd.f32 1.0, %v5200_v59  ;;  %v3145_v59 = vrot.slane %v6980_v43, 7 }
 0x6ff   :  { %v5204_v45 = vpop.eup %5203  ;;  %v3111_v21 = vadd.f32 1.0, %v5202_v58  ;;  %5229 = vrcp.f32 %v3109_v22 }
 0x700   :  { %v5206_v18 = vpop.eup %5205  ;;  %v3112_v1 = vadd.f32 1.0, %v5204_v45  ;;  %5231 = vrcp.f32 %v3110_v49  ;;  %v3166_v45 = vmul.f32 %v7126_v51, %v7093_v20  ;;  %v3169_v20 = vmul.f32 %v7133_v37, %v7105_v62 }
 0x701   :  { %v5208_v50 = vpop.eup %5207  ;;  %v3113_v55 = vadd.f32 1.0, %v5206_v18  ;;  %5233 = vrcp.f32 %v3111_v21  ;;  %v3146_v18 = vrot.slane %v6985_v63, 7  ;;  %v3167_v63 = vmul.f32 %v7129_v30, %v7097_v41 }
 0x702   :  { %v5210_v32 = vpop.eup %5209  ;;  %v3114_v31 = vadd.f32 1.0, %v5208_v50  ;;  %5235 = vrcp.f32 %v3112_v1  ;;  %v3170_v30 = vmul.f32 %v7119_v28, %v7108_v17 }
 0x703   :  { %v5212_v13 = vpop.eup %5211  ;;  %v3115_v24 = vadd.f32 1.0, %v5210_v32  ;;  %5237 = vrcp.f32 %v3113_v55  ;;  %v3168_v55 = vmul.f32 %v7131_v53, %v7101_v5 }
 0x704   :  { %v5214_v36 = vpop.eup %5213  ;;  %v3116_v22 = vadd.f32 1.0, %v5212_v13  ;;  %5239 = vrcp.f32 %v3114_v31  ;;  %v3171_v31 = vmul.f32 %v7135_v7, %v7112_v9  ;;  %v3172_v13 = vmul.f32 %v7137_v15, %v7116_v39 }
 0x705   :  { %v5216_v58 = vpop.eup %5215  ;;  %v3157_v49 = vmul.f32 %v5214_v36, %v3141_v4  ;;  %5241 = vrcp.f32 %v3115_v24 }
 0x706   :  { %v5218_v48 = vpop.eup %5217  ;;  %v3158_v21 = vmul.f32 %v5216_v58, %v3142_v60  ;;  %5243 = vrcp.f32 %v3116_v22 }
 0x707   :  { %v5220_v43 = vpop.eup %5219  ;;  %v3159_v1 = vmul.f32 %v5218_v48, %v3143_v2  ;;  %v7153_v50 = vadd.f32 %v3165_v16, %v3157_v49 }
 0x708   :  { %v5222_v61 = vpop.eup %5221  ;;  %v7157_v14 = vadd.f32 %v3166_v45, %v3158_v21  ;;  %v3160_v19 = vmul.f32 %v5220_v43, %v3144_v11 }
 0x709   :  { %v5224_v8 = vpop.eup %5223  ;;  %v3161_v51 = vmul.f32 %v5222_v61, %v3145_v59  ;;  %v7161_v32 = vadd.f32 %v3167_v63, %v3159_v1  ;;  %5245 = vtanh.f32 %v7153_v50 }
 0x70a   :  { %v5226_v41 = vpop.eup %5225  ;;  %v3162_v4 = vmul.f32 %v5224_v8, %v3146_v18  ;;  %v7166_v60 = vadd.f32 %v3168_v55, %v3160_v19  ;;  %5247 = vtanh.f32 %v7157_v14 }
 0x70b   :  { %v5228_v5 = vpop.eup %5227  ;;  %v3163_v53 = vmul.f32 %v5226_v41, %v3147_v56  ;;  %v7171_v62 = vadd.f32 %v3169_v20, %v3161_v51  ;;  %5249 = vtanh.f32 %v7161_v32 }
 0x70c   :  { %v3164_v37 = vmul.f32 %v5228_v5, %v3148_v29  ;;  %v7176_v11 = vadd.f32 %v3170_v30, %v3162_v4  ;;  %5251 = vtanh.f32 %v7166_v60  ;;  %v5230_v28 = vpop.eup %5229 }
 0x70d   :  { %v7179_v17 = vadd.f32 %v3171_v31, %v3163_v53  ;;  %5253 = vtanh.f32 %v7171_v62  ;;  %v5232_v9 = vpop.eup %5231 }
 0x70e   :  { %v7182_v2 = vadd.f32 %v3172_v13, %v3164_v37  ;;  %5255 = vtanh.f32 %v7176_v11  ;;  %v5234_v7 = vpop.eup %5233 }
 0x70f   :  { %5257 = vtanh.f32 %v7179_v17  ;;  %v5236_v39 = vpop.eup %5235 }
 0x710   :  { %5259 = vtanh.f32 %v7182_v2  ;;  %v5238_v15 = vpop.eup %5237 }
 0x711   :  { %v5240_v24 = vpop.eup %5239 }
 0x712   :  { %v5242_v36 = vpop.eup %5241 }
 0x713   :  { %v5244_v59 = vpop.eup %5243 }
 0x716   :  { %v5246_v18 = vpop.eup %5245 }
 0x717   :  { %v5248_v22 = vpop.eup %5247  ;;  %v3189_v58 = vmul.f32 %v5246_v18, %v5230_v28 }
 0x718   :  { %v5250_v56 = vpop.eup %5249  ;;  %v3190_v16 = vmul.f32 %v5248_v22, %v5232_v9 }
 0x719   :  { %v5252_v49 = vpop.eup %5251  ;;  %v3191_v48 = vmul.f32 %v5250_v56, %v5234_v7  ;;  %v3197_v29 = vpack.c.bf16 %v3189_v58, %v3189_v58 }
 0x71a   :  { %v5254_v45 = vpop.eup %5253  ;;  %v3192_v21 = vmul.f32 %v5252_v49, %v5236_v39  ;;  %v3198_v43 = vpack.c.bf16 %v3190_v16, %v3190_v16 }
 0x71b   :  { %v5256_v63 = vpop.eup %5255  ;;  %v3193_v1 = vmul.f32 %v5254_v45, %v5238_v15  ;;  %v3199_v61 = vpack.c.bf16 %v3191_v48, %v3191_v48  ;;  %v3213_v55 = vunpack.c.l.b16 %v3197_v29 }
 0x71c   :  { %v5258_v19 = vpop.eup %5257  ;;  %v3194_v8 = vmul.f32 %v5256_v63, %v5240_v24  ;;  %v3200_v20 = vpack.c.bf16 %v3192_v21, %v3192_v21  ;;  %v3214_v51 = vunpack.c.l.b16 %v3198_v43 }
 0x71d   :  { %v5260_v41 = vpop.eup %5259  ;;  %v3195_v30 = vmul.f32 %v5258_v19, %v5242_v36  ;;  %v3201_v4 = vpack.c.bf16 %v3193_v1, %v3193_v1  ;;  %v3215_v5 = vunpack.c.l.b16 %v3199_v61  ;;  %v3221_v53 = vrot.slane %v3213_v55, 5  ;;  %v5604_v1 = vld [vmem:[#allocation7 + $0x48] ss:$16 sps:$4 sm:$0xff]   ;;  %v5605_v61 = vld [vmem:[#allocation7 + $0x24] ss:$16 sps:$4 sm:$0xff]  }
 0x71e   :  { %v3196_v31 = vmul.f32 %v5260_v41, %v5244_v59  ;;  %v3202_v37 = vpack.c.bf16 %v3194_v8, %v3194_v8  ;;  %v3216_v13 = vunpack.c.l.b16 %v3200_v20  ;;  %v3222_v28 = vrot.slane %v3214_v51, 4  ;;  %v5606_v55 = vld [vmem:[#allocation7 + $0x2c] ss:$16 sps:$4 sm:$0xff]   ;;  %v5607_v19 = vld [vmem:[#allocation7 + $0x20] ss:$16 sps:$4 sm:$0xff]  }
 0x71f   :  { %v3203_v9 = vpack.c.bf16 %v3195_v30, %v3195_v30  ;;  %v3217_v7 = vunpack.c.l.b16 %v3201_v4  ;;  %v3224_v39 = vrot.slane %v3215_v5, 3  ;;  %v5608_v8 = vld [vmem:[#allocation7 + $0x28] ss:$16 sps:$4 sm:$0xff]   ;;  %v5609_v20 = vld [vmem:[#allocation7 + $0x4] ss:$16 sps:$4 sm:$0xff]  }
 0x720   :  { %v3204_v18 = vpack.c.bf16 %v3196_v31, %v3196_v31  ;;  %v3223_v15 = vsel %vm1045_vm0, %v3222_v28, %v3221_v53  ;;  %v3226_v22 = vrot.slane %v3216_v13, 2  ;;  %v3218_v16 = vunpack.c.l.b16 %v3202_v37  ;;  %v5610_v51 = vld [vmem:[#allocation7 + $0xc] ss:$16 sps:$4 sm:$0xff]   ;;  %v5611_v41 = vld [vmem:[#allocation7] ss:$16 sps:$4 sm:$0xff]  }
 0x721   :  { %v3219_v58 = vunpack.c.l.b16 %v3203_v9  ;;  %v3225_v24 = vsel %vm1048_vm1, %v3224_v39, %v3223_v15  ;;  %v3228_v56 = vrot.slane %v3217_v7, 1  ;;  %v5612_v30 = vld [vmem:[#allocation7 + $0x8] ss:$16 sps:$4 sm:$0xff]  }
 0x722   :  { %v3220_v36 = vunpack.c.l.b16 %v3204_v18  ;;  %v3227_v49 = vsel %vm1051_vm2, %v3226_v22, %v3225_v24 }
 0x723   :  { %v3229_v59 = vsel %vm1054_vm3, %v3228_v56, %v3227_v49  ;;  %v3231_v48 = vrot.slane %v3219_v58, 7 }
 0x724   :  { %v3230_v29 = vsel %vm1057_vm4, %v3218_v16, %v3229_v59  ;;  %v3233_v45 = vrot.slane %v3220_v36, 6 }
 0x725   :  { %v3232_v21 = vsel %vm1060_vm5, %v3231_v48, %v3230_v29 }
 0x726   :  { %v3234_v43 = vsel %vm1063_vm6, %v3233_v45, %v3232_v21 }
 0x727   :  { %v3235_v63 = vpack.c.b16 %v3234_v43, %v3234_v43 }
 0x729   :  { %3270 = vmatmul.mubr.bf16.vlgmr.msra.gmra.mxu0 %v3235_v63  ;;  %3311 = vmatmul.mubr.bf16.vlgmr.msra.gmra.mxu1 %v3235_v63 }
 0x72a   :  { %3672 = vmatpush1.bf16.msra.mxu0 %v7003_v34  ;;  %3713 = vmatpush1.bf16.msra.mxu1 %v7006_v23  ;;  %v5593_v34 = vld [vmem:[#allocation7 + $0x84] ss:$16 sps:$4 sm:$0xff]   ;;  %v5594_v23 = vld [vmem:[#allocation7 + $0x8c] ss:$16 sps:$4 sm:$0xff]  }
 0x72b   :  { %3673 = vmatprep.subr.bf16.mxu0 %v7009_v42  ;;  %3714 = vmatprep.subr.bf16.mxu1 %v7012_v54  ;;  %v5595_v42 = vld [vmem:[#allocation7 + $0x80] ss:$16 sps:$4 sm:$0xff]   ;;  %v5596_v54 = vld [vmem:[#allocation7 + $0x88] ss:$16 sps:$4 sm:$0xff]  }
 0x72c   :  { %3703 = vmatprep.mubr.bf16.mxu0 %v7613_v25  ;;  %3744 = vmatprep.mubr.bf16.mxu1 %v7613_v25  ;;  %v5597_v25 = vld [vmem:[#allocation7 + $0x64] ss:$16 sps:$4 sm:$0xff]  }
 0x72e   :  { %3674 = vmatpush1.bf16.msra.mxu0 %v7017_v10  ;;  %3715 = vmatpush1.bf16.msra.mxu1 %v7020_v33  ;;  %v5598_v10 = vld [vmem:[#allocation7 + $0x6c] ss:$16 sps:$4 sm:$0xff]   ;;  %v5599_v33 = vld [vmem:[#allocation7 + $0x60] ss:$16 sps:$4 sm:$0xff]  }
 0x72f   :  { %3675 = vmatprep.subr.bf16.mxu0 %v7023_v35  ;;  %3716 = vmatprep.subr.bf16.mxu1 %v7026_v3  ;;  %v5600_v35 = vld [vmem:[#allocation7 + $0x68] ss:$16 sps:$4 sm:$0xff]   ;;  %v5601_v3 = vld [vmem:[#allocation7 + $0x44] ss:$16 sps:$4 sm:$0xff]  }
 0x732   :  { %3676 = vmatpush1.bf16.msra.mxu0 %v7029_v44  ;;  %3717 = vmatpush1.bf16.msra.mxu1 %v7032_v38  ;;  %v5602_v44 = vld [vmem:[#allocation7 + $0x4c] ss:$16 sps:$4 sm:$0xff]   ;;  %v5603_v38 = vld [vmem:[#allocation7 + $0x40] ss:$16 sps:$4 sm:$0xff]  }
 0x733   :  { %3677 = vmatprep.subr.bf16.mxu0 %v5593_v34  ;;  %3718 = vmatprep.subr.bf16.mxu1 %v5594_v23 }
 0x736   :  { %3678 = vmatpush1.bf16.msra.mxu0 %v5595_v42  ;;  %3719 = vmatpush1.bf16.msra.mxu1 %v5596_v54 }
 0x737   :  { %3679 = vmatprep.subr.bf16.mxu0 %v5597_v25  ;;  %3720 = vmatprep.subr.bf16.mxu1 %v5598_v10 }
 0x73a   :  { %3680 = vmatpush1.bf16.msra.mxu0 %v5599_v33  ;;  %3721 = vmatpush1.bf16.msra.mxu1 %v5600_v35 }
 0x73b   :  { %3681 = vmatprep.subr.bf16.mxu0 %v5601_v3  ;;  %3722 = vmatprep.subr.bf16.mxu1 %v5602_v44 }
 0x73e   :  { %3682 = vmatpush1.bf16.msra.mxu0 %v5603_v38  ;;  %3723 = vmatpush1.bf16.msra.mxu1 %v5604_v1 }
 0x73f   :  { %3683 = vmatprep.subr.bf16.mxu0 %v5605_v61  ;;  %3724 = vmatprep.subr.bf16.mxu1 %v5606_v55  ;;  %v7754_v55 = vld [vmem:[#allocation34_spill] sm:$0xff] }
 0x742   :  { %3684 = vmatpush1.bf16.msra.mxu0 %v5607_v19  ;;  %3725 = vmatpush1.bf16.msra.mxu1 %v5608_v8 }
 0x743   :  { %3685 = vmatprep.subr.bf16.mxu0 %v5609_v20  ;;  %3726 = vmatprep.subr.bf16.mxu1 %v5610_v51  ;;  %v7755_v20 = vld [vmem:[#allocation35_spill] sm:$0xff] }
 0x746   :  { %3686 = vmatpush1.bf16.msra.mxu0 %v5611_v41  ;;  %3727 = vmatpush1.bf16.msra.mxu1 %v5612_v30  ;;  %v7756_v41 = vld [vmem:[#allocation36_spill] sm:$0xff] }
 0x7e9   :  { %v3271_v4 = vpop.f32.mrf.mxu0  ;;  %v3312_v5 = vpop.f32.mrf.mxu1 }
 0x7ea   :  { %v3323_v53 = vrot.slane %v3271_v4, 2  ;;  %v3327_v31 = vrot.slane %v3271_v4, 3  ;;  %v3331_v37 = vrot.slane %v3271_v4, 4  ;;  %v3335_v13 = vrot.slane %v3271_v4, 5 }
 0x7eb   :  { %v3339_v28 = vrot.slane %v3271_v4, 6  ;;  %v3343_v9 = vrot.slane %v3271_v4, 7  ;;  %v3347_v7 = vrot.slane %v3271_v4, 1  ;;  %v3407_v39 = vadd.f32 %v3271_v4, %v7728_v27  ;;  %v7207_v18 = vpop.f32.mrf.mxu0  ;;  %v7209_v15 = vpop.f32.mrf.mxu1  ;;  %v7757_v4 = vld [vmem:[#allocation37_spill] sm:$0xff] }
 0x7ec   :  { %v3383_v22 = vadd.f32 %v3323_v53, %v7723_v26  ;;  %v3387_v58 = vadd.f32 %v3327_v31, %v7724_v40  ;;  %v3391_v24 = vadd.f32 %v3331_v37, %v7725_v57  ;;  %v3395_v56 = vadd.f32 %v3335_v13, %v7726_v12  ;;  %v7758_v31 = vld [vmem:[#allocation38_spill] sm:$0xff]  ;;  %v7759_v13 = vld [vmem:[#allocation39_spill] sm:$0xff] }
 0x7ed   :  { %v3399_v16 = vadd.f32 %v3339_v28, %v7727_v46  ;;  %v3403_v36 = vadd.f32 %v3343_v9, %v7722_v47  ;;  %v4342_v49 = vmul.f32 -1.442695, %v3407_v39  ;;  %v3275_v59 = vpop.f32.mrf.mxu0  ;;  %v3316_v48 = vpop.f32.mrf.mxu1  ;;  %v3411_v29 = vadd.f32 %v3347_v7, %v7729_v6 }
 0x7ee   :  { %v4336_v45 = vmul.f32 -1.442695, %v3383_v22  ;;  %v4337_v21 = vmul.f32 -1.442695, %v3387_v58  ;;  %v4338_v43 = vmul.f32 -1.442695, %v3391_v24  ;;  %v3409_v37 = vadd.f32 %v3312_v5, %v7758_v31 }
 0x7ef   :  { %v4339_v63 = vmul.f32 -1.442695, %v3395_v56  ;;  %5261 = vpow2.f32 %v4342_v49  ;;  %v3276_v34 = vpop.f32.mrf.mxu0  ;;  %v3317_v23 = vpop.f32.mrf.mxu1  ;;  %v4340_v42 = vmul.f32 -1.442695, %v3399_v16  ;;  %v3325_v54 = vrot.slane %v3312_v5, 2 }
 0x7f0   :  { %5263 = vpow2.f32 %v4336_v45  ;;  %v3329_v25 = vrot.slane %v3312_v5, 3  ;;  %v4341_v10 = vmul.f32 -1.442695, %v3403_v36  ;;  %v3333_v33 = vrot.slane %v3312_v5, 4  ;;  %v7761_v34 = vld [vmem:[#allocation40_spill] sm:$0xff] }
 0x7f1   :  { %5265 = vpow2.f32 %v4337_v21  ;;  %v4343_v35 = vmul.f32 -1.442695, %v3411_v29  ;;  %v3337_v3 = vrot.slane %v3312_v5, 5  ;;  %v3341_v44 = vrot.slane %v3312_v5, 6  ;;  %v7760_v29 = vld [vmem:[#allocation31_spill] sm:$0xff] }
 0x7f2   :  { %5267 = vpow2.f32 %v4338_v43  ;;  %v3385_v38 = vadd.f32 %v3325_v54, %v7730_v52  ;;  %v3345_v1 = vrot.slane %v3312_v5, 7  ;;  %v3389_v61 = vadd.f32 %v3329_v25, %v7731_v0  ;;  %v7762_v25 = vld [vmem:[#allocation42_spill] sm:$0xff] }
 0x7f3   :  { %5269 = vpow2.f32 %v4339_v63  ;;  %v3393_v19 = vadd.f32 %v3333_v33, %v7754_v55  ;;  %v3349_v8 = vrot.slane %v3312_v5, 1  ;;  %v3397_v51 = vadd.f32 %v3337_v3, %v7755_v20  ;;  %v7763_v33 = vld [vmem:[#allocation44_spill] sm:$0xff] }
 0x7f4   :  { %5271 = vpow2.f32 %v4340_v42  ;;  %v3401_v30 = vadd.f32 %v3341_v44, %v7756_v41  ;;  %v3405_v53 = vadd.f32 %v3345_v1, %v7757_v4  ;;  %v3324_v9 = vrot.slane %v7207_v18, 2 }
 0x7f5   :  { %5273 = vpow2.f32 %v4341_v10  ;;  %v3413_v28 = vadd.f32 %v3349_v8, %v7759_v13  ;;  %v3328_v39 = vrot.slane %v7207_v18, 3  ;;  %v3332_v24 = vrot.slane %v7207_v18, 4 }
 0x7f6   :  { %5275 = vpow2.f32 %v4343_v35  ;;  %v3336_v56 = vrot.slane %v7207_v18, 5  ;;  %v3340_v36 = vrot.slane %v7207_v18, 6  ;;  %v3344_v49 = vrot.slane %v7207_v18, 7 }
 0x7f7   :  { %5277 = vtanh.f32 %v3385_v38  ;;  %v3384_v45 = vadd.f32 %v3324_v9, %v7760_v29  ;;  %v3348_v63 = vrot.slane %v7207_v18, 1  ;;  %v3388_v23 = vadd.f32 %v3328_v39, %v7761_v34  ;;  %v7764_v38 = vld [vmem:[#allocation46_spill] sm:$0xff] }
 0x7f8   :  { %5279 = vtanh.f32 %v3389_v61  ;;  %v3392_v10 = vadd.f32 %v3332_v24, %v7762_v25  ;;  %v3396_v35 = vadd.f32 %v3336_v56, %v7763_v33  ;;  %v3400_v1 = vadd.f32 %v3340_v36, %v7764_v38  ;;  %v7765_v61 = vld [vmem:[#allocation48_spill] sm:$0xff] }
 0x7f9   :  { %5281 = vtanh.f32 %v3393_v19  ;;  %v3404_v19 = vadd.f32 %v3344_v49, %v7765_v61  ;;  %v4345_v9 = vmul.f32 -1.442695, %v3388_v23  ;;  %v3334_v56 = vrot.slane %v7209_v15, 4 }
 0x7fa   :  { %5283 = vtanh.f32 %v3397_v51  ;;  %v4346_v24 = vmul.f32 -1.442695, %v3392_v10  ;;  %v4347_v49 = vmul.f32 -1.442695, %v3396_v35  ;;  %v7769_v10 = vld [vmem:[#allocation41_spill] sm:$0xff] }
 0x7fb   :  { %5285 = vtanh.f32 %v3401_v30  ;;  %v4344_v30 = vmul.f32 -1.442695, %v3384_v45  ;;  %v4348_v45 = vmul.f32 -1.442695, %v3400_v1 }
 0x7fc   :  { %v5262_v7 = vpop.eup %5261  ;;  %5287 = vtanh.f32 %v3405_v53  ;;  %v3326_v53 = vrot.slane %v7209_v15, 2 }
 0x7fd   :  { %v5264_v22 = vpop.eup %5263  ;;  %v3445_v58 = vadd.f32 1.0, %v5262_v7  ;;  %5289 = vtanh.f32 %v3409_v37  ;;  %v3330_v7 = vrot.slane %v7209_v15, 3 }
 0x7fe   :  { %v5266_v16 = vpop.eup %5265  ;;  %v3439_v5 = vadd.f32 1.0, %v5264_v22  ;;  %5291 = vtanh.f32 %v3413_v28  ;;  %v7766_v22 = vld [vmem:[#allocation50_spill] sm:$0xff] }
 0x7ff   :  { %v5268_v59 = vpop.eup %5267  ;;  %v3440_v48 = vadd.f32 1.0, %v5266_v16  ;;  %5293 = vrcp.f32 %v3445_v58  ;;  %v3408_v58 = vadd.f32 %v7207_v18, %v7766_v22 }
 0x800   :  { %v5270_v21 = vpop.eup %5269  ;;  %v3441_v43 = vadd.f32 1.0, %v5268_v59  ;;  %5295 = vrcp.f32 %v3439_v5  ;;  %v7767_v5 = vld [vmem:[#allocation52_spill] sm:$0xff]  ;;  %v3338_v59 = vrot.slane %v7209_v15, 5 }
 0x801   :  { %v5272_v42 = vpop.eup %5271  ;;  %v3442_v54 = vadd.f32 1.0, %v5270_v21  ;;  %5297 = vrcp.f32 %v3440_v48  ;;  %v3412_v36 = vadd.f32 %v3348_v63, %v7767_v5  ;;  %v3342_v21 = vrot.slane %v7209_v15, 6 }
 0x802   :  { %v5274_v3 = vpop.eup %5273  ;;  %v3443_v44 = vadd.f32 1.0, %v5272_v42  ;;  %5299 = vrcp.f32 %v3441_v43  ;;  %v7768_v43 = vld [vmem:[#allocation32_spill] sm:$0xff]  ;;  %v4349_v42 = vmul.f32 -1.442695, %v3404_v19  ;;  %v4350_v35 = vmul.f32 -1.442695, %v3408_v58 }
 0x803   :  { %v5276_v8 = vpop.eup %5275  ;;  %v3444_v51 = vadd.f32 1.0, %v5274_v3  ;;  %5301 = vrcp.f32 %v3442_v54  ;;  %v3386_v23 = vadd.f32 %v3326_v53, %v7768_v43  ;;  %v3346_v54 = vrot.slane %v7209_v15, 7  ;;  %v7771_v53 = vld [vmem:[#allocation45_spill] sm:$0xff]  ;;  %v7772_v19 = vld [vmem:[#allocation47_spill] sm:$0xff] }
 0x804   :  { %v7240_v37 = vpop.eup %5277  ;;  %v3446_v28 = vadd.f32 1.0, %v5276_v8  ;;  %5303 = vrcp.f32 %v3443_v44  ;;  %v3390_v3 = vadd.f32 %v3330_v7, %v7769_v10  ;;  %v7770_v44 = vld [vmem:[#allocation43_spill] sm:$0xff]  ;;  %v4351_v1 = vmul.f32 -1.442695, %v3412_v36  ;;  %v7773_v58 = vld [vmem:[#allocation49_spill] sm:$0xff] }
 0x805   :  { %v7243_v39 = vpop.eup %5279  ;;  %5305 = vrcp.f32 %v3444_v51  ;;  %v3394_v8 = vadd.f32 %v3334_v56, %v7770_v44  ;;  %v3402_v43 = vadd.f32 %v3342_v21, %v7772_v19  ;;  %v4352_v7 = vmul.f32 -1.442695, %v3386_v23  ;;  %v7774_v36 = vld [vmem:[#allocation51_spill] sm:$0xff] }
 0x806   :  { %v7248_v16 = vpop.eup %5281  ;;  %5307 = vrcp.f32 %v3446_v28  ;;  %v3398_v28 = vadd.f32 %v3338_v59, %v7771_v53  ;;  %v4353_v56 = vmul.f32 -1.442695, %v3390_v3 }
 0x807   :  { %v7252_v48 = vpop.eup %5283  ;;  %5309 = vpow2.f32 %v4344_v30  ;;  %v3350_v30 = vrot.slane %v7209_v15, 1  ;;  %v4354_v5 = vmul.f32 -1.442695, %v3394_v8 }
 0x808   :  { %v7256_v18 = vpop.eup %5285  ;;  %5311 = vpow2.f32 %v4345_v9  ;;  %v4355_v21 = vmul.f32 -1.442695, %v3398_v28 }
 0x809   :  { %v7260_v63 = vpop.eup %5287  ;;  %5313 = vpow2.f32 %v4346_v24  ;;  %v3406_v24 = vadd.f32 %v3346_v54, %v7773_v58 }
 0x80a   :  { %v7263_v51 = vpop.eup %5289  ;;  %5315 = vpow2.f32 %v4347_v49  ;;  %v3410_v49 = vadd.f32 %v7209_v15, %v7774_v36 }
 0x80b   :  { %v7267_v9 = vpop.eup %5291  ;;  %5317 = vpow2.f32 %v4348_v45  ;;  %v7775_v45 = vld [vmem:[#allocation53_spill] sm:$0xff]  ;;  %v4357_v54 = vmul.f32 -1.442695, %v3406_v24 }
 0x80c   :  { %v7270_v10 = vpop.eup %5293  ;;  %5319 = vpow2.f32 %v4349_v42  ;;  %v3414_v53 = vadd.f32 %v3350_v30, %v7775_v45  ;;  %v4356_v42 = vmul.f32 -1.442695, %v3402_v43 }
 0x80d   :  { %v7273_v44 = vpop.eup %5295  ;;  %5321 = vpow2.f32 %v4350_v35  ;;  %v4358_v35 = vmul.f32 -1.442695, %v3410_v49 }
 0x80e   :  { %v7277_v59 = vpop.eup %5297  ;;  %5323 = vpow2.f32 %v4351_v1  ;;  %v4359_v8 = vmul.f32 -1.442695, %v3414_v53 }
 0x80f   :  { %v7280_v23 = vpop.eup %5299  ;;  %5325 = vpow2.f32 %v4352_v7 }
 0x810   :  { %v7282_v19 = vpop.eup %5301  ;;  %5327 = vpow2.f32 %v4353_v56 }
 0x811   :  { %v7284_v3 = vpop.eup %5303  ;;  %5329 = vpow2.f32 %v4354_v5 }
 0x812   :  { %v7286_v15 = vpop.eup %5305  ;;  %5331 = vpow2.f32 %v4355_v21 }
 0x813   :  { %v7288_v1 = vpop.eup %5307  ;;  %5333 = vpow2.f32 %v4356_v42 }
 0x814   :  { %v5310_v30 = vpop.eup %5309  ;;  %5335 = vpow2.f32 %v4357_v54 }
 0x815   :  { %v5312_v28 = vpop.eup %5311  ;;  %v3487_v7 = vadd.f32 1.0, %v5310_v30  ;;  %5337 = vpow2.f32 %v4358_v35 }
 0x816   :  { %v5314_v43 = vpop.eup %5313  ;;  %v3488_v45 = vadd.f32 1.0, %v5312_v28  ;;  %5339 = vpow2.f32 %v4359_v8 }
 0x817   :  { %v5316_v24 = vpop.eup %5315  ;;  %v3489_v56 = vadd.f32 1.0, %v5314_v43  ;;  %5341 = vrcp.f32 %v3487_v7 }
 0x818   :  { %v5318_v5 = vpop.eup %5317  ;;  %v3490_v49 = vadd.f32 1.0, %v5316_v24  ;;  %5343 = vrcp.f32 %v3488_v45 }
 0x819   :  { %v5320_v36 = vpop.eup %5319  ;;  %v3491_v21 = vadd.f32 1.0, %v5318_v5  ;;  %5345 = vrcp.f32 %v3489_v56 }
 0x81a   :  { %v5322_v53 = vpop.eup %5321  ;;  %v3492_v58 = vadd.f32 1.0, %v5320_v36  ;;  %5347 = vrcp.f32 %v3490_v49  ;;  %v3575_v49 = vrot.slane %v7153_v50, 7  ;;  %v3581_v50 = vrot.slane %v7179_v17, 7 }
 0x81b   :  { %v5324_v42 = vpop.eup %5323  ;;  %v3493_v54 = vadd.f32 1.0, %v5322_v53  ;;  %5349 = vrcp.f32 %v3491_v21  ;;  %v3576_v21 = vrot.slane %v7157_v14, 7  ;;  %v3599_v14 = vmul.f32 %v7273_v44, %v7240_v37 }
 0x81c   :  { %v5326_v30 = vpop.eup %5325  ;;  %v3494_v35 = vadd.f32 1.0, %v5324_v42  ;;  %5351 = vrcp.f32 %v3492_v58  ;;  %v3578_v42 = vrot.slane %v7166_v60, 7 }
 0x81d   :  { %v5328_v28 = vpop.eup %5327  ;;  %5353 = vrcp.f32 %v3493_v54  ;;  %v3543_v8 = vadd.f32 1.0, %v5326_v30  ;;  %v3577_v54 = vrot.slane %v7161_v32, 7  ;;  %v3582_v32 = vrot.slane %v7182_v2, 7 }
 0x81e   :  { %v5330_v43 = vpop.eup %5329  ;;  %5355 = vrcp.f32 %v3494_v35  ;;  %v3544_v7 = vadd.f32 1.0, %v5328_v28  ;;  %v3579_v28 = vrot.slane %v7171_v62, 7 }
 0x81f   :  { %v5332_v24 = vpop.eup %5331  ;;  %v3545_v45 = vadd.f32 1.0, %v5330_v43  ;;  %5357 = vrcp.f32 %v3543_v8 }
 0x820   :  { %v5334_v22 = vpop.eup %5333  ;;  %v3546_v5 = vadd.f32 1.0, %v5332_v24  ;;  %5359 = vrcp.f32 %v3544_v7  ;;  %v3600_v24 = vmul.f32 %v7277_v59, %v7243_v39  ;;  %v3603_v39 = vmul.f32 %v7284_v3, %v7256_v18 }
 0x821   :  { %v5336_v56 = vpop.eup %5335  ;;  %v3547_v61 = vadd.f32 1.0, %v5334_v22  ;;  %5361 = vrcp.f32 %v3545_v45  ;;  %v3580_v22 = vrot.slane %v7176_v11, 7  ;;  %v3601_v11 = vmul.f32 %v7280_v23, %v7248_v16 }
 0x822   :  { %v5338_v36 = vpop.eup %5337  ;;  %v3548_v53 = vadd.f32 1.0, %v5336_v56  ;;  %5363 = vrcp.f32 %v3546_v5 }
 0x823   :  { %v5340_v58 = vpop.eup %5339  ;;  %v3549_v30 = vadd.f32 1.0, %v5338_v36  ;;  %5365 = vrcp.f32 %v3547_v61  ;;  %v3602_v61 = vmul.f32 %v7282_v19, %v7252_v48 }
 0x824   :  { %v5342_v35 = vpop.eup %5341  ;;  %v3550_v8 = vadd.f32 1.0, %v5340_v58  ;;  %5367 = vrcp.f32 %v3548_v53  ;;  %v3605_v53 = vmul.f32 %v7270_v10, %v7263_v51  ;;  %v3606_v58 = vmul.f32 %v7288_v1, %v7267_v9 }
 0x825   :  { %v5344_v43 = vpop.eup %5343  ;;  %v3591_v7 = vmul.f32 %v5342_v35, %v3575_v49  ;;  %5369 = vrcp.f32 %v3549_v30  ;;  %v3604_v49 = vmul.f32 %v7286_v15, %v7260_v63 }
 0x826   :  { %v5346_v60 = vpop.eup %5345  ;;  %v3592_v45 = vmul.f32 %v5344_v43, %v3576_v21  ;;  %5371 = vrcp.f32 %v3550_v8 }
 0x827   :  { %v5348_v62 = vpop.eup %5347  ;;  %v3593_v5 = vmul.f32 %v5346_v60, %v3577_v54  ;;  %v7304_v56 = vadd.f32 %v3599_v14, %v3591_v7 }
 0x828   :  { %v5350_v17 = vpop.eup %5349  ;;  %v7308_v37 = vadd.f32 %v3600_v24, %v3592_v45  ;;  %v3594_v2 = vmul.f32 %v5348_v62, %v3578_v42 }
 0x829   :  { %v5352_v44 = vpop.eup %5351  ;;  %v3595_v59 = vmul.f32 %v5350_v17, %v3579_v28  ;;  %v7312_v36 = vadd.f32 %v3601_v11, %v3593_v5  ;;  %5373 = vtanh.f32 %v7304_v56 }
 0x82a   :  { %v5354_v16 = vpop.eup %5353  ;;  %v3596_v23 = vmul.f32 %v5352_v44, %v3580_v22  ;;  %v7317_v21 = vadd.f32 %v3602_v61, %v3594_v2  ;;  %5375 = vtanh.f32 %v7308_v37 }
 0x82b   :  { %v5356_v48 = vpop.eup %5355  ;;  %v3597_v19 = vmul.f32 %v5354_v16, %v3581_v50  ;;  %v7322_v18 = vadd.f32 %v3603_v39, %v3595_v59  ;;  %5377 = vtanh.f32 %v7312_v36 }
 0x82c   :  { %v3598_v3 = vmul.f32 %v5356_v48, %v3582_v32  ;;  %v7327_v42 = vadd.f32 %v3604_v49, %v3596_v23  ;;  %5379 = vtanh.f32 %v7317_v21  ;;  %v5358_v15 = vpop.eup %5357 }
 0x82d   :  { %v7330_v63 = vadd.f32 %v3605_v53, %v3597_v19  ;;  %5381 = vtanh.f32 %v7322_v18  ;;  %v5360_v10 = vpop.eup %5359 }
 0x82e   :  { %v7333_v54 = vadd.f32 %v3606_v58, %v3598_v3  ;;  %5383 = vtanh.f32 %v7327_v42  ;;  %v5362_v51 = vpop.eup %5361 }
 0x82f   :  { %5385 = vtanh.f32 %v7330_v63  ;;  %v5364_v9 = vpop.eup %5363 }
 0x830   :  { %5387 = vtanh.f32 %v7333_v54  ;;  %v5366_v1 = vpop.eup %5365 }
 0x831   :  { %v5368_v30 = vpop.eup %5367 }
 0x832   :  { %v5370_v35 = vpop.eup %5369 }
 0x833   :  { %v5372_v28 = vpop.eup %5371 }
 0x836   :  { %v5374_v22 = vpop.eup %5373 }
 0x837   :  { %v5376_v8 = vpop.eup %5375  ;;  %v3623_v43 = vmul.f32 %v5374_v22, %v5358_v15 }
 0x838   :  { %v5378_v50 = vpop.eup %5377  ;;  %v3624_v14 = vmul.f32 %v5376_v8, %v5360_v10 }
 0x839   :  { %v5380_v7 = vpop.eup %5379  ;;  %v3625_v60 = vmul.f32 %v5378_v50, %v5362_v51  ;;  %v3631_v32 = vpack.c.bf16 %v3623_v43, %v3623_v43 }
 0x83a   :  { %v5382_v24 = vpop.eup %5381  ;;  %v3626_v45 = vmul.f32 %v5380_v7, %v5364_v9  ;;  %v3632_v62 = vpack.c.bf16 %v3624_v14, %v3624_v14 }
 0x83b   :  { %v5384_v11 = vpop.eup %5383  ;;  %v3627_v5 = vmul.f32 %v5382_v24, %v5366_v1  ;;  %v3633_v17 = vpack.c.bf16 %v3625_v60, %v3625_v60  ;;  %v3647_v61 = vunpack.c.l.b16 %v3631_v32 }
 0x83c   :  { %v5386_v2 = vpop.eup %5385  ;;  %v3628_v44 = vmul.f32 %v5384_v11, %v5368_v30  ;;  %v3634_v39 = vpack.c.bf16 %v3626_v45, %v3626_v45  ;;  %v3648_v59 = vunpack.c.l.b16 %v3632_v62 }
 0x83d   :  { %v5388_v16 = vpop.eup %5387  ;;  %v3629_v23 = vmul.f32 %v5386_v2, %v5370_v35  ;;  %v3635_v49 = vpack.c.bf16 %v3627_v5, %v3627_v5  ;;  %v3649_v48 = vunpack.c.l.b16 %v3633_v17  ;;  %v3655_v19 = vrot.slane %v3647_v61, 6 }
 0x83e   :  { %v3630_v53 = vmul.f32 %v5388_v16, %v5372_v28  ;;  %v3636_v3 = vpack.c.bf16 %v3628_v44, %v3628_v44  ;;  %v3650_v58 = vunpack.c.l.b16 %v3634_v39  ;;  %v3656_v15 = vrot.slane %v3648_v59, 5 }
 0x83f   :  { %v3637_v10 = vpack.c.bf16 %v3629_v23, %v3629_v23  ;;  %v3651_v51 = vunpack.c.l.b16 %v3635_v49  ;;  %v3658_v9 = vrot.slane %v3649_v48, 4 }
 0x840   :  { %v3638_v22 = vpack.c.bf16 %v3630_v53, %v3630_v53  ;;  %v3652_v1 = vunpack.c.l.b16 %v3636_v3  ;;  %v3657_v8 = vsel %vm1045_vm0, %v3656_v15, %v3655_v19  ;;  %v3660_v43 = vrot.slane %v3650_v58, 3 }
 0x841   :  { %v3659_v30 = vsel %vm1048_vm1, %v3658_v9, %v3657_v8  ;;  %v3662_v50 = vrot.slane %v3651_v51, 2  ;;  %v3653_v60 = vunpack.c.l.b16 %v3637_v10 }
 0x842   :  { %v3654_v14 = vunpack.c.l.b16 %v3638_v22  ;;  %v3661_v35 = vsel %vm1051_vm2, %v3660_v43, %v3659_v30  ;;  %v3664_v7 = vrot.slane %v3652_v1, 1 }
 0x843   :  { %v3663_v28 = vsel %vm1054_vm3, %v3662_v50, %v3661_v35 }
 0x844   :  { %v3665_v32 = vsel %vm1057_vm4, %v3664_v7, %v3663_v28  ;;  %v3667_v24 = vrot.slane %v3654_v14, 7 }
 0x845   :  { %v3666_v45 = vsel %vm1060_vm5, %v3653_v60, %v3665_v32 }
 0x846   :  { %v3668_v62 = vsel %vm1063_vm6, %v3667_v24, %v3666_v45 }
 0x847   :  { %v3669_v11 = vpack.c.b16 %v3668_v62, %v3668_v62 }
 0x849   :  { %3704 = vmatmul.mubr.bf16.vlgmr.msra.gmra.mxu0 %v3669_v11  ;;  %3745 = vmatmul.mubr.bf16.vlgmr.msra.gmra.mxu1 %v3669_v11 }
 0x909   :  { %v3705_v5 = vpop.f32.mrf.mxu0  ;;  %v3746_v17 = vpop.f32.mrf.mxu1 }
 0x90a   :  { %v3757_v61 = vrot.slane %v3705_v5, 1  ;;  %v3761_v2 = vrot.slane %v3705_v5, 2  ;;  %v3765_v44 = vrot.slane %v3705_v5, 3  ;;  %v3769_v39 = vrot.slane %v3705_v5, 4 }
 0x90b   :  { %v3773_v59 = vrot.slane %v3705_v5, 5  ;;  %v3777_v16 = vrot.slane %v3705_v5, 6  ;;  %v3781_v23 = vrot.slane %v3705_v5, 7  ;;  %v3845_v49 = vadd.f32 %v3705_v5, %v7729_v6  ;;  %v7346_v48 = vpop.f32.mrf.mxu0  ;;  %v7348_v19 = vpop.f32.mrf.mxu1 }
 0x90c   :  { %v3817_v53 = vadd.f32 %v3757_v61, %v7723_v26  ;;  %v3821_v3 = vadd.f32 %v3761_v2, %v7724_v40  ;;  %v3825_v58 = vadd.f32 %v3765_v44, %v7725_v57  ;;  %v3829_v15 = vadd.f32 %v3769_v39, %v7726_v12 }
 0x90d   :  { %v3833_v10 = vadd.f32 %v3773_v59, %v7727_v46  ;;  %v3837_v51 = vadd.f32 %v3777_v16, %v7722_v47  ;;  %v4367_v9 = vmul.f32 -1.442695, %v3845_v49  ;;  %v3709_v22 = vpop.f32.mrf.mxu0  ;;  %v3750_v1 = vpop.f32.mrf.mxu1  ;;  %v3841_v6 = vadd.f32 %v3781_v23, %v7728_v27 }
 0x90e   :  { %v4360_v8 = vmul.f32 -1.442695, %v3817_v53  ;;  %v4361_v43 = vmul.f32 -1.442695, %v3821_v3  ;;  %v4362_v30 = vmul.f32 -1.442695, %v3825_v58 }
 0x90f   :  { %v4363_v50 = vmul.f32 -1.442695, %v3829_v15  ;;  %5389 = vpow2.f32 %v4367_v9  ;;  %v3710_v26 = vpop.f32.mrf.mxu0  ;;  %v3751_v40 = vpop.f32.mrf.mxu1  ;;  %v4364_v57 = vmul.f32 -1.442695, %v3833_v10  ;;  %v3759_v14 = vrot.slane %v3746_v17, 1 }
 0x910   :  { %5391 = vpow2.f32 %v4360_v8  ;;  %v3763_v12 = vrot.slane %v3746_v17, 2  ;;  %v4365_v46 = vmul.f32 -1.442695, %v3837_v51  ;;  %v3767_v35 = vrot.slane %v3746_v17, 3 }
 0x911   :  { %5393 = vpow2.f32 %v4361_v43  ;;  %v4366_v47 = vmul.f32 -1.442695, %v3841_v6  ;;  %v3771_v7 = vrot.slane %v3746_v17, 4  ;;  %v3775_v60 = vrot.slane %v3746_v17, 5 }
 0x912   :  { %5395 = vpow2.f32 %v4362_v30  ;;  %v3819_v27 = vadd.f32 %v3759_v14, %v7730_v52  ;;  %v3779_v28 = vrot.slane %v3746_v17, 6  ;;  %v3823_v32 = vadd.f32 %v3763_v12, %v7731_v0  ;;  %v7777_v14 = vld [vmem:[#allocation50_spill] sm:$0xff] }
 0x913   :  { %5397 = vpow2.f32 %v4363_v50  ;;  %v3783_v24 = vrot.slane %v3746_v17, 7  ;;  %v3827_v45 = vadd.f32 %v3767_v35, %v7754_v55  ;;  %v3831_v62 = vadd.f32 %v3771_v7, %v7755_v20 }
 0x914   :  { %5399 = vpow2.f32 %v4364_v57  ;;  %v3835_v11 = vadd.f32 %v3775_v60, %v7756_v41  ;;  %v3839_v5 = vadd.f32 %v3779_v28, %v7757_v4  ;;  %v3847_v52 = vadd.f32 %v3746_v17, %v7759_v13 }
 0x915   :  { %5401 = vpow2.f32 %v4365_v46  ;;  %v3843_v61 = vadd.f32 %v3783_v24, %v7758_v31  ;;  %v3758_v0 = vrot.slane %v7346_v48, 1  ;;  %v3762_v55 = vrot.slane %v7346_v48, 2 }
 0x916   :  { %5403 = vpow2.f32 %v4366_v47  ;;  %v3766_v41 = vrot.slane %v7346_v48, 3  ;;  %v3770_v4 = vrot.slane %v7346_v48, 4  ;;  %v3774_v13 = vrot.slane %v7346_v48, 5  ;;  %v7778_v47 = vld [vmem:[#allocation52_spill] sm:$0xff] }
 0x917   :  { %5405 = vtanh.f32 %v3819_v27  ;;  %v3778_v17 = vrot.slane %v7346_v48, 6  ;;  %v3818_v23 = vadd.f32 %v3758_v0, %v7760_v29  ;;  %v3782_v3 = vrot.slane %v7346_v48, 7  ;;  %v7776_v29 = vld [vmem:[#allocation48_spill] sm:$0xff] }
 0x918   :  { %5407 = vtanh.f32 %v3823_v32  ;;  %v3822_v58 = vadd.f32 %v3762_v55, %v7761_v34  ;;  %v3826_v51 = vadd.f32 %v3766_v41, %v7762_v25  ;;  %v3830_v9 = vadd.f32 %v3770_v4, %v7763_v33  ;;  %v7781_v55 = vld [vmem:[#allocation45_spill] sm:$0xff] }
 0x919   :  { %5409 = vtanh.f32 %v3827_v45  ;;  %v3834_v6 = vadd.f32 %v3774_v13, %v7764_v38  ;;  %v3838_v8 = vadd.f32 %v3778_v17, %v7776_v29  ;;  %v4368_v50 = vmul.f32 -1.442695, %v3818_v23  ;;  %v7779_v45 = vld [vmem:[#allocation41_spill] sm:$0xff] }
 0x91a   :  { %5411 = vtanh.f32 %v3831_v62  ;;  %v3764_v34 = vrot.slane %v7348_v19, 2  ;;  %v4369_v25 = vmul.f32 -1.442695, %v3822_v58  ;;  %v3768_v33 = vrot.slane %v7348_v19, 3  ;;  %v7783_v17 = vld [vmem:[#allocation49_spill] sm:$0xff] }
 0x91b   :  { %5413 = vtanh.f32 %v3835_v11  ;;  %v3842_v38 = vadd.f32 %v3782_v3, %v7777_v14  ;;  %v4370_v12 = vmul.f32 -1.442695, %v3826_v51  ;;  %v3772_v46 = vrot.slane %v7348_v19, 4 }
 0x91c   :  { %v5390_v2 = vpop.eup %5389  ;;  %5415 = vtanh.f32 %v3839_v5  ;;  %v3846_v7 = vadd.f32 %v7346_v48, %v7778_v47  ;;  %v4371_v60 = vmul.f32 -1.442695, %v3830_v9  ;;  %v3776_v27 = vrot.slane %v7348_v19, 5 }
 0x91d   :  { %v5392_v20 = vpop.eup %5391  ;;  %v3880_v44 = vadd.f32 1.0, %v5390_v2  ;;  %5417 = vtanh.f32 %v3843_v61  ;;  %v4372_v32 = vmul.f32 -1.442695, %v3834_v6  ;;  %v3780_v24 = vrot.slane %v7348_v19, 6 }
 0x91e   :  { %v5394_v39 = vpop.eup %5393  ;;  %v3873_v31 = vadd.f32 1.0, %v5392_v20  ;;  %5419 = vtanh.f32 %v3847_v52  ;;  %v3824_v62 = vadd.f32 %v3764_v34, %v7779_v45  ;;  %v4373_v5 = vmul.f32 -1.442695, %v3838_v8  ;;  %v7780_v52 = vld [vmem:[#allocation43_spill] sm:$0xff] }
 0x91f   :  { %v5396_v59 = vpop.eup %5395  ;;  %v3874_v16 = vadd.f32 1.0, %v5394_v39  ;;  %5421 = vrcp.f32 %v3880_v44  ;;  %v3784_v61 = vrot.slane %v7348_v19, 7  ;;  %v3828_v0 = vadd.f32 %v3768_v33, %v7780_v52  ;;  %v7782_v39 = vld [vmem:[#allocation47_spill] sm:$0xff] }
 0x920   :  { %v5398_v49 = vpop.eup %5397  ;;  %v3875_v53 = vadd.f32 1.0, %v5396_v59  ;;  %5423 = vrcp.f32 %v3873_v31  ;;  %v4374_v2 = vmul.f32 -1.442695, %v3842_v38  ;;  %v3832_v20 = vadd.f32 %v3772_v46, %v7781_v55 }
 0x921   :  { %v5400_v15 = vpop.eup %5399  ;;  %v3876_v10 = vadd.f32 1.0, %v5398_v49  ;;  %5425 = vrcp.f32 %v3874_v16  ;;  %v4375_v41 = vmul.f32 -1.442695, %v3846_v7  ;;  %v3760_v4 = vrot.slane %v7348_v19, 1  ;;  %v7784_v49 = vld [vmem:[#allocation51_spill] sm:$0xff] }
 0x922   :  { %v5402_v22 = vpop.eup %5401  ;;  %v3877_v1 = vadd.f32 1.0, %v5400_v15  ;;  %5427 = vrcp.f32 %v3875_v53  ;;  %v3836_v31 = vadd.f32 %v3776_v27, %v7782_v39  ;;  %v3840_v59 = vadd.f32 %v3780_v24, %v7783_v17  ;;  %v7785_v15 = vld [vmem:[#allocation53_spill] sm:$0xff] }
 0x923   :  { %v5404_v43 = vpop.eup %5403  ;;  %v3878_v30 = vadd.f32 1.0, %v5402_v22  ;;  %5429 = vrcp.f32 %v3876_v10  ;;  %v4377_v16 = vmul.f32 -1.442695, %v3824_v62  ;;  %v3844_v53 = vadd.f32 %v3784_v61, %v7784_v49  ;;  %v7786_v22 = vld [vmem:[#allocation32_spill] sm:$0xff] }
 0x924   :  { %v7379_v26 = vpop.eup %5405  ;;  %v3879_v40 = vadd.f32 1.0, %v5404_v43  ;;  %5431 = vrcp.f32 %v3877_v1  ;;  %v4378_v3 = vmul.f32 -1.442695, %v3828_v0  ;;  %v3848_v10 = vadd.f32 %v7348_v19, %v7785_v15 }
 0x925   :  { %v7382_v57 = vpop.eup %5407  ;;  %5433 = vrcp.f32 %v3878_v30  ;;  %v4379_v51 = vmul.f32 -1.442695, %v3832_v20  ;;  %v3820_v1 = vadd.f32 %v3760_v4, %v7786_v22  ;;  %v4380_v6 = vmul.f32 -1.442695, %v3836_v31 }
 0x926   :  { %v7386_v35 = vpop.eup %5409  ;;  %5435 = vrcp.f32 %v3879_v40  ;;  %v4381_v8 = vmul.f32 -1.442695, %v3840_v59  ;;  %v4382_v30 = vmul.f32 -1.442695, %v3844_v53  ;;  %v4383_v34 = vmul.f32 -1.442695, %v3848_v10 }
 0x927   :  { %v7391_v28 = vpop.eup %5411  ;;  %5437 = vpow2.f32 %v4368_v50  ;;  %v4376_v40 = vmul.f32 -1.442695, %v3820_v1  ;;  %v4009_v53 = vrot.slane %v7304_v56, 7  ;;  %v4010_v15 = vrot.slane %v7308_v37, 7 }
 0x928   :  { %v7395_v11 = vpop.eup %5413  ;;  %5439 = vpow2.f32 %v4369_v25  ;;  %v4011_v22 = vrot.slane %v7312_v36, 7  ;;  %v4012_v1 = vrot.slane %v7317_v21, 7  ;;  %v4016_v36 = vrot.slane %v7333_v54, 7 }
 0x929   :  { %v7399_v48 = vpop.eup %5415  ;;  %5441 = vpow2.f32 %v4370_v12 }
 0x92a   :  { %v7402_v44 = vpop.eup %5417  ;;  %5443 = vpow2.f32 %v4371_v60 }
 0x92b   :  { %v7406_v13 = vpop.eup %5419  ;;  %5445 = vpow2.f32 %v4372_v32 }
 0x92c   :  { %v7409_v23 = vpop.eup %5421  ;;  %5447 = vpow2.f32 %v4373_v5 }
 0x92d   :  { %v7412_v58 = vpop.eup %5423  ;;  %5449 = vpow2.f32 %v4374_v2 }
 0x92e   :  { %v7416_v9 = vpop.eup %5425  ;;  %5451 = vpow2.f32 %v4375_v41  ;;  %v4033_v37 = vmul.f32 %v7412_v58, %v7379_v26 }
 0x92f   :  { %v7419_v29 = vpop.eup %5427  ;;  %5453 = vpow2.f32 %v4377_v16 }
 0x930   :  { %v7421_v43 = vpop.eup %5429  ;;  %5455 = vpow2.f32 %v4378_v3 }
 0x931   :  { %v7423_v50 = vpop.eup %5431  ;;  %5457 = vpow2.f32 %v4379_v51 }
 0x932   :  { %v7425_v19 = vpop.eup %5433  ;;  %5459 = vpow2.f32 %v4380_v6 }
 0x933   :  { %v7427_v25 = vpop.eup %5435  ;;  %5461 = vpow2.f32 %v4381_v8 }
 0x934   :  { %v5438_v33 = vpop.eup %5437  ;;  %5463 = vpow2.f32 %v4382_v30  ;;  %v4013_v30 = vrot.slane %v7322_v18, 7 }
 0x935   :  { %v5440_v14 = vpop.eup %5439  ;;  %v3921_v38 = vadd.f32 1.0, %v5438_v33  ;;  %5465 = vpow2.f32 %v4383_v34  ;;  %v4014_v34 = vrot.slane %v7327_v42, 7  ;;  %v4015_v33 = vrot.slane %v7330_v63, 7 }
 0x936   :  { %v5442_v12 = vpop.eup %5441  ;;  %v3922_v46 = vadd.f32 1.0, %v5440_v14  ;;  %5467 = vpow2.f32 %v4376_v40  ;;  %v4036_v63 = vmul.f32 %v7421_v43, %v7391_v28  ;;  %v4039_v28 = vmul.f32 %v7427_v25, %v7402_v44 }
 0x937   :  { %v5444_v47 = vpop.eup %5443  ;;  %v3923_v7 = vadd.f32 1.0, %v5442_v12  ;;  %5469 = vrcp.f32 %v3921_v38  ;;  %v4034_v38 = vmul.f32 %v7416_v9, %v7382_v57  ;;  %v4037_v57 = vmul.f32 %v7423_v50, %v7395_v11 }
 0x938   :  { %v5446_v60 = vpop.eup %5445  ;;  %v3924_v27 = vadd.f32 1.0, %v5444_v47  ;;  %5471 = vrcp.f32 %v3922_v46  ;;  %v4035_v46 = vmul.f32 %v7419_v29, %v7386_v35 }
 0x939   :  { %v5448_v32 = vpop.eup %5447  ;;  %v3925_v24 = vadd.f32 1.0, %v5446_v60  ;;  %5473 = vrcp.f32 %v3923_v7 }
 0x93a   :  { %v5450_v45 = vpop.eup %5449  ;;  %v3926_v62 = vadd.f32 1.0, %v5448_v32  ;;  %5475 = vrcp.f32 %v3924_v27  ;;  %v4038_v32 = vmul.f32 %v7425_v19, %v7399_v48 }
 0x93b   :  { %v5452_v5 = vpop.eup %5451  ;;  %v3927_v61 = vadd.f32 1.0, %v5450_v45  ;;  %5477 = vrcp.f32 %v3925_v24 }
 0x93c   :  { %v5454_v52 = vpop.eup %5453  ;;  %v3928_v0 = vadd.f32 1.0, %v5452_v5  ;;  %5479 = vrcp.f32 %v3926_v62  ;;  %v4040_v62 = vmul.f32 %v7409_v23, %v7406_v13  ;;  %v4384_v23 = vld [vmem:[%s7476_s4] ss:$0 sm:$0xff] }
 0x93d   :  { %v5456_v2 = vpop.eup %5455  ;;  %5481 = vrcp.f32 %v3927_v61  ;;  %v3978_v55 = vadd.f32 1.0, %v5454_v52 }
 0x93e   :  { %v5458_v20 = vpop.eup %5457  ;;  %5483 = vrcp.f32 %v3928_v0  ;;  %v3979_v41 = vadd.f32 1.0, %v5456_v2 }
 0x93f   :  { %v5460_v4 = vpop.eup %5459  ;;  %v3980_v39 = vadd.f32 1.0, %v5458_v20  ;;  %5485 = vrcp.f32 %v3978_v55 }
 0x940   :  { %v5462_v31 = vpop.eup %5461  ;;  %v3981_v17 = vadd.f32 1.0, %v5460_v4  ;;  %5487 = vrcp.f32 %v3979_v41 }
 0x941   :  { %v5464_v59 = vpop.eup %5463  ;;  %v3982_v16 = vadd.f32 1.0, %v5462_v31  ;;  %5489 = vrcp.f32 %v3980_v39 }
 0x942   :  { %v5466_v49 = vpop.eup %5465  ;;  %v3983_v3 = vadd.f32 1.0, %v5464_v59  ;;  %5491 = vrcp.f32 %v3981_v17 }
 0x943   :  { %v5468_v10 = vpop.eup %5467  ;;  %v3984_v51 = vadd.f32 1.0, %v5466_v49  ;;  %5493 = vrcp.f32 %v3982_v16 }
 0x944   :  { %v5470_v6 = vpop.eup %5469  ;;  %v3977_v8 = vadd.f32 1.0, %v5468_v10  ;;  %5495 = vrcp.f32 %v3983_v3 }
 0x945   :  { %v5472_v40 = vpop.eup %5471  ;;  %v4025_v56 = vmul.f32 %v5470_v6, %v4009_v53  ;;  %5497 = vrcp.f32 %v3984_v51 }
 0x946   :  { %v5474_v14 = vpop.eup %5473  ;;  %v4026_v21 = vmul.f32 %v5472_v40, %v4010_v15  ;;  %5499 = vrcp.f32 %v3977_v8 }
 0x947   :  { %v5476_v12 = vpop.eup %5475  ;;  %v4041_v18 = vadd.f32 %v4033_v37, %v4025_v56  ;;  %v4027_v42 = vmul.f32 %v5474_v14, %v4011_v22 }
 0x948   :  { %v5478_v47 = vpop.eup %5477  ;;  %v4028_v26 = vmul.f32 %v5476_v12, %v4012_v1  ;;  %v4042_v58 = vadd.f32 %v4034_v38, %v4026_v21 }
 0x949   :  { %v5480_v7 = vpop.eup %5479  ;;  %5501 = vtanh.f32 %v4041_v18  ;;  %v4029_v54 = vmul.f32 %v5478_v47, %v4013_v30  ;;  %v4043_v9 = vadd.f32 %v4035_v46, %v4027_v42 }
 0x94a   :  { %v5482_v60 = vpop.eup %5481  ;;  %v4030_v27 = vmul.f32 %v5480_v7, %v4014_v34  ;;  %v4044_v35 = vadd.f32 %v4036_v63, %v4028_v26  ;;  %5503 = vtanh.f32 %v4042_v58 }
 0x94b   :  { %v5484_v29 = vpop.eup %5483  ;;  %v4031_v24 = vmul.f32 %v5482_v60, %v4015_v33  ;;  %v4045_v43 = vadd.f32 %v4037_v57, %v4029_v54  ;;  %5505 = vtanh.f32 %v4043_v9  ;;  %v4111_v54 = vstv %s7477_s5 }
 0x94c   :  { %v4032_v45 = vmul.f32 %v5484_v29, %v4016_v36  ;;  %v4046_v11 = vadd.f32 %v4038_v32, %v4030_v27  ;;  %5507 = vtanh.f32 %v4044_v35  ;;  %v5486_v5 = vpop.eup %5485 }
 0x94d   :  { %v4047_v50 = vadd.f32 %v4039_v28, %v4031_v24  ;;  %5509 = vtanh.f32 %v4045_v43  ;;  %v5488_v48 = vpop.eup %5487 }
 0x94e   :  { %v4048_v61 = vadd.f32 %v4040_v62, %v4032_v45  ;;  %5511 = vtanh.f32 %v4046_v11  ;;  %v5490_v19 = vpop.eup %5489 }
 0x94f   :  { %5513 = vtanh.f32 %v4047_v50  ;;  %v5492_v52 = vpop.eup %5491 }
 0x950   :  { %5515 = vtanh.f32 %v4048_v61  ;;  %v5494_v0 = vpop.eup %5493 }
 0x951   :  { %v5496_v44 = vpop.eup %5495 }
 0x952   :  { %v5498_v25 = vpop.eup %5497 }
 0x953   :  { %v5500_v2 = vpop.eup %5499 }
 0x956   :  { %v5502_v55 = vpop.eup %5501 }
 0x957   :  { %v5504_v20 = vpop.eup %5503  ;;  %v4057_v41 = vmul.f32 %v5502_v55, %v5500_v2 }
 0x958   :  { %v5506_v13 = vpop.eup %5505  ;;  %v4058_v4 = vmul.f32 %v5504_v20, %v5486_v5 }
 0x959   :  { %v5508_v39 = vpop.eup %5507  ;;  %v4072_v31 = vmul.f32 %v4384_v23, %v4057_v41  ;;  %v4059_v17 = vmul.f32 %v5506_v13, %v5488_v48 }
 0x95a   :  { %v5510_v59 = vpop.eup %5509  ;;  %v4060_v16 = vmul.f32 %v5508_v39, %v5490_v19  ;;  %v4073_v49 = vmul.f32 %v4384_v23, %v4058_v4 }
 0x95b   :  { %v5512_v53 = vpop.eup %5511  ;;  %v4103_v3 = vsel %vm1063_vm6, %v4072_v31, 0.0  ;;  %v4061_v15 = vmul.f32 %v5510_v59, %v5492_v52  ;;  %v4074_v10 = vmul.f32 %v4384_v23, %v4059_v17 }
 0x95c   :  { %v5514_v51 = vpop.eup %5513  ;;  %4104 = vadd.xlane.f32.xlu0 %v4103_v3  ;;  %v4062_v22 = vmul.f32 %v5512_v53, %v5494_v0  ;;  %v4075_v1 = vmul.f32 %v4384_v23, %v4060_v16  ;;  %v4088_v6 = vrot.slane %v4073_v49, 7 }
 0x95d   :  { %v5516_v8 = vpop.eup %5515  ;;  %v4063_v30 = vmul.f32 %v5514_v51, %v5496_v44  ;;  %v4076_v34 = vmul.f32 %v4384_v23, %v4061_v15  ;;  %v4089_v40 = vrot.slane %v4074_v10, 6 }
 0x95e   :  { %v4064_v56 = vmul.f32 %v5516_v8, %v5498_v25  ;;  %v4077_v37 = vmul.f32 %v4384_v23, %v4062_v22  ;;  %v4091_v33 = vrot.slane %v4075_v1, 5 }
 0x95f   :  { %v4078_v14 = vmul.f32 %v4384_v23, %v4063_v30  ;;  %v4090_v36 = vsel %vm1045_vm0, %v4089_v40, %v4088_v6  ;;  %v4093_v21 = vrot.slane %v4076_v34, 4 }
 0x960   :  { %v4079_v38 = vmul.f32 %v4384_v23, %v4064_v56  ;;  %v4092_v12 = vsel %vm1048_vm1, %v4091_v33, %v4090_v36  ;;  %v4095_v18 = vrot.slane %v4077_v37, 3 }
 0x961   :  { %v4094_v42 = vsel %vm1051_vm2, %v4093_v21, %v4092_v12  ;;  %v4097_v46 = vrot.slane %v4078_v14, 2 }
 0x962   :  { %v4096_v47 = vsel %vm1054_vm3, %v4095_v18, %v4094_v42  ;;  %v4099_v26 = vrot.slane %v4079_v38, 1 }
 0x963   :  { %v4098_v63 = vsel %vm1057_vm4, %v4097_v46, %v4096_v47 }
 0x964   :  { %v4100_v58 = vsel %vm1060_vm5, %v4099_v26, %v4098_v63 }
 0x965   :  { %v4107_v7 = vsel %vm4106_vm7, %v4100_v58, 0.0 }
 0x966   :  { %4108 = vadd.xlane.f32.xlu0 %v4107_v7 }
 0x9e5   :  { %v4105_v57 = vpop.xlane.xlu0 %4104 }
 0x9e6   :  { %v4112_v9 = vadd.f32 %v4111_v54, %v4105_v57 }
 0x9e8   :  { %4115 = vst.msk [vmem:[%s7478_s6 - $0x7] sm:$0x80] %vm4114_vm8, %v4112_v9 }
 0x9ef   :  { %v4109_v60 = vpop.xlane.xlu0 %4108 }
 0x9f0   :  { %v4113_v27 = vadd.f32 %v4111_v54, %v4109_v60 }
 0x9f2   :  { %4117 = vst.msk [vmem:[%s7478_s6 + $0x1] sm:$0x7f] %vm4116_vm9, %v4113_v27 }
 0x9f3   :  { %4122 = vsyncpa [#allocation4], 1 }
 0x9f4   :  { %4123 = vsyncpa [#allocation6], 1 }

</bundles_post_ra>
